<compile_context>
chip_gen: v5e
topology: v5e:2x2
jax: 0.10.0
libtpu: 0.0.40
codegen_flags: <defaults>
</compile_context>

<pallas_src>
import functools
import math

import jax
import jax.numpy as jnp
from jax.experimental import pallas as pl
from jax.experimental.pallas import tpu as pltpu


def _round_up(x, m):
    return ((x + m - 1) // m) * m


def _cdiv(a, b):
    return (a + b - 1) // b


# ------------------------------ kernel math ----------------------------------

def _layer_norm_packed(x, mmean, gamma, beta, eps=1e-5):
    """LayerNorm over each packed lane group (one original batch element).

    `mmean` is the block-diagonal (DP, DP) matrix with 1/D inside each lane
    group, so reduction + broadcast is a single f32 MXU matmul and the
    statistics stay in f32.
    """
    mean = jnp.dot(x, mmean, preferred_element_type=jnp.float32)
    xc = x - mean
    var = jnp.dot(xc * xc, mmean, preferred_element_type=jnp.float32)
    return xc * jax.lax.rsqrt(var + eps) * gamma + beta


def _encoder_layer(x, S, TB_sub, pool, spread, mmean,
                   wqkv, bqkv, wo, bo, w1, b1, w2, b2, g1, be1, g2, be2):
    """Post-norm nn.TransformerEncoderLayer (relu, eval-mode dropout).

    x is the lane-packed token slab (S*TB_sub, DP): row s*TB_sub + p holds
    token s of LP batch elements packed along lanes.  All learned weights are
    block-diagonal over the LP lane groups, so batch elements never mix.
    """
    DP = x.shape[-1]                       # lane-packed model width (LP*D = 128)

    xb = x.astype(jnp.bfloat16)
    qkv = jnp.dot(xb, wqkv, preferred_element_type=jnp.float32) + bqkv     # (rows, 3*DP)
    q = qkv[:, 0:DP]
    k = qkv[:, DP:2 * DP]
    v = qkv[:, 2 * DP:3 * DP]

    # Attention: queries batched over the whole slab, loop only over the S key
    # tokens.  Per-head score pooling / weight spreading via constant
    # block-diagonal matrices (f32, exact softmax math).
    scores = []
    for j in range(S):                                                      # static unroll (S tiny)
        k_j = k[j * TB_sub:(j + 1) * TB_sub, :]
        k_rep = jnp.concatenate([k_j] * S, axis=0)                          # (rows, DP)
        scores.append(jnp.dot(q * k_rep, pool,
                              preferred_element_type=jnp.float32))          # (rows, LP*H)
    m = scores[0]
    for j in range(1, S):
        m = jnp.maximum(m, scores[j])
    exps = [jnp.exp(s - m) for s in scores]
    denom = exps[0]
    for j in range(1, S):
        denom = denom + exps[j]
    inv = pl.reciprocal(denom)                                              # exact (EUP)

    ctx = None
    for j in range(S):
        a_full = jnp.dot(exps[j] * inv, spread,
                         preferred_element_type=jnp.float32)                # (rows, DP)
        v_j = v[j * TB_sub:(j + 1) * TB_sub, :]
        v_rep = jnp.concatenate([v_j] * S, axis=0)
        term = a_full * v_rep
        ctx = term if ctx is None else ctx + term

    sa = jnp.dot(ctx.astype(jnp.bfloat16), wo,
                 preferred_element_type=jnp.float32) + bo
    x = _layer_norm_packed(x + sa, mmean, g1, be1)

    h1 = jnp.maximum(
        jnp.dot(x.astype(jnp.bfloat16), w1, preferred_element_type=jnp.float32) + b1,
        0.0)
    h2 = jnp.dot(h1.astype(jnp.bfloat16), w2,
                 preferred_element_type=jnp.float32) + b2
    x = _layer_norm_packed(x + h2, mmean, g2, be2)
    return x


def _fusion_kernel(num_mod, num_layers, S, TB_sub, *refs):
    idx = 0
    mod_refs = refs[idx:idx + num_mod]; idx += num_mod
    pw_refs = refs[idx:idx + num_mod]; idx += num_mod
    pb_refs = refs[idx:idx + num_mod]; idx += num_mod
    (cls_ref, wqkv_ref, bqkv_ref, wo_ref, bo_ref, w1_ref, b1_ref,
     w2_ref, b2_ref, g1_ref, be1_ref, g2_ref, be2_ref,
     pool_ref, spread_ref, mmean_ref, out_ref, x_buf) = refs[idx:]

    DP = cls_ref.shape[-1]

    # ---- token assembly: sliced stores into the packed (S*TB_sub, DP) slab ---
    x_buf[pl.ds(0, TB_sub), :] = jnp.broadcast_to(cls_ref[...], (TB_sub, DP))
    for m in range(num_mod):
        proj = jnp.dot(mod_refs[m][...].astype(jnp.bfloat16), pw_refs[m][...],
                       preferred_element_type=jnp.float32) + pb_refs[m][...]
        x_buf[pl.ds((m + 1) * TB_sub, TB_sub), :] = proj
    x = x_buf[...]

    pool = pool_ref[...]
    spread = spread_ref[...]
    mmean = mmean_ref[...]

    for l in range(num_layers):                                             # static unroll
        x = _encoder_layer(
            x, S, TB_sub, pool, spread, mmean,
            wqkv_ref[l], bqkv_ref[l], wo_ref[l], bo_ref[l],
            w1_ref[l], b1_ref[l], w2_ref[l], b2_ref[l],
            g1_ref[l], be1_ref[l], g2_ref[l], be2_ref[l])

    out_ref[...] = x[0:TB_sub, :]      # CLS rows are the first TB_sub packed rows


# -------------------------------- wrapper -------------------------------------

def transformer_fusion(modalities, params, *, num_heads=8):
    num_mod = len(modalities)
    B = modalities[0].shape[0]
    D = params['cls'].shape[-1]
    L = params['in_w'].shape[0]
    S = 1 + num_mod
    H = num_heads
    assert D % H == 0
    hd = D // H
    scale = 1.0 / math.sqrt(hd)

    # lane-packing factor: LP batch elements side by side -> width LP*D (=128 at D=32)
    LP = max(1, 128 // D)
    DP = LP * D
    GRAN = 8 * LP                 # batch granularity: 8 sublanes x LP lane groups

    # batch tile: aim for >= 2 grid steps (v7x megacore) once the batch allows;
    # cap at 256 batch rows per step (VMEM / vreg pressure is tiny either way).
    B_ceil = _round_up(B, GRAN)
    if B_ceil >= 2 * GRAN:
        TB = min(256, _round_up(_cdiv(B_ceil, 2), GRAN))
    else:
        TB = GRAN
    B_pad = _round_up(B, TB)
    grid = (B_pad // TB,)
    TB_sub = TB // LP

    # ---- host-side packing / weight re-layout --------------------------------
    def bd(w):                    # (i, o) -> (LP*i, LP*o) block-diagonal replication
        return jnp.kron(jnp.eye(LP, dtype=jnp.float32), jnp.asarray(w, jnp.float32))

    def pack_vec(v):              # (n,)-like -> (1, LP*n) lane-tiled
        return jnp.tile(jnp.asarray(v, jnp.float32).reshape(1, -1), (1, LP))

    mods_packed = []
    for mod in modalities:
        mp = jnp.pad(mod.astype(jnp.float32), ((0, B_pad - B), (0, 0)))
        mods_packed.append(mp.reshape(B_pad // LP, LP * mod.shape[1]))

    proj_w = [bd(w.T).astype(jnp.bfloat16) for w in params['proj_w']]
    proj_b = [pack_vec(b) for b in params['proj_b']]
    cls = pack_vec(params['cls'].reshape(D))

    wqkv_l, bqkv_l, wo_l, bo_l, w1_l, b1_l, w2_l, b2_l = [], [], [], [], [], [], [], []
    g1_l, be1_l, g2_l, be2_l = [], [], [], []
    for l in range(L):
        iw, ib = params['in_w'][l], params['in_b'][l]
        wqkv_l.append(jnp.concatenate(
            [bd(iw[0:D].T), bd(iw[D:2 * D].T), bd(iw[2 * D:].T)],
            axis=1).astype(jnp.bfloat16))                                  # (DP, 3*DP)
        bqkv_l.append(jnp.concatenate(
            [pack_vec(ib[0:D]), pack_vec(ib[D:2 * D]), pack_vec(ib[2 * D:])], axis=1))
        wo_l.append(bd(params['out_w'][l].T).astype(jnp.bfloat16))
        bo_l.append(pack_vec(params['out_b'][l]))
        w1_l.append(bd(params['ff1_w'][l].T).astype(jnp.bfloat16))         # (DP, 4*DP)
        b1_l.append(pack_vec(params['ff1_b'][l]))
        w2_l.append(bd(params['ff2_w'][l].T).astype(jnp.bfloat16))         # (4*DP, DP)
        b2_l.append(pack_vec(params['ff2_b'][l]))
        g1_l.append(pack_vec(params['ln1_g'][l])); be1_l.append(pack_vec(params['ln1_b'][l]))
        g2_l.append(pack_vec(params['ln2_g'][l])); be2_l.append(pack_vec(params['ln2_b'][l]))

    stack = lambda xs: jnp.stack(xs, axis=0)
    wqkv, bqkv, wo, bo = stack(wqkv_l), stack(bqkv_l), stack(wo_l), stack(bo_l)
    w1, b1, w2, b2 = stack(w1_l), stack(b1_l), stack(w2_l), stack(b2_l)
    g1, be1, g2, be2 = stack(g1_l), stack(be1_l), stack(g2_l), stack(be2_l)

    # constant per-head pool/spread and LayerNorm-mean matrices (host-built, f32)
    d_idx = jnp.arange(D)[:, None] // hd
    h_idx = jnp.arange(H)[None, :]
    pool_small = jnp.where(d_idx == h_idx, scale, 0.0).astype(jnp.float32)   # (D, H)
    spread_small = (pool_small.T != 0).astype(jnp.float32)                   # (H, D)
    pool_p = bd(pool_small)                                                  # (DP, LP*H)
    spread_p = bd(spread_small)                                              # (LP*H, DP)
    mmean_p = bd(jnp.full((D, D), 1.0 / D, jnp.float32))                     # (DP, DP)

    weights = [cls, wqkv, bqkv, wo, bo, w1, b1, w2, b2,
               g1, be1, g2, be2, pool_p, spread_p, mmean_p]
    inputs = mods_packed + proj_w + proj_b + weights

    def _tile_spec(arr):
        return pl.BlockSpec((TB_sub, arr.shape[1]), lambda i: (i, 0))

    def _const_spec(arr):
        zeros = (0,) * arr.ndim
        return pl.BlockSpec(arr.shape, lambda i, z=zeros: z)   # VMEM-resident

    in_specs = ([_tile_spec(m) for m in mods_packed]
                + [_const_spec(a) for a in (proj_w + proj_b + weights)])
    out_specs = pl.BlockSpec((TB_sub, DP), lambda i: (i, 0))

    kernel = functools.partial(_fusion_kernel, num_mod, L, S, TB_sub)
    out_packed = pl.pallas_call(
        kernel,
        grid=grid,
        in_specs=in_specs,
        out_specs=out_specs,
        out_shape=jax.ShapeDtypeStruct((B_pad // LP, DP), jnp.float32),
        scratch_shapes=[pltpu.VMEM((S * TB_sub, DP), jnp.float32)],
        compiler_params=pltpu.CompilerParams(
            dimension_semantics=("parallel",)),
    )(*inputs)
    # un-pack the lane-dense CLS slab: (B_pad/LP, LP*D) -> (B_pad, D)
    return out_packed.reshape(B_pad, D)[:B]


# ----------------------- deterministic parameter init -------------------------
# Parameters are kept in PyTorch nn.Linear convention (out_features, in_features);
# the wrapper does the (free) host-side transposes / block-diag replication.

def init_params(key, input_dims, output_dim, num_layers=2):
    D = output_dim
    keys = iter(jax.random.split(key, 64))

    def lin(k, out_f, in_f):
        k1, k2 = jax.random.split(k)
        bound = 1.0 / math.sqrt(in_f)
        w = jax.random.uniform(k1, (out_f, in_f), jnp.float32, -bound, bound)
        b = jax.random.uniform(k2, (out_f,), jnp.float32, -bound, bound)
        return w, b

    proj_w, proj_b = [], []
    for dim in input_dims:
        w, b = lin(next(keys), D, dim)
        proj_w.append(w); proj_b.append(b)

    cls = 0.02 * jax.random.normal(next(keys), (1, 1, D), jnp.float32)

    stacks = {n: [] for n in ['in_w', 'in_b', 'out_w', 'out_b',
                              'ff1_w', 'ff1_b', 'ff2_w', 'ff2_b',
                              'ln1_g', 'ln1_b', 'ln2_g', 'ln2_b']}
    for _ in range(num_layers):
        w, b = lin(next(keys), 3 * D, D); stacks['in_w'].append(w); stacks['in_b'].append(b)
        w, b = lin(next(keys), D, D);     stacks['out_w'].append(w); stacks['out_b'].append(b)
        w, b = lin(next(keys), 4 * D, D); stacks['ff1_w'].append(w); stacks['ff1_b'].append(b)
        w, b = lin(next(keys), D, 4 * D); stacks['ff2_w'].append(w); stacks['ff2_b'].append(b)
        stacks['ln1_g'].append(jnp.ones((D,), jnp.float32))
        stacks['ln1_b'].append(jnp.zeros((D,), jnp.float32))
        stacks['ln2_g'].append(jnp.ones((D,), jnp.float32))
        stacks['ln2_b'].append(jnp.zeros((D,), jnp.float32))

    out = dict(proj_w=proj_w, proj_b=proj_b, cls=cls)
    out.update({k: jnp.stack(v, axis=0) for k, v in stacks.items()})
    return out


# --------------- independent pure-JAX reference (PyTorch semantics, f32) ------

def reference_forward(modalities, params, *, num_heads=8):
    B = modalities[0].shape[0]
    D = params['cls'].shape[-1]
    hd = D // num_heads
    projected = [m @ w.T + b for m, w, b in
                 zip(modalities, params['proj_w'], params['proj_b'])]
    x = jnp.concatenate([jnp.broadcast_to(params['cls'], (B, 1, D))]
                        + [p[:, None, :] for p in projected], axis=1)     # (B,S,D)
    S = x.shape[1]
    L = params['in_w'].shape[0]

    def ln(y, g, b, eps=1e-5):
        mu = y.mean(-1, keepdims=True)
        var = ((y - mu) ** 2).mean(-1, keepdims=True)
        return (y - mu) / jnp.sqrt(var + eps) * g + b

    for l in range(L):
        qkv = x @ params['in_w'][l].T + params['in_b'][l]                 # (B,S,3D)
        q, k, v = qkv[..., :D], qkv[..., D:2 * D], qkv[..., 2 * D:]

        def split(t):
            return t.reshape(B, S, num_heads, hd).transpose(0, 2, 1, 3)

        qh, kh, vh = split(q), split(k), split(v)
        s = jnp.einsum('bhqe,bhke->bhqk', qh, kh) / math.sqrt(hd)
        a = jax.nn.softmax(s, axis=-1)
        ctx = jnp.einsum('bhqk,bhke->bhqe', a, vh)
        ctx = ctx.transpose(0, 2, 1, 3).reshape(B, S, D)
        sa = ctx @ params['out_w'][l].T + params['out_b'][l]
        x = ln(x + sa, params['ln1_g'][l], params['ln1_b'][l])
        h1 = jax.nn.relu(x @ params['ff1_w'][l].T + params['ff1_b'][l])
        h2 = h1 @ params['ff2_w'][l].T + params['ff2_b'][l]
        x = ln(x + h2, params['ln2_g'][l], params['ln2_b'][l])
    return x[:, 0, :]


# ----------------------------------- main --------------------------------------

if __name__ == "__main__":
    key = jax.random.PRNGKey(0)
    input_dims = [48, 32]     # two modalities
    output_dim = 32           # d_model (divisible by nhead=8)
    batch = 2

    k_param, k_m0, k_m1 = jax.random.split(key, 3)
    params = init_params(k_param, input_dims, output_dim, num_layers=2)
    modalities = [
        jax.random.normal(k_m0, (batch, input_dims[0]), jnp.float32),
        jax.random.normal(k_m1, (batch, input_dims[1]), jnp.float32),
    ]

    out = transformer_fusion(modalities, params)
    out = jax.block_until_ready(out)
    assert out.shape == (batch, output_dim)

    # Reference is pure f32; the kernel runs bf16 MXU matmuls with f32
    # accumulation (LayerNorm/softmax in f32), so allow ~bf16-level drift.
    ref = reference_forward(modalities, params)
    if not bool(jnp.allclose(out, ref, atol=2e-2, rtol=2e-2)):
        raise AssertionError(
            f"kernel/reference mismatch, max abs diff = "
            f"{float(jnp.max(jnp.abs(out - ref)))}")

    print("KERNEL_OK")
</pallas_src>

<mosaic_0001>
module attributes {stable_mosaic.version = 11 : i64} {
  func.func @_fusion_kernel(%arg0: i32, %arg1: memref<8x192xf32, #tpu.memory_space<vmem>>, %arg2: memref<8x128xf32, #tpu.memory_space<vmem>>, %arg3: memref<192x128xbf16, #tpu.memory_space<vmem>>, %arg4: memref<128x128xbf16, #tpu.memory_space<vmem>>, %arg5: memref<1x128xf32, #tpu.memory_space<vmem>>, %arg6: memref<1x128xf32, #tpu.memory_space<vmem>>, %arg7: memref<1x128xf32, #tpu.memory_space<vmem>>, %arg8: memref<2x128x384xbf16, #tpu.memory_space<vmem>>, %arg9: memref<2x1x384xf32, #tpu.memory_space<vmem>>, %arg10: memref<2x128x128xbf16, #tpu.memory_space<vmem>>, %arg11: memref<2x1x128xf32, #tpu.memory_space<vmem>>, %arg12: memref<2x128x512xbf16, #tpu.memory_space<vmem>>, %arg13: memref<2x1x512xf32, #tpu.memory_space<vmem>>, %arg14: memref<2x512x128xbf16, #tpu.memory_space<vmem>>, %arg15: memref<2x1x128xf32, #tpu.memory_space<vmem>>, %arg16: memref<2x1x128xf32, #tpu.memory_space<vmem>>, %arg17: memref<2x1x128xf32, #tpu.memory_space<vmem>>, %arg18: memref<2x1x128xf32, #tpu.memory_space<vmem>>, %arg19: memref<2x1x128xf32, #tpu.memory_space<vmem>>, %arg20: memref<128x32xf32, #tpu.memory_space<vmem>>, %arg21: memref<32x128xf32, #tpu.memory_space<vmem>>, %arg22: memref<128x128xf32, #tpu.memory_space<vmem>>, %arg23: memref<8x128xf32, #tpu.memory_space<vmem>>, %arg24: memref<24x128xf32, #tpu.memory_space<vmem>>) attributes {dimension_semantics = [#tpu.dimension_semantics<parallel>], iteration_bounds = array<i64: 1>, scalar_prefetch = 0 : i64, scratch_operands = 1 : i64, tpu.core_type = #tpu.core_type<tc>, window_params = [{transform_indices = @transform_0, window_bounds = array<i64: 8, 192>}, {transform_indices = @transform_1, window_bounds = array<i64: 8, 128>}, {pipeline_mode = #tpu.pipeline_mode<synchronous>, transform_indices = @transform_2, window_bounds = array<i64: 192, 128>}, {pipeline_mode = #tpu.pipeline_mode<synchronous>, transform_indices = @transform_3, window_bounds = array<i64: 128, 128>}, {pipeline_mode = #tpu.pipeline_mode<synchronous>, transform_indices = @transform_4, window_bounds = array<i64: 1, 128>}, {pipeline_mode = #tpu.pipeline_mode<synchronous>, transform_indices = @transform_5, window_bounds = array<i64: 1, 128>}, {pipeline_mode = #tpu.pipeline_mode<synchronous>, transform_indices = @transform_6, window_bounds = array<i64: 1, 128>}, {pipeline_mode = #tpu.pipeline_mode<synchronous>, transform_indices = @transform_7, window_bounds = array<i64: 2, 128, 384>}, {pipeline_mode = #tpu.pipeline_mode<synchronous>, transform_indices = @transform_8, window_bounds = array<i64: 2, 1, 384>}, {pipeline_mode = #tpu.pipeline_mode<synchronous>, transform_indices = @transform_9, window_bounds = array<i64: 2, 128, 128>}, {pipeline_mode = #tpu.pipeline_mode<synchronous>, transform_indices = @transform_10, window_bounds = array<i64: 2, 1, 128>}, {pipeline_mode = #tpu.pipeline_mode<synchronous>, transform_indices = @transform_11, window_bounds = array<i64: 2, 128, 512>}, {pipeline_mode = #tpu.pipeline_mode<synchronous>, transform_indices = @transform_12, window_bounds = array<i64: 2, 1, 512>}, {pipeline_mode = #tpu.pipeline_mode<synchronous>, transform_indices = @transform_13, window_bounds = array<i64: 2, 512, 128>}, {pipeline_mode = #tpu.pipeline_mode<synchronous>, transform_indices = @transform_14, window_bounds = array<i64: 2, 1, 128>}, {pipeline_mode = #tpu.pipeline_mode<synchronous>, transform_indices = @transform_15, window_bounds = array<i64: 2, 1, 128>}, {pipeline_mode = #tpu.pipeline_mode<synchronous>, transform_indices = @transform_16, window_bounds = array<i64: 2, 1, 128>}, {pipeline_mode = #tpu.pipeline_mode<synchronous>, transform_indices = @transform_17, window_bounds = array<i64: 2, 1, 128>}, {pipeline_mode = #tpu.pipeline_mode<synchronous>, transform_indices = @transform_18, window_bounds = array<i64: 2, 1, 128>}, {pipeline_mode = #tpu.pipeline_mode<synchronous>, transform_indices = @transform_19, window_bounds = array<i64: 128, 32>}, {pipeline_mode = #tpu.pipeline_mode<synchronous>, transform_indices = @transform_20, window_bounds = array<i64: 32, 128>}, {pipeline_mode = #tpu.pipeline_mode<synchronous>, transform_indices = @transform_21, window_bounds = array<i64: 128, 128>}, {transform_indices = @transform_22, window_bounds = array<i64: 8, 128>}]} {
    %c0 = arith.constant 0 : index
    %c0_0 = arith.constant 0 : index
    %0 = vector.load %arg7[%c0, %c0_0] : memref<1x128xf32, #tpu.memory_space<vmem>>, vector<1x128xf32>
    %1 = vector.shape_cast %0 : vector<1x128xf32> to vector<1x128xf32>
    %2 = vector.broadcast %1 : vector<1x128xf32> to vector<8x128xf32>
    %c0_1 = arith.constant 0 : index
    %c0_2 = arith.constant 0 : index
    %3 = vector.load %arg24[%c0_1, %c0_2] : memref<24x128xf32, #tpu.memory_space<vmem>>, vector<8x128xf32>
    tpu.vector_store %arg24[%c0_1, %c0_2], %2 {strides = array<i32>} : memref<24x128xf32, #tpu.memory_space<vmem>>, vector<8x128xf32>,
    %c0_3 = arith.constant 0 : index
    %c0_4 = arith.constant 0 : index
    %4 = vector.load %arg1[%c0_3, %c0_4] : memref<8x192xf32, #tpu.memory_space<vmem>>, vector<8x192xf32>
    %5 = arith.truncf %4 : vector<8x192xf32> to vector<8x192xbf16>
    %c0_5 = arith.constant 0 : index
    %c0_6 = arith.constant 0 : index
    %6 = vector.load %arg3[%c0_5, %c0_6] : memref<192x128xbf16, #tpu.memory_space<vmem>>, vector<192x128xbf16>
    %cst = arith.constant dense<0.000000e+00> : vector<8x128xf32>
    %7 = tpu.matmul %5, %6, %cst {dimension_numbers = #tpu.dot_dimension_numbers<[1], [0], [0], [1], [0, 0, 1, 1], [], []>} : vector<8x192xbf16>, vector<192x128xbf16>, vector<8x128xf32> -> vector<8x128xf32>
    %c0_7 = arith.constant 0 : index
    %c0_8 = arith.constant 0 : index
    %8 = vector.load %arg5[%c0_7, %c0_8] : memref<1x128xf32, #tpu.memory_space<vmem>>, vector<1x128xf32>
    %9 = vector.broadcast %8 : vector<1x128xf32> to vector<8x128xf32>
    %10 = arith.addf %7, %9 : vector<8x128xf32>
    %c8 = arith.constant 8 : index
    %c0_9 = arith.constant 0 : index
    %11 = vector.load %arg24[%c8, %c0_9] : memref<24x128xf32, #tpu.memory_space<vmem>>, vector<8x128xf32>
    tpu.vector_store %arg24[%c8, %c0_9], %10 {strides = array<i32>} : memref<24x128xf32, #tpu.memory_space<vmem>>, vector<8x128xf32>,
    %c0_10 = arith.constant 0 : index
    %c0_11 = arith.constant 0 : index
    %12 = vector.load %arg2[%c0_10, %c0_11] : memref<8x128xf32, #tpu.memory_space<vmem>>, vector<8x128xf32>
    %13 = arith.truncf %12 : vector<8x128xf32> to vector<8x128xbf16>
    %c0_12 = arith.constant 0 : index
    %c0_13 = arith.constant 0 : index
    %14 = vector.load %arg4[%c0_12, %c0_13] : memref<128x128xbf16, #tpu.memory_space<vmem>>, vector<128x128xbf16>
    %cst_14 = arith.constant dense<0.000000e+00> : vector<8x128xf32>
    %15 = tpu.matmul %13, %14, %cst_14 {dimension_numbers = #tpu.dot_dimension_numbers<[1], [0], [0], [1], [0, 0, 1, 1], [], []>} : vector<8x128xbf16>, vector<128x128xbf16>, vector<8x128xf32> -> vector<8x128xf32>
    %c0_15 = arith.constant 0 : index
    %c0_16 = arith.constant 0 : index
    %16 = vector.load %arg6[%c0_15, %c0_16] : memref<1x128xf32, #tpu.memory_space<vmem>>, vector<1x128xf32>
    %17 = vector.broadcast %16 : vector<1x128xf32> to vector<8x128xf32>
    %18 = arith.addf %15, %17 : vector<8x128xf32>
    %c16 = arith.constant 16 : index
    %c0_17 = arith.constant 0 : index
    %19 = vector.load %arg24[%c16, %c0_17] : memref<24x128xf32, #tpu.memory_space<vmem>>, vector<8x128xf32>
    tpu.vector_store %arg24[%c16, %c0_17], %18 {strides = array<i32>} : memref<24x128xf32, #tpu.memory_space<vmem>>, vector<8x128xf32>,
    %c0_18 = arith.constant 0 : index
    %c0_19 = arith.constant 0 : index
    %20 = vector.load %arg24[%c0_18, %c0_19] : memref<24x128xf32, #tpu.memory_space<vmem>>, vector<24x128xf32>
    %c0_20 = arith.constant 0 : index
    %c0_21 = arith.constant 0 : index
    %21 = vector.load %arg20[%c0_20, %c0_21] : memref<128x32xf32, #tpu.memory_space<vmem>>, vector<128x32xf32>
    %c0_22 = arith.constant 0 : index
    %c0_23 = arith.constant 0 : index
    %22 = vector.load %arg21[%c0_22, %c0_23] : memref<32x128xf32, #tpu.memory_space<vmem>>, vector<32x128xf32>
    %c0_24 = arith.constant 0 : index
    %c0_25 = arith.constant 0 : index
    %23 = vector.load %arg22[%c0_24, %c0_25] : memref<128x128xf32, #tpu.memory_space<vmem>>, vector<128x128xf32>
    %c0_26 = arith.constant 0 : index
    %c0_27 = arith.constant 0 : index
    %c0_28 = arith.constant 0 : index
    %24 = vector.load %arg8[%c0_26, %c0_27, %c0_28] : memref<2x128x384xbf16, #tpu.memory_space<vmem>>, vector<1x128x384xbf16>
    %25 = vector.shape_cast %24 : vector<1x128x384xbf16> to vector<128x384xbf16>
    %c0_29 = arith.constant 0 : index
    %c0_30 = arith.constant 0 : index
    %c0_31 = arith.constant 0 : index
    %26 = vector.load %arg9[%c0_29, %c0_30, %c0_31] : memref<2x1x384xf32, #tpu.memory_space<vmem>>, vector<1x1x384xf32>
    %27 = vector.shape_cast %26 : vector<1x1x384xf32> to vector<1x384xf32>
    %c0_32 = arith.constant 0 : index
    %c0_33 = arith.constant 0 : index
    %c0_34 = arith.constant 0 : index
    %28 = vector.load %arg10[%c0_32, %c0_33, %c0_34] : memref<2x128x128xbf16, #tpu.memory_space<vmem>>, vector<1x128x128xbf16>
    %29 = vector.shape_cast %28 : vector<1x128x128xbf16> to vector<128x128xbf16>
    %c0_35 = arith.constant 0 : index
    %c0_36 = arith.constant 0 : index
    %c0_37 = arith.constant 0 : index
    %30 = vector.load %arg11[%c0_35, %c0_36, %c0_37] : memref<2x1x128xf32, #tpu.memory_space<vmem>>, vector<1x1x128xf32>
    %31 = vector.shape_cast %30 : vector<1x1x128xf32> to vector<1x128xf32>
    %c0_38 = arith.constant 0 : index
    %c0_39 = arith.constant 0 : index
    %c0_40 = arith.constant 0 : index
    %32 = vector.load %arg12[%c0_38, %c0_39, %c0_40] : memref<2x128x512xbf16, #tpu.memory_space<vmem>>, vector<1x128x512xbf16>
    %33 = vector.shape_cast %32 : vector<1x128x512xbf16> to vector<128x512xbf16>
    %c0_41 = arith.constant 0 : index
    %c0_42 = arith.constant 0 : index
    %c0_43 = arith.constant 0 : index
    %34 = vector.load %arg13[%c0_41, %c0_42, %c0_43] : memref<2x1x512xf32, #tpu.memory_space<vmem>>, vector<1x1x512xf32>
    %35 = vector.shape_cast %34 : vector<1x1x512xf32> to vector<1x512xf32>
    %c0_44 = arith.constant 0 : index
    %c0_45 = arith.constant 0 : index
    %c0_46 = arith.constant 0 : index
    %36 = vector.load %arg14[%c0_44, %c0_45, %c0_46] : memref<2x512x128xbf16, #tpu.memory_space<vmem>>, vector<1x512x128xbf16>
    %37 = vector.shape_cast %36 : vector<1x512x128xbf16> to vector<512x128xbf16>
    %c0_47 = arith.constant 0 : index
    %c0_48 = arith.constant 0 : index
    %c0_49 = arith.constant 0 : index
    %38 = vector.load %arg15[%c0_47, %c0_48, %c0_49] : memref<2x1x128xf32, #tpu.memory_space<vmem>>, vector<1x1x128xf32>
    %39 = vector.shape_cast %38 : vector<1x1x128xf32> to vector<1x128xf32>
    %c0_50 = arith.constant 0 : index
    %c0_51 = arith.constant 0 : index
    %c0_52 = arith.constant 0 : index
    %40 = vector.load %arg16[%c0_50, %c0_51, %c0_52] : memref<2x1x128xf32, #tpu.memory_space<vmem>>, vector<1x1x128xf32>
    %41 = vector.shape_cast %40 : vector<1x1x128xf32> to vector<1x128xf32>
    %c0_53 = arith.constant 0 : index
    %c0_54 = arith.constant 0 : index
    %c0_55 = arith.constant 0 : index
    %42 = vector.load %arg17[%c0_53, %c0_54, %c0_55] : memref<2x1x128xf32, #tpu.memory_space<vmem>>, vector<1x1x128xf32>
    %43 = vector.shape_cast %42 : vector<1x1x128xf32> to vector<1x128xf32>
    %c0_56 = arith.constant 0 : index
    %c0_57 = arith.constant 0 : index
    %c0_58 = arith.constant 0 : index
    %44 = vector.load %arg18[%c0_56, %c0_57, %c0_58] : memref<2x1x128xf32, #tpu.memory_space<vmem>>, vector<1x1x128xf32>
    %45 = vector.shape_cast %44 : vector<1x1x128xf32> to vector<1x128xf32>
    %c0_59 = arith.constant 0 : index
    %c0_60 = arith.constant 0 : index
    %c0_61 = arith.constant 0 : index
    %46 = vector.load %arg19[%c0_59, %c0_60, %c0_61] : memref<2x1x128xf32, #tpu.memory_space<vmem>>, vector<1x1x128xf32>
    %47 = vector.shape_cast %46 : vector<1x1x128xf32> to vector<1x128xf32>
    %48 = arith.truncf %20 : vector<24x128xf32> to vector<24x128xbf16>
    %cst_62 = arith.constant dense<0.000000e+00> : vector<24x384xf32>
    %49 = tpu.matmul %48, %25, %cst_62 {dimension_numbers = #tpu.dot_dimension_numbers<[1], [0], [0], [1], [0, 0, 1, 1], [], []>} : vector<24x128xbf16>, vector<128x384xbf16>, vector<24x384xf32> -> vector<24x384xf32>
    %50 = vector.broadcast %27 : vector<1x384xf32> to vector<24x384xf32>
    %51 = arith.addf %49, %50 : vector<24x384xf32>
    %52 = vector.extract_strided_slice %51 {offsets = [0, 0], sizes = [24, 128], strides = [1, 1]} : vector<24x384xf32> to vector<24x128xf32>
    %53 = vector.extract_strided_slice %51 {offsets = [0, 128], sizes = [24, 128], strides = [1, 1]} : vector<24x384xf32> to vector<24x128xf32>
    %54 = vector.extract_strided_slice %51 {offsets = [0, 256], sizes = [24, 128], strides = [1, 1]} : vector<24x384xf32> to vector<24x128xf32>
    %55 = vector.extract_strided_slice %53 {offsets = [0, 0], sizes = [8, 128], strides = [1, 1]} : vector<24x128xf32> to vector<8x128xf32>
    %56 = tpu.concatenate %55, %55, %55 in 0 : vector<8x128xf32>, vector<8x128xf32>, vector<8x128xf32> -> vector<24x128xf32>
    %57 = arith.mulf %52, %56 : vector<24x128xf32>
    %cst_63 = arith.constant dense<0.000000e+00> : vector<24x32xf32>
    %58 = tpu.matmul %57, %21, %cst_63 {dimension_numbers = #tpu.dot_dimension_numbers<[1], [0], [0], [1], [0, 0, 1, 1], [], []>} : vector<24x128xf32>, vector<128x32xf32>, vector<24x32xf32> -> vector<24x32xf32>
    %59 = vector.extract_strided_slice %53 {offsets = [8, 0], sizes = [8, 128], strides = [1, 1]} : vector<24x128xf32> to vector<8x128xf32>
    %60 = tpu.concatenate %59, %59, %59 in 0 : vector<8x128xf32>, vector<8x128xf32>, vector<8x128xf32> -> vector<24x128xf32>
    %61 = arith.mulf %52, %60 : vector<24x128xf32>
    %cst_64 = arith.constant dense<0.000000e+00> : vector<24x32xf32>
    %62 = tpu.matmul %61, %21, %cst_64 {dimension_numbers = #tpu.dot_dimension_numbers<[1], [0], [0], [1], [0, 0, 1, 1], [], []>} : vector<24x128xf32>, vector<128x32xf32>, vector<24x32xf32> -> vector<24x32xf32>
    %63 = vector.extract_strided_slice %53 {offsets = [16, 0], sizes = [8, 128], strides = [1, 1]} : vector<24x128xf32> to vector<8x128xf32>
    %64 = tpu.concatenate %63, %63, %63 in 0 : vector<8x128xf32>, vector<8x128xf32>, vector<8x128xf32> -> vector<24x128xf32>
    %65 = arith.mulf %52, %64 : vector<24x128xf32>
    %cst_65 = arith.constant dense<0.000000e+00> : vector<24x32xf32>
    %66 = tpu.matmul %65, %21, %cst_65 {dimension_numbers = #tpu.dot_dimension_numbers<[1], [0], [0], [1], [0, 0, 1, 1], [], []>} : vector<24x128xf32>, vector<128x32xf32>, vector<24x32xf32> -> vector<24x32xf32>
    %67 = arith.maximumf %58, %62 : vector<24x32xf32>
    %68 = arith.maximumf %67, %66 : vector<24x32xf32>
    %69 = arith.subf %58, %68 : vector<24x32xf32>
    %70 = math.exp %69 : vector<24x32xf32>
    %71 = arith.subf %62, %68 : vector<24x32xf32>
    %72 = math.exp %71 : vector<24x32xf32>
    %73 = arith.subf %66, %68 : vector<24x32xf32>
    %74 = math.exp %73 : vector<24x32xf32>
    %75 = arith.addf %70, %72 : vector<24x32xf32>
    %76 = arith.addf %75, %74 : vector<24x32xf32>
    %77 = tpu.reciprocal %76 : vector<24x32xf32> -> vector<24x32xf32>
    %78 = arith.mulf %70, %77 : vector<24x32xf32>
    %cst_66 = arith.constant dense<0.000000e+00> : vector<24x128xf32>
    %79 = tpu.matmul %78, %22, %cst_66 {dimension_numbers = #tpu.dot_dimension_numbers<[1], [0], [0], [1], [0, 0, 1, 1], [], []>} : vector<24x32xf32>, vector<32x128xf32>, vector<24x128xf32> -> vector<24x128xf32>
    %80 = vector.extract_strided_slice %54 {offsets = [0, 0], sizes = [8, 128], strides = [1, 1]} : vector<24x128xf32> to vector<8x128xf32>
    %81 = tpu.concatenate %80, %80, %80 in 0 : vector<8x128xf32>, vector<8x128xf32>, vector<8x128xf32> -> vector<24x128xf32>
    %82 = arith.mulf %79, %81 : vector<24x128xf32>
    %83 = arith.mulf %72, %77 : vector<24x32xf32>
    %cst_67 = arith.constant dense<0.000000e+00> : vector<24x128xf32>
    %84 = tpu.matmul %83, %22, %cst_67 {dimension_numbers = #tpu.dot_dimension_numbers<[1], [0], [0], [1], [0, 0, 1, 1], [], []>} : vector<24x32xf32>, vector<32x128xf32>, vector<24x128xf32> -> vector<24x128xf32>
    %85 = vector.extract_strided_slice %54 {offsets = [8, 0], sizes = [8, 128], strides = [1, 1]} : vector<24x128xf32> to vector<8x128xf32>
    %86 = tpu.concatenate %85, %85, %85 in 0 : vector<8x128xf32>, vector<8x128xf32>, vector<8x128xf32> -> vector<24x128xf32>
    %87 = arith.mulf %84, %86 : vector<24x128xf32>
    %88 = arith.addf %82, %87 : vector<24x128xf32>
    %89 = arith.mulf %74, %77 : vector<24x32xf32>
    %cst_68 = arith.constant dense<0.000000e+00> : vector<24x128xf32>
    %90 = tpu.matmul %89, %22, %cst_68 {dimension_numbers = #tpu.dot_dimension_numbers<[1], [0], [0], [1], [0, 0, 1, 1], [], []>} : vector<24x32xf32>, vector<32x128xf32>, vector<24x128xf32> -> vector<24x128xf32>
    %91 = vector.extract_strided_slice %54 {offsets = [16, 0], sizes = [8, 128], strides = [1, 1]} : vector<24x128xf32> to vector<8x128xf32>
    %92 = tpu.concatenate %91, %91, %91 in 0 : vector<8x128xf32>, vector<8x128xf32>, vector<8x128xf32> -> vector<24x128xf32>
    %93 = arith.mulf %90, %92 : vector<24x128xf32>
    %94 = arith.addf %88, %93 : vector<24x128xf32>
    %95 = arith.truncf %94 : vector<24x128xf32> to vector<24x128xbf16>
    %cst_69 = arith.constant dense<0.000000e+00> : vector<24x128xf32>
    %96 = tpu.matmul %95, %29, %cst_69 {dimension_numbers = #tpu.dot_dimension_numbers<[1], [0], [0], [1], [0, 0, 1, 1], [], []>} : vector<24x128xbf16>, vector<128x128xbf16>, vector<24x128xf32> -> vector<24x128xf32>
    %97 = vector.broadcast %31 : vector<1x128xf32> to vector<24x128xf32>
    %98 = arith.addf %96, %97 : vector<24x128xf32>
    %99 = arith.addf %20, %98 : vector<24x128xf32>
    %cst_70 = arith.constant dense<0.000000e+00> : vector<24x128xf32>
    %100 = tpu.matmul %99, %23, %cst_70 {dimension_numbers = #tpu.dot_dimension_numbers<[1], [0], [0], [1], [0, 0, 1, 1], [], []>} : vector<24x128xf32>, vector<128x128xf32>, vector<24x128xf32> -> vector<24x128xf32>
    %101 = arith.subf %99, %100 : vector<24x128xf32>
    %102 = arith.mulf %101, %101 : vector<24x128xf32>
    %cst_71 = arith.constant dense<0.000000e+00> : vector<24x128xf32>
    %103 = tpu.matmul %102, %23, %cst_71 {dimension_numbers = #tpu.dot_dimension_numbers<[1], [0], [0], [1], [0, 0, 1, 1], [], []>} : vector<24x128xf32>, vector<128x128xf32>, vector<24x128xf32> -> vector<24x128xf32>
    %cst_72 = arith.constant 9.99999974E-6 : f32
    %104 = vector.broadcast %cst_72 : f32 to vector<24x128xf32>
    %105 = arith.addf %103, %104 : vector<24x128xf32>
    %106 = math.rsqrt %105 : vector<24x128xf32>
    %107 = arith.mulf %101, %106 : vector<24x128xf32>
    %108 = vector.broadcast %41 : vector<1x128xf32> to vector<24x128xf32>
    %109 = arith.mulf %107, %108 : vector<24x128xf32>
    %110 = vector.broadcast %43 : vector<1x128xf32> to vector<24x128xf32>
    %111 = arith.addf %109, %110 : vector<24x128xf32>
    %112 = arith.truncf %111 : vector<24x128xf32> to vector<24x128xbf16>
    %cst_73 = arith.constant dense<0.000000e+00> : vector<24x512xf32>
    %113 = tpu.matmul %112, %33, %cst_73 {dimension_numbers = #tpu.dot_dimension_numbers<[1], [0], [0], [1], [0, 0, 1, 1], [], []>} : vector<24x128xbf16>, vector<128x512xbf16>, vector<24x512xf32> -> vector<24x512xf32>
    %114 = vector.broadcast %35 : vector<1x512xf32> to vector<24x512xf32>
    %115 = arith.addf %113, %114 : vector<24x512xf32>
    %cst_74 = arith.constant 0.000000e+00 : f32
    %116 = vector.broadcast %cst_74 : f32 to vector<24x512xf32>
    %117 = arith.maximumf %115, %116 : vector<24x512xf32>
    %118 = arith.truncf %117 : vector<24x512xf32> to vector<24x512xbf16>
    %cst_75 = arith.constant dense<0.000000e+00> : vector<24x128xf32>
    %119 = tpu.matmul %118, %37, %cst_75 {dimension_numbers = #tpu.dot_dimension_numbers<[1], [0], [0], [1], [0, 0, 1, 1], [], []>} : vector<24x512xbf16>, vector<512x128xbf16>, vector<24x128xf32> -> vector<24x128xf32>
    %120 = vector.broadcast %39 : vector<1x128xf32> to vector<24x128xf32>
    %121 = arith.addf %119, %120 : vector<24x128xf32>
    %122 = arith.addf %111, %121 : vector<24x128xf32>
    %cst_76 = arith.constant dense<0.000000e+00> : vector<24x128xf32>
    %123 = tpu.matmul %122, %23, %cst_76 {dimension_numbers = #tpu.dot_dimension_numbers<[1], [0], [0], [1], [0, 0, 1, 1], [], []>} : vector<24x128xf32>, vector<128x128xf32>, vector<24x128xf32> -> vector<24x128xf32>
    %124 = arith.subf %122, %123 : vector<24x128xf32>
    %125 = arith.mulf %124, %124 : vector<24x128xf32>
    %cst_77 = arith.constant dense<0.000000e+00> : vector<24x128xf32>
    %126 = tpu.matmul %125, %23, %cst_77 {dimension_numbers = #tpu.dot_dimension_numbers<[1], [0], [0], [1], [0, 0, 1, 1], [], []>} : vector<24x128xf32>, vector<128x128xf32>, vector<24x128xf32> -> vector<24x128xf32>
    %cst_78 = arith.constant 9.99999974E-6 : f32
    %127 = vector.broadcast %cst_78 : f32 to vector<24x128xf32>
    %128 = arith.addf %126, %127 : vector<24x128xf32>
    %129 = math.rsqrt %128 : vector<24x128xf32>
    %130 = arith.mulf %124, %129 : vector<24x128xf32>
    %131 = vector.broadcast %45 : vector<1x128xf32> to vector<24x128xf32>
    %132 = arith.mulf %130, %131 : vector<24x128xf32>
    %133 = vector.broadcast %47 : vector<1x128xf32> to vector<24x128xf32>
    %134 = arith.addf %132, %133 : vector<24x128xf32>
    %c1 = arith.constant 1 : index
    %c0_79 = arith.constant 0 : index
    %c0_80 = arith.constant 0 : index
    %135 = vector.load %arg8[%c1, %c0_79, %c0_80] : memref<2x128x384xbf16, #tpu.memory_space<vmem>>, vector<1x128x384xbf16>
    %136 = vector.shape_cast %135 : vector<1x128x384xbf16> to vector<128x384xbf16>
    %c1_81 = arith.constant 1 : index
    %c0_82 = arith.constant 0 : index
    %c0_83 = arith.constant 0 : index
    %137 = vector.load %arg9[%c1_81, %c0_82, %c0_83] : memref<2x1x384xf32, #tpu.memory_space<vmem>>, vector<1x1x384xf32>
    %138 = vector.shape_cast %137 : vector<1x1x384xf32> to vector<1x384xf32>
    %c1_84 = arith.constant 1 : index
    %c0_85 = arith.constant 0 : index
    %c0_86 = arith.constant 0 : index
    %139 = vector.load %arg10[%c1_84, %c0_85, %c0_86] : memref<2x128x128xbf16, #tpu.memory_space<vmem>>, vector<1x128x128xbf16>
    %140 = vector.shape_cast %139 : vector<1x128x128xbf16> to vector<128x128xbf16>
    %c1_87 = arith.constant 1 : index
    %c0_88 = arith.constant 0 : index
    %c0_89 = arith.constant 0 : index
    %141 = vector.load %arg11[%c1_87, %c0_88, %c0_89] : memref<2x1x128xf32, #tpu.memory_space<vmem>>, vector<1x1x128xf32>
    %142 = vector.shape_cast %141 : vector<1x1x128xf32> to vector<1x128xf32>
    %c1_90 = arith.constant 1 : index
    %c0_91 = arith.constant 0 : index
    %c0_92 = arith.constant 0 : index
    %143 = vector.load %arg12[%c1_90, %c0_91, %c0_92] : memref<2x128x512xbf16, #tpu.memory_space<vmem>>, vector<1x128x512xbf16>
    %144 = vector.shape_cast %143 : vector<1x128x512xbf16> to vector<128x512xbf16>
    %c1_93 = arith.constant 1 : index
    %c0_94 = arith.constant 0 : index
    %c0_95 = arith.constant 0 : index
    %145 = vector.load %arg13[%c1_93, %c0_94, %c0_95] : memref<2x1x512xf32, #tpu.memory_space<vmem>>, vector<1x1x512xf32>
    %146 = vector.shape_cast %145 : vector<1x1x512xf32> to vector<1x512xf32>
    %c1_96 = arith.constant 1 : index
    %c0_97 = arith.constant 0 : index
    %c0_98 = arith.constant 0 : index
    %147 = vector.load %arg14[%c1_96, %c0_97, %c0_98] : memref<2x512x128xbf16, #tpu.memory_space<vmem>>, vector<1x512x128xbf16>
    %148 = vector.shape_cast %147 : vector<1x512x128xbf16> to vector<512x128xbf16>
    %c1_99 = arith.constant 1 : index
    %c0_100 = arith.constant 0 : index
    %c0_101 = arith.constant 0 : index
    %149 = vector.load %arg15[%c1_99, %c0_100, %c0_101] : memref<2x1x128xf32, #tpu.memory_space<vmem>>, vector<1x1x128xf32>
    %150 = vector.shape_cast %149 : vector<1x1x128xf32> to vector<1x128xf32>
    %c1_102 = arith.constant 1 : index
    %c0_103 = arith.constant 0 : index
    %c0_104 = arith.constant 0 : index
    %151 = vector.load %arg16[%c1_102, %c0_103, %c0_104] : memref<2x1x128xf32, #tpu.memory_space<vmem>>, vector<1x1x128xf32>
    %152 = vector.shape_cast %151 : vector<1x1x128xf32> to vector<1x128xf32>
    %c1_105 = arith.constant 1 : index
    %c0_106 = arith.constant 0 : index
    %c0_107 = arith.constant 0 : index
    %153 = vector.load %arg17[%c1_105, %c0_106, %c0_107] : memref<2x1x128xf32, #tpu.memory_space<vmem>>, vector<1x1x128xf32>
    %154 = vector.shape_cast %153 : vector<1x1x128xf32> to vector<1x128xf32>
    %c1_108 = arith.constant 1 : index
    %c0_109 = arith.constant 0 : index
    %c0_110 = arith.constant 0 : index
    %155 = vector.load %arg18[%c1_108, %c0_109, %c0_110] : memref<2x1x128xf32, #tpu.memory_space<vmem>>, vector<1x1x128xf32>
    %156 = vector.shape_cast %155 : vector<1x1x128xf32> to vector<1x128xf32>
    %c1_111 = arith.constant 1 : index
    %c0_112 = arith.constant 0 : index
    %c0_113 = arith.constant 0 : index
    %157 = vector.load %arg19[%c1_111, %c0_112, %c0_113] : memref<2x1x128xf32, #tpu.memory_space<vmem>>, vector<1x1x128xf32>
    %158 = vector.shape_cast %157 : vector<1x1x128xf32> to vector<1x128xf32>
    %159 = arith.truncf %134 : vector<24x128xf32> to vector<24x128xbf16>
    %cst_114 = arith.constant dense<0.000000e+00> : vector<24x384xf32>
    %160 = tpu.matmul %159, %136, %cst_114 {dimension_numbers = #tpu.dot_dimension_numbers<[1], [0], [0], [1], [0, 0, 1, 1], [], []>} : vector<24x128xbf16>, vector<128x384xbf16>, vector<24x384xf32> -> vector<24x384xf32>
    %161 = vector.broadcast %138 : vector<1x384xf32> to vector<24x384xf32>
    %162 = arith.addf %160, %161 : vector<24x384xf32>
    %163 = vector.extract_strided_slice %162 {offsets = [0, 0], sizes = [24, 128], strides = [1, 1]} : vector<24x384xf32> to vector<24x128xf32>
    %164 = vector.extract_strided_slice %162 {offsets = [0, 128], sizes = [24, 128], strides = [1, 1]} : vector<24x384xf32> to vector<24x128xf32>
    %165 = vector.extract_strided_slice %162 {offsets = [0, 256], sizes = [24, 128], strides = [1, 1]} : vector<24x384xf32> to vector<24x128xf32>
    %166 = vector.extract_strided_slice %164 {offsets = [0, 0], sizes = [8, 128], strides = [1, 1]} : vector<24x128xf32> to vector<8x128xf32>
    %167 = tpu.concatenate %166, %166, %166 in 0 : vector<8x128xf32>, vector<8x128xf32>, vector<8x128xf32> -> vector<24x128xf32>
    %168 = arith.mulf %163, %167 : vector<24x128xf32>
    %cst_115 = arith.constant dense<0.000000e+00> : vector<24x32xf32>
    %169 = tpu.matmul %168, %21, %cst_115 {dimension_numbers = #tpu.dot_dimension_numbers<[1], [0], [0], [1], [0, 0, 1, 1], [], []>} : vector<24x128xf32>, vector<128x32xf32>, vector<24x32xf32> -> vector<24x32xf32>
    %170 = vector.extract_strided_slice %164 {offsets = [8, 0], sizes = [8, 128], strides = [1, 1]} : vector<24x128xf32> to vector<8x128xf32>
    %171 = tpu.concatenate %170, %170, %170 in 0 : vector<8x128xf32>, vector<8x128xf32>, vector<8x128xf32> -> vector<24x128xf32>
    %172 = arith.mulf %163, %171 : vector<24x128xf32>
    %cst_116 = arith.constant dense<0.000000e+00> : vector<24x32xf32>
    %173 = tpu.matmul %172, %21, %cst_116 {dimension_numbers = #tpu.dot_dimension_numbers<[1], [0], [0], [1], [0, 0, 1, 1], [], []>} : vector<24x128xf32>, vector<128x32xf32>, vector<24x32xf32> -> vector<24x32xf32>
    %174 = vector.extract_strided_slice %164 {offsets = [16, 0], sizes = [8, 128], strides = [1, 1]} : vector<24x128xf32> to vector<8x128xf32>
    %175 = tpu.concatenate %174, %174, %174 in 0 : vector<8x128xf32>, vector<8x128xf32>, vector<8x128xf32> -> vector<24x128xf32>
    %176 = arith.mulf %163, %175 : vector<24x128xf32>
    %cst_117 = arith.constant dense<0.000000e+00> : vector<24x32xf32>
    %177 = tpu.matmul %176, %21, %cst_117 {dimension_numbers = #tpu.dot_dimension_numbers<[1], [0], [0], [1], [0, 0, 1, 1], [], []>} : vector<24x128xf32>, vector<128x32xf32>, vector<24x32xf32> -> vector<24x32xf32>
    %178 = arith.maximumf %169, %173 : vector<24x32xf32>
    %179 = arith.maximumf %178, %177 : vector<24x32xf32>
    %180 = arith.subf %169, %179 : vector<24x32xf32>
    %181 = math.exp %180 : vector<24x32xf32>
    %182 = arith.subf %173, %179 : vector<24x32xf32>
    %183 = math.exp %182 : vector<24x32xf32>
    %184 = arith.subf %177, %179 : vector<24x32xf32>
    %185 = math.exp %184 : vector<24x32xf32>
    %186 = arith.addf %181, %183 : vector<24x32xf32>
    %187 = arith.addf %186, %185 : vector<24x32xf32>
    %188 = tpu.reciprocal %187 : vector<24x32xf32> -> vector<24x32xf32>
    %189 = arith.mulf %181, %188 : vector<24x32xf32>
    %cst_118 = arith.constant dense<0.000000e+00> : vector<24x128xf32>
    %190 = tpu.matmul %189, %22, %cst_118 {dimension_numbers = #tpu.dot_dimension_numbers<[1], [0], [0], [1], [0, 0, 1, 1], [], []>} : vector<24x32xf32>, vector<32x128xf32>, vector<24x128xf32> -> vector<24x128xf32>
    %191 = vector.extract_strided_slice %165 {offsets = [0, 0], sizes = [8, 128], strides = [1, 1]} : vector<24x128xf32> to vector<8x128xf32>
    %192 = tpu.concatenate %191, %191, %191 in 0 : vector<8x128xf32>, vector<8x128xf32>, vector<8x128xf32> -> vector<24x128xf32>
    %193 = arith.mulf %190, %192 : vector<24x128xf32>
    %194 = arith.mulf %183, %188 : vector<24x32xf32>
    %cst_119 = arith.constant dense<0.000000e+00> : vector<24x128xf32>
    %195 = tpu.matmul %194, %22, %cst_119 {dimension_numbers = #tpu.dot_dimension_numbers<[1], [0], [0], [1], [0, 0, 1, 1], [], []>} : vector<24x32xf32>, vector<32x128xf32>, vector<24x128xf32> -> vector<24x128xf32>
    %196 = vector.extract_strided_slice %165 {offsets = [8, 0], sizes = [8, 128], strides = [1, 1]} : vector<24x128xf32> to vector<8x128xf32>
    %197 = tpu.concatenate %196, %196, %196 in 0 : vector<8x128xf32>, vector<8x128xf32>, vector<8x128xf32> -> vector<24x128xf32>
    %198 = arith.mulf %195, %197 : vector<24x128xf32>
    %199 = arith.addf %193, %198 : vector<24x128xf32>
    %200 = arith.mulf %185, %188 : vector<24x32xf32>
    %cst_120 = arith.constant dense<0.000000e+00> : vector<24x128xf32>
    %201 = tpu.matmul %200, %22, %cst_120 {dimension_numbers = #tpu.dot_dimension_numbers<[1], [0], [0], [1], [0, 0, 1, 1], [], []>} : vector<24x32xf32>, vector<32x128xf32>, vector<24x128xf32> -> vector<24x128xf32>
    %202 = vector.extract_strided_slice %165 {offsets = [16, 0], sizes = [8, 128], strides = [1, 1]} : vector<24x128xf32> to vector<8x128xf32>
    %203 = tpu.concatenate %202, %202, %202 in 0 : vector<8x128xf32>, vector<8x128xf32>, vector<8x128xf32> -> vector<24x128xf32>
    %204 = arith.mulf %201, %203 : vector<24x128xf32>
    %205 = arith.addf %199, %204 : vector<24x128xf32>
    %206 = arith.truncf %205 : vector<24x128xf32> to vector<24x128xbf16>
    %cst_121 = arith.constant dense<0.000000e+00> : vector<24x128xf32>
    %207 = tpu.matmul %206, %140, %cst_121 {dimension_numbers = #tpu.dot_dimension_numbers<[1], [0], [0], [1], [0, 0, 1, 1], [], []>} : vector<24x128xbf16>, vector<128x128xbf16>, vector<24x128xf32> -> vector<24x128xf32>
    %208 = vector.broadcast %142 : vector<1x128xf32> to vector<24x128xf32>
    %209 = arith.addf %207, %208 : vector<24x128xf32>
    %210 = arith.addf %134, %209 : vector<24x128xf32>
    %cst_122 = arith.constant dense<0.000000e+00> : vector<24x128xf32>
    %211 = tpu.matmul %210, %23, %cst_122 {dimension_numbers = #tpu.dot_dimension_numbers<[1], [0], [0], [1], [0, 0, 1, 1], [], []>} : vector<24x128xf32>, vector<128x128xf32>, vector<24x128xf32> -> vector<24x128xf32>
    %212 = arith.subf %210, %211 : vector<24x128xf32>
    %213 = arith.mulf %212, %212 : vector<24x128xf32>
    %cst_123 = arith.constant dense<0.000000e+00> : vector<24x128xf32>
    %214 = tpu.matmul %213, %23, %cst_123 {dimension_numbers = #tpu.dot_dimension_numbers<[1], [0], [0], [1], [0, 0, 1, 1], [], []>} : vector<24x128xf32>, vector<128x128xf32>, vector<24x128xf32> -> vector<24x128xf32>
    %cst_124 = arith.constant 9.99999974E-6 : f32
    %215 = vector.broadcast %cst_124 : f32 to vector<24x128xf32>
    %216 = arith.addf %214, %215 : vector<24x128xf32>
    %217 = math.rsqrt %216 : vector<24x128xf32>
    %218 = arith.mulf %212, %217 : vector<24x128xf32>
    %219 = vector.broadcast %152 : vector<1x128xf32> to vector<24x128xf32>
    %220 = arith.mulf %218, %219 : vector<24x128xf32>
    %221 = vector.broadcast %154 : vector<1x128xf32> to vector<24x128xf32>
    %222 = arith.addf %220, %221 : vector<24x128xf32>
    %223 = arith.truncf %222 : vector<24x128xf32> to vector<24x128xbf16>
    %cst_125 = arith.constant dense<0.000000e+00> : vector<24x512xf32>
    %224 = tpu.matmul %223, %144, %cst_125 {dimension_numbers = #tpu.dot_dimension_numbers<[1], [0], [0], [1], [0, 0, 1, 1], [], []>} : vector<24x128xbf16>, vector<128x512xbf16>, vector<24x512xf32> -> vector<24x512xf32>
    %225 = vector.broadcast %146 : vector<1x512xf32> to vector<24x512xf32>
    %226 = arith.addf %224, %225 : vector<24x512xf32>
    %cst_126 = arith.constant 0.000000e+00 : f32
    %227 = vector.broadcast %cst_126 : f32 to vector<24x512xf32>
    %228 = arith.maximumf %226, %227 : vector<24x512xf32>
    %229 = arith.truncf %228 : vector<24x512xf32> to vector<24x512xbf16>
    %cst_127 = arith.constant dense<0.000000e+00> : vector<24x128xf32>
    %230 = tpu.matmul %229, %148, %cst_127 {dimension_numbers = #tpu.dot_dimension_numbers<[1], [0], [0], [1], [0, 0, 1, 1], [], []>} : vector<24x512xbf16>, vector<512x128xbf16>, vector<24x128xf32> -> vector<24x128xf32>
    %231 = vector.broadcast %150 : vector<1x128xf32> to vector<24x128xf32>
    %232 = arith.addf %230, %231 : vector<24x128xf32>
    %233 = arith.addf %222, %232 : vector<24x128xf32>
    %cst_128 = arith.constant dense<0.000000e+00> : vector<24x128xf32>
    %234 = tpu.matmul %233, %23, %cst_128 {dimension_numbers = #tpu.dot_dimension_numbers<[1], [0], [0], [1], [0, 0, 1, 1], [], []>} : vector<24x128xf32>, vector<128x128xf32>, vector<24x128xf32> -> vector<24x128xf32>
    %235 = arith.subf %233, %234 : vector<24x128xf32>
    %236 = arith.mulf %235, %235 : vector<24x128xf32>
    %cst_129 = arith.constant dense<0.000000e+00> : vector<24x128xf32>
    %237 = tpu.matmul %236, %23, %cst_129 {dimension_numbers = #tpu.dot_dimension_numbers<[1], [0], [0], [1], [0, 0, 1, 1], [], []>} : vector<24x128xf32>, vector<128x128xf32>, vector<24x128xf32> -> vector<24x128xf32>
    %cst_130 = arith.constant 9.99999974E-6 : f32
    %238 = vector.broadcast %cst_130 : f32 to vector<24x128xf32>
    %239 = arith.addf %237, %238 : vector<24x128xf32>
    %240 = math.rsqrt %239 : vector<24x128xf32>
    %241 = arith.mulf %235, %240 : vector<24x128xf32>
    %242 = vector.broadcast %156 : vector<1x128xf32> to vector<24x128xf32>
    %243 = arith.mulf %241, %242 : vector<24x128xf32>
    %244 = vector.broadcast %158 : vector<1x128xf32> to vector<24x128xf32>
    %245 = arith.addf %243, %244 : vector<24x128xf32>
    %246 = vector.extract_strided_slice %245 {offsets = [0, 0], sizes = [8, 128], strides = [1, 1]} : vector<24x128xf32> to vector<8x128xf32>
    %c0_131 = arith.constant 0 : index
    %c0_132 = arith.constant 0 : index
    %247 = vector.load %arg23[%c0_131, %c0_132] : memref<8x128xf32, #tpu.memory_space<vmem>>, vector<8x128xf32>
    tpu.vector_store %arg23[%c0_131, %c0_132], %246 {strides = array<i32>} : memref<8x128xf32, #tpu.memory_space<vmem>>, vector<8x128xf32>,
    return
  }
  func.func @transform_0(%arg0: i32) -> (i32, i32) {
    %c0_i32 = arith.constant 0 : i32
    %c0_i32_0 = arith.constant 0 : i32
    return %arg0, %c0_i32 : i32, i32
  }
  func.func @transform_1(%arg0: i32) -> (i32, i32) {
    %c0_i32 = arith.constant 0 : i32
    %c0_i32_0 = arith.constant 0 : i32
    return %arg0, %c0_i32 : i32, i32
  }
  func.func @transform_2(%arg0: i32) -> (i32, i32) {
    %c0_i32 = arith.constant 0 : i32
    %c0_i32_0 = arith.constant 0 : i32
    %c0_i32_1 = arith.constant 0 : i32
    return %c0_i32, %c0_i32_0 : i32, i32
  }
  func.func @transform_3(%arg0: i32) -> (i32, i32) {
    %c0_i32 = arith.constant 0 : i32
    %c0_i32_0 = arith.constant 0 : i32
    %c0_i32_1 = arith.constant 0 : i32
    return %c0_i32, %c0_i32_0 : i32, i32
  }
  func.func @transform_4(%arg0: i32) -> (i32, i32) {
    %c0_i32 = arith.constant 0 : i32
    %c0_i32_0 = arith.constant 0 : i32
    %c0_i32_1 = arith.constant 0 : i32
    return %c0_i32, %c0_i32_0 : i32, i32
  }
  func.func @transform_5(%arg0: i32) -> (i32, i32) {
    %c0_i32 = arith.constant 0 : i32
    %c0_i32_0 = arith.constant 0 : i32
    %c0_i32_1 = arith.constant 0 : i32
    return %c0_i32, %c0_i32_0 : i32, i32
  }
  func.func @transform_6(%arg0: i32) -> (i32, i32) {
    %c0_i32 = arith.constant 0 : i32
    %c0_i32_0 = arith.constant 0 : i32
    %c0_i32_1 = arith.constant 0 : i32
    return %c0_i32, %c0_i32_0 : i32, i32
  }
  func.func @transform_7(%arg0: i32) -> (i32, i32, i32) {
    %c0_i32 = arith.constant 0 : i32
    %c0_i32_0 = arith.constant 0 : i32
    %c0_i32_1 = arith.constant 0 : i32
    %c0_i32_2 = arith.constant 0 : i32
    return %c0_i32, %c0_i32_0, %c0_i32_1 : i32, i32, i32
  }
  func.func @transform_8(%arg0: i32) -> (i32, i32, i32) {
    %c0_i32 = arith.constant 0 : i32
    %c0_i32_0 = arith.constant 0 : i32
    %c0_i32_1 = arith.constant 0 : i32
    %c0_i32_2 = arith.constant 0 : i32
    return %c0_i32, %c0_i32_0, %c0_i32_1 : i32, i32, i32
  }
  func.func @transform_9(%arg0: i32) -> (i32, i32, i32) {
    %c0_i32 = arith.constant 0 : i32
    %c0_i32_0 = arith.constant 0 : i32
    %c0_i32_1 = arith.constant 0 : i32
    %c0_i32_2 = arith.constant 0 : i32
    return %c0_i32, %c0_i32_0, %c0_i32_1 : i32, i32, i32
  }
  func.func @transform_10(%arg0: i32) -> (i32, i32, i32) {
    %c0_i32 = arith.constant 0 : i32
    %c0_i32_0 = arith.constant 0 : i32
    %c0_i32_1 = arith.constant 0 : i32
    %c0_i32_2 = arith.constant 0 : i32
    return %c0_i32, %c0_i32_0, %c0_i32_1 : i32, i32, i32
  }
  func.func @transform_11(%arg0: i32) -> (i32, i32, i32) {
    %c0_i32 = arith.constant 0 : i32
    %c0_i32_0 = arith.constant 0 : i32
    %c0_i32_1 = arith.constant 0 : i32
    %c0_i32_2 = arith.constant 0 : i32
    return %c0_i32, %c0_i32_0, %c0_i32_1 : i32, i32, i32
  }
  func.func @transform_12(%arg0: i32) -> (i32, i32, i32) {
    %c0_i32 = arith.constant 0 : i32
    %c0_i32_0 = arith.constant 0 : i32
    %c0_i32_1 = arith.constant 0 : i32
    %c0_i32_2 = arith.constant 0 : i32
    return %c0_i32, %c0_i32_0, %c0_i32_1 : i32, i32, i32
  }
  func.func @transform_13(%arg0: i32) -> (i32, i32, i32) {
    %c0_i32 = arith.constant 0 : i32
    %c0_i32_0 = arith.constant 0 : i32
    %c0_i32_1 = arith.constant 0 : i32
    %c0_i32_2 = arith.constant 0 : i32
    return %c0_i32, %c0_i32_0, %c0_i32_1 : i32, i32, i32
  }
  func.func @transform_14(%arg0: i32) -> (i32, i32, i32) {
    %c0_i32 = arith.constant 0 : i32
    %c0_i32_0 = arith.constant 0 : i32
    %c0_i32_1 = arith.constant 0 : i32
    %c0_i32_2 = arith.constant 0 : i32
    return %c0_i32, %c0_i32_0, %c0_i32_1 : i32, i32, i32
  }
  func.func @transform_15(%arg0: i32) -> (i32, i32, i32) {
    %c0_i32 = arith.constant 0 : i32
    %c0_i32_0 = arith.constant 0 : i32
    %c0_i32_1 = arith.constant 0 : i32
    %c0_i32_2 = arith.constant 0 : i32
    return %c0_i32, %c0_i32_0, %c0_i32_1 : i32, i32, i32
  }
  func.func @transform_16(%arg0: i32) -> (i32, i32, i32) {
    %c0_i32 = arith.constant 0 : i32
    %c0_i32_0 = arith.constant 0 : i32
    %c0_i32_1 = arith.constant 0 : i32
    %c0_i32_2 = arith.constant 0 : i32
    return %c0_i32, %c0_i32_0, %c0_i32_1 : i32, i32, i32
  }
  func.func @transform_17(%arg0: i32) -> (i32, i32, i32) {
    %c0_i32 = arith.constant 0 : i32
    %c0_i32_0 = arith.constant 0 : i32
    %c0_i32_1 = arith.constant 0 : i32
    %c0_i32_2 = arith.constant 0 : i32
    return %c0_i32, %c0_i32_0, %c0_i32_1 : i32, i32, i32
  }
  func.func @transform_18(%arg0: i32) -> (i32, i32, i32) {
    %c0_i32 = arith.constant 0 : i32
    %c0_i32_0 = arith.constant 0 : i32
    %c0_i32_1 = arith.constant 0 : i32
    %c0_i32_2 = arith.constant 0 : i32
    return %c0_i32, %c0_i32_0, %c0_i32_1 : i32, i32, i32
  }
  func.func @transform_19(%arg0: i32) -> (i32, i32) {
    %c0_i32 = arith.constant 0 : i32
    %c0_i32_0 = arith.constant 0 : i32
    %c0_i32_1 = arith.constant 0 : i32
    return %c0_i32, %c0_i32_0 : i32, i32
  }
  func.func @transform_20(%arg0: i32) -> (i32, i32) {
    %c0_i32 = arith.constant 0 : i32
    %c0_i32_0 = arith.constant 0 : i32
    %c0_i32_1 = arith.constant 0 : i32
    return %c0_i32, %c0_i32_0 : i32, i32
  }
  func.func @transform_21(%arg0: i32) -> (i32, i32) {
    %c0_i32 = arith.constant 0 : i32
    %c0_i32_0 = arith.constant 0 : i32
    %c0_i32_1 = arith.constant 0 : i32
    return %c0_i32, %c0_i32_0 : i32, i32
  }
  func.func @transform_22(%arg0: i32) -> (i32, i32) {
    %c0_i32 = arith.constant 0 : i32
    %c0_i32_0 = arith.constant 0 : i32
    return %arg0, %c0_i32 : i32, i32
  }
}

</mosaic_0001>

<bundles_post_ra>
// kernel: tpu_custom_call.1
= control target key start
LH: loop header
LB: loop body
LE: loop exit
PB: predicated region body
PF: predicated region fallthrough
CT: control target
= control target key end

     0   :  { %s5855_s0 = inlined_call_operand.hbm [shape: f32[8,192], index: 0, kind: input, shape index: {}]   ;;  %s5856_s1 = inlined_call_operand.vmem [shape: f32[8,128], index: 1, kind: input, shape index: {}]   ;;  %s5857_s2 = inlined_call_operand.hbm [shape: bf16[192,128], index: 2, kind: input, shape index: {}]   ;;  %s5858_s3 = inlined_call_operand.hbm [shape: bf16[128,128], index: 3, kind: input, shape index: {}]   ;;  %s5859_s4 = inlined_call_operand.hbm [shape: f32[1,128], index: 4, kind: input, shape index: {}]   ;;  %s5860_s5 = inlined_call_operand.hbm [shape: f32[1,128], index: 5, kind: input, shape index: {}]   ;;  %s5861_s6 = inlined_call_operand.hbm [shape: f32[1,128], index: 6, kind: input, shape index: {}]   ;;  %s5862_s7 = inlined_call_operand.hbm [shape: bf16[2,128,384], index: 7, kind: input, shape index: {}]   ;;  %s5863_s8 = inlined_call_operand.hbm [shape: f32[2,1,384], index: 8, kind: input, shape index: {}]   ;;  %s5864_s9 = inlined_call_operand.vmem [shape: bf16[2,128,128], index: 9, kind: input, shape index: {}]   ;;  %s5865_s10 = inlined_call_operand.hbm [shape: f32[2,1,128], index: 10, kind: input, shape index: {}]   ;;  %s5866_s11 = inlined_call_operand.hbm [shape: bf16[2,128,512], index: 11, kind: input, shape index: {}]   ;;  %s5867_s12 = inlined_call_operand.hbm [shape: f32[2,1,512], index: 12, kind: input, shape index: {}]   ;;  %s5868_s13 = inlined_call_operand.hbm [shape: bf16[2,512,128], index: 13, kind: input, shape index: {}]   ;;  %s5869_s14 = inlined_call_operand.vmem [shape: f32[2,1,128], index: 14, kind: input, shape index: {}]   ;;  %s5870_s15 = inlined_call_operand.vmem [shape: f32[2,1,128], index: 15, kind: input, shape index: {}]   ;;  %s5871_s16 = inlined_call_operand.vmem [shape: f32[2,1,128], index: 16, kind: input, shape index: {}]   ;;  %s5872_s17 = inlined_call_operand.hbm [shape: f32[2,1,128], index: 17, kind: input, shape index: {}]   ;;  %s5873_s18 = inlined_call_operand.vmem [shape: f32[2,1,128], index: 18, kind: input, shape index: {}]   ;;  %s5874_s19 = inlined_call_operand.vmem [shape: f32[128,32], index: 19, kind: input, shape index: {}]   ;;  %s5875_s20 = inlined_call_operand.vmem [shape: f32[32,128], index: 20, kind: input, shape index: {}]   ;;  %s5876_s21 = inlined_call_operand.hbm [shape: f32[128,128], index: 21, kind: input, shape index: {}]   ;;  %s5877_s22 = inlined_call_operand.hbm [shape: f32[8,128], index: 22, kind: output, shape index: {}]  }
   0x1   :  { %5880 = sst [smem:[#allocation36_spill]] %s5855_s0 }
   0x2   :  { %5881 = sst [smem:[#allocation37_spill]] %s5856_s1 }
   0x3   :  { %5882 = sst [smem:[#allocation38_spill]] %s5857_s2 }
   0x4   :  { %5883 = sst [smem:[#allocation39_spill]] %s5858_s3 }
   0x5   :  { %5884 = sst [smem:[#allocation40_spill]] %s5859_s4 }
   0x6   :  { %5885 = sst [smem:[#allocation41_spill]] %s5860_s5 }
   0x7   :  { %5886 = sst [smem:[#allocation42_spill]] %s5861_s6 }
   0x8   :  { %5887 = sst [smem:[#allocation43_spill]] %s5877_s22 }
   0x9   :  { %27 = vsyncpa [#allocation4], 0 }
   0xa   :  { %28 = vsyncpa [#allocation7], 0 }
   0xb   :  { %29 = vsyncpa [#allocation10], 0 }
   0xc   :  { %30 = vsyncpa [#allocation13], 0 }
   0xd   :  { %31 = vsyncpa [#allocation16], 0 }
   0xe   :  { %32 = vsyncpa [#allocation19], 0 }
   0xf   :  { %33 = vsyncpa [#allocation22], 0 }
  0x10   :  { %34 = vsyncpa [#allocation25], 0  ;;  %s5888_s29 = sld [smem:[#allocation38_spill]] }
  0x16   :  { %s53_s30 = sshll.u32 %s5888_s29, 4  ;;  %s54_s30 = int_to_ptr.hbm [resolvable:$true] %s53_s30 }
  0x17   :  { %35 = vsyncpa [#allocation5], 0  ;;  %s5116_s4 = smov [#allocation6]   ;;  %s5889_s5 = sld [smem:[#allocation40_spill]] }
  0x18   :  { %s55_s0 = sshll.u32 %s5116_s4, 4  ;;  %s5878_s6 = smov 64   ;;  %s56_s0 = int_to_ptr.vmem [resolvable:$true] %s55_s0 }
  0x19   :  { %s5118_s25 = smov 4   ;;  %s5119_s26 = smov [#allocation9]  }
  0x1a   :  { %61 = dma.hbm_to_vmem [thread:$0]  %s54_s30, 1536, %s56_s0, [#allocation7], %s5878_s6, %s5878_s6, %s5118_s25  }
  0x1b   :  { %s82_s2 = sshll.u32 %s5119_s26, 4  ;;  %s5890_s28 = sld [smem:[#allocation42_spill]]  ;;  %s83_s2 = int_to_ptr.vmem [resolvable:$true] %s82_s2 }
  0x1c   :  { %s125_s23 = sshll.u32 %s5863_s8, 4  ;;  %s5120_s1 = smov [#allocation12]   ;;  %s126_s23 = int_to_ptr.hbm [resolvable:$true] %s125_s23 }
  0x1d   :  { %s80_s24 = sshll.u32 %s5889_s5, 4  ;;  %s104_s5 = sshll.u32 %s5120_s1, 4  ;;  %s81_s24 = int_to_ptr.hbm [resolvable:$true] %s80_s24  ;;  %s105_s5 = int_to_ptr.vmem [resolvable:$true] %s104_s5 }
  0x1e   :  { %85 = dma.hbm_to_vmem [thread:$0]  %s81_s24, 16, %s83_s2, [#allocation10]  }
  0x1f   :  { %s5121_s30 = smov [#allocation15]   ;;  %s5122_s26 = smov 48  }
  0x20   :  { %s127_s0 = sshll.u32 %s5121_s30, 4  ;;  %s5123_s6 = smov 3   ;;  %s128_s0 = int_to_ptr.vmem [resolvable:$true] %s127_s0 }
  0x21   :  { %s102_s29 = sshll.u32 %s5890_s28, 4  ;;  %s153_s28 = sshll.u32 %s5866_s11, 4  ;;  %s103_s29 = int_to_ptr.hbm [resolvable:$true] %s102_s29  ;;  %s154_s28 = int_to_ptr.hbm [resolvable:$true] %s153_s28 }
  0x22   :  { %107 = dma.hbm_to_vmem [thread:$0]  %s103_s29, 16, %s105_s5, [#allocation13]  }
  0x23   :  { %133 = dma.hbm_to_vmem [thread:$0]  %s126_s23, 96, %s128_s0, [#allocation16], %s5122_s26, %s5122_s26, %s5123_s6  }
  0x24   :  { %s5124_s24 = smov [#allocation18]   ;;  %s179_s4 = sshll.u32 %s5868_s13, 4  ;;  %s180_s4 = int_to_ptr.hbm [resolvable:$true] %s179_s4 }
  0x25   :  { %s155_s2 = sshll.u32 %s5124_s24, 4  ;;  %s5125_s1 = smov 256   ;;  %s156_s2 = int_to_ptr.vmem [resolvable:$true] %s155_s2 }
  0x26   :  { %s5126_s29 = smov 16   ;;  %s5127_s5 = smov [#allocation21]  }
  0x27   :  { %161 = dma.hbm_to_vmem [thread:$0]  %s154_s28, 8192, %s156_s2, [#allocation19], %s5125_s1, %s5125_s1, %s5126_s29  }
  0x28   :  { %s181_s30 = sshll.u32 %s5127_s5, 4  ;;  %s5891_s0 = sld [smem:[#allocation36_spill]]  ;;  %s182_s30 = int_to_ptr.vmem [resolvable:$true] %s181_s30 }
  0x29   :  { %s5892_s11 = smov 64   ;;  %s5893_s13 = sld [smem:[#allocation39_spill]] }
  0x2a   :  { %187 = dma.hbm_to_vmem [thread:$0]  %s180_s4, 8192, %s182_s30, [#allocation22], %s5892_s11, %s5892_s11, %s5118_s25  }
  0x2b   :  { %s5128_s8 = smov [#allocation3]   ;;  %s5129_s28 = smov [#allocation8]  }
  0x2c   :  { %s43_s22 = sshll.u32 %s5128_s8, 4  ;;  %s68_s2 = sshll.u32 %s5129_s28, 4  ;;  %s44_s22 = int_to_ptr.vmem [resolvable:$true] %s43_s22  ;;  %s69_s2 = int_to_ptr.vmem [resolvable:$true] %s68_s2 }
  0x2d   :  { %s5894_s6 = sld [smem:[#allocation41_spill]]  ;;  %s5130_s27 = smov [#allocation11]  }
  0x2e   :  { %s41_s26 = sshll.u32 %s5891_s0, 4  ;;  %s112_s0 = sshll.u32 %s5862_s7, 4  ;;  %s42_s26 = int_to_ptr.hbm [resolvable:$true] %s41_s26  ;;  %s113_s0 = int_to_ptr.hbm [resolvable:$true] %s112_s0 }
  0x2f   :  { %s66_s24 = sshll.u32 %s5893_s13, 4  ;;  %s93_s3 = sshll.u32 %s5130_s27, 4  ;;  %s67_s24 = int_to_ptr.hbm [resolvable:$true] %s66_s24  ;;  %s94_s3 = int_to_ptr.vmem [resolvable:$true] %s93_s3 }
  0x30   :  { %46 = dma.hbm_to_vmem [thread:$0]  %s42_s26, 256, %s44_s22, [#allocation4]  }
  0x31   :  { %74 = dma.hbm_to_vmem [thread:$0]  %s67_s24, 1024, %s69_s2, [#allocation7], %s5892_s11, %s5892_s11, %s5118_s25  }
  0x32   :  { %s5131_s26 = smov [#allocation14]   ;;  %s5132_s8 = smov 192  }
  0x33   :  { %s91_s23 = sshll.u32 %s5894_s6, 4  ;;  %s114_s13 = sshll.u32 %s5131_s26, 4  ;;  %s92_s23 = int_to_ptr.hbm [resolvable:$true] %s91_s23  ;;  %s115_s13 = int_to_ptr.vmem [resolvable:$true] %s114_s13 }
  0x34   :  { %96 = dma.hbm_to_vmem [thread:$0]  %s92_s23, 16, %s94_s3, [#allocation10]  }
  0x35   :  { %s5133_s22 = smov 12   ;;  %s140_s5 = sshll.u32 %s5865_s10, 4  ;;  %s141_s5 = int_to_ptr.hbm [resolvable:$true] %s140_s5 }
  0x36   :  { %120 = dma.hbm_to_vmem [thread:$0]  %s113_s0, 6144, %s115_s13, [#allocation13], %s5132_s8, %s5132_s8, %s5133_s22  }
  0x37   :  { %s5134_s24 = smov [#allocation17]   ;;  %s5135_s7 = smov 1  }
  0x38   :  { %s142_s2 = sshll.u32 %s5134_s24, 4  ;;  %s166_s4 = sshll.u32 %s5867_s12, 4  ;;  %s143_s2 = int_to_ptr.vmem [resolvable:$true] %s142_s2  ;;  %s167_s4 = int_to_ptr.hbm [resolvable:$true] %s166_s4 }
  0x39   :  { %148 = dma.hbm_to_vmem [thread:$0]  %s141_s5, 32, %s143_s2, [#allocation16], %s5126_s29, %s5126_s29, %s5135_s7  }
  0x3a   :  { %s5136_s30 = smov [#allocation20]   ;;  %s198_s10 = sshll.u32 %s5872_s17, 4  ;;  %s199_s10 = int_to_ptr.hbm [resolvable:$true] %s198_s10 }
  0x3b   :  { %s168_s27 = sshll.u32 %s5136_s30, 4  ;;  %s5137_s26 = smov [#allocation23]   ;;  %s169_s27 = int_to_ptr.vmem [resolvable:$true] %s168_s27 }
  0x3c   :  { %174 = dma.hbm_to_vmem [thread:$0]  %s167_s4, 128, %s169_s27, [#allocation19], %s5892_s11, %s5892_s11, %s5118_s25  }
  0x3d   :  { %s200_s13 = sshll.u32 %s5137_s26, 4  ;;  %s217_s28 = sshll.u32 %s5876_s21, 4  ;;  %s201_s13 = int_to_ptr.vmem [resolvable:$true] %s200_s13  ;;  %s218_s28 = int_to_ptr.hbm [resolvable:$true] %s217_s28 }
  0x3e   :  { %206 = dma.hbm_to_vmem [thread:$0]  %s199_s10, 32, %s201_s13, [#allocation22], %s5126_s29, %s5126_s29, %s5135_s7  }
  0x3f   :  { %s5138_s12 = smov [#allocation24]   ;;  %s5139_s17 = smov 128  }
  0x40   :  { %s219_s1 = sshll.u32 %s5138_s12, 4  ;;  %s5140_s5 = smov 8   ;;  %s220_s1 = int_to_ptr.vmem [resolvable:$true] %s219_s1 }
  0x41   :  { %225 = dma.hbm_to_vmem [thread:$0]  %s218_s28, 2048, %s220_s1, [#allocation25], %s5139_s17, %s5139_s17, %s5140_s5  }
  0x42   :  { %5098 = dma.done.wait [#allocation4], 256  }
  0x43   :  { %5099 = vsyncadd [#allocation4], 4294967040 }
  0x44   :  { %5100 = dma.done.wait [#allocation7], 2560  }
  0x45   :  { %5101 = vsyncadd [#allocation7], 4294964736 }
  0x46   :  { %5102 = dma.done.wait [#allocation10], 32  }
  0x47   :  { %5103 = vsyncadd [#allocation10], 4294967264 }
  0x48   :  { %5104 = dma.done.wait [#allocation13], 6160  }
  0x49   :  { %5105 = vsyncadd [#allocation13], 4294961136 }
  0x4a   :  { %5106 = dma.done.wait [#allocation16], 128  }
  0x4b   :  { %5107 = vsyncadd [#allocation16], 4294967168 }
  0x4c   :  { %5108 = dma.done.wait [#allocation19], 8320  }
  0x4d   :  { %5109 = vsyncadd [#allocation19], 4294958976 }
  0x4e   :  { %5110 = dma.done.wait [#allocation22], 8224  }
  0x4f   :  { %5111 = vsyncadd [#allocation22], 4294959072 }
  0x50   :  { %5112 = dma.done.wait [#allocation25], 2048  }
  0x51   :  { %5113 = vsyncadd [#allocation25], 4294965248  ;;  %v4356_v0 = vld [vmem:[#allocation6 + $0x38] sm:$0xff]  ;;  %v4355_v3 = vld [vmem:[#allocation6 + $0x30] sm:$0xff]  ;;  %vm392_vm0 = vcmask 523264   ;;  %s5895_s29 = sld [smem:[#allocation37_spill]] }
  0x52   :  { %v4368_v1 = vld [vmem:[#allocation8 + $0x38] sm:$0xff]  ;;  %396 = vmatpush.bf16.msra.mxu0 %v4356_v0  ;;  %v4367_v4 = vld [vmem:[#allocation8 + $0x30] sm:$0xff]  ;;  %v4354_v6 = vld [vmem:[#allocation6 + $0x28] sm:$0xff]  ;;  %vm1060_vm5 = vcmask 261120   ;;  %s5141_s24 = smov [#allocation26]  }
  0x53   :  { %v4360_v2 = vld [vmem:[#allocation6 + $0x58] sm:$0xff]  ;;  %493 = vmatpush.bf16.msra.mxu2 %v4368_v1  ;;  %v4359_v5 = vld [vmem:[#allocation6 + $0x50] sm:$0xff]  ;;  %v4366_v7 = vld [vmem:[#allocation8 + $0x28] sm:$0xff]  ;;  %s3443_s2 = sshll.u32 %s5141_s24, 4  ;;  %s3444_s2 = int_to_ptr.vmem [resolvable:$true] %s3443_s2 }
  0x54   :  { %413 = vmatpush.bf16.msra.mxu1 %v4360_v2  ;;  %v4358_v8 = vld [vmem:[#allocation6 + $0x48] sm:$0xff]  ;;  %v4391_v10 = vld [vmem:[#allocation14 + $0xb0] sm:$0xf0]  ;;  %v4390_v12 = vld [vmem:[#allocation14 + $0xac] sm:$0xf] }
  0x55   :  { %v3629_v9 = vld [vmem:[#allocation14 + $0xa8] sm:$0xf]  ;;  %v3631_v13 = vld [vmem:[#allocation14 + $0xb4] sm:$0xf0]  ;;  %v3617_v14 = vld [vmem:[#allocation14 + $0x90] sm:$0xf] }
  0x56   :  { %397 = vmatpush.bf16.msra.mxu0 %v4355_v3  ;;  %v3630_v11 = vor.u32 %v4391_v10, %v3629_v9  ;;  %v4353_v15 = vld [vmem:[#allocation6 + $0x20] sm:$0xff]  ;;  %v289_v20 = vld [vmem:[#allocation3 + $0x8] sm:$0xff]  ;;  %v3634_v21 = vor.u32 %v4390_v12, %v3631_v13  ;;  %v4385_v23 = vld [vmem:[#allocation14 + $0x80] sm:$0xf0] }
  0x57   :  { %494 = vmatpush.bf16.msra.mxu2 %v4367_v4  ;;  %v4365_v16 = vld [vmem:[#allocation8 + $0x20] sm:$0xff]  ;;  %v4387_v24 = vld [vmem:[#allocation14 + $0x94] sm:$0xf]  ;;  %v291_v28 = vpack.c.bf16 %v289_v20, %v289_v20  ;;  %v4351_v30 = vld [vmem:[#allocation6 + $0x10] sm:$0xff] }
  0x58   :  { %414 = vmatpush.bf16.msra.mxu1 %v4359_v5  ;;  %v4388_v17 = vld [vmem:[#allocation14 + $0x98] sm:$0xf0]  ;;  %835 = vmatpush.bf16.msra.mxu3 %v3630_v11  ;;  %v3605_v22 = vld [vmem:[#allocation14 + $0x78] sm:$0xf]  ;;  %v3619_v25 = vld [vmem:[#allocation14 + $0x9c] sm:$0xf0] }
  0x59   :  { %v4357_v18 = vld [vmem:[#allocation6 + $0x40] sm:$0xff]  ;;  %v3618_v19 = vor.u32 %v4388_v17, %v3617_v14  ;;  %v4352_v26 = vld [vmem:[#allocation6 + $0x18] sm:$0xff]  ;;  %v3606_v29 = vor.u32 %v4385_v23, %v3605_v22  ;;  %v4363_v31 = vld [vmem:[#allocation8 + $0x10] sm:$0xff]  ;;  %v3622_v32 = vor.u32 %v4387_v24, %v3619_v25 }
  0x5a   :  { %398 = vmatpush.bf16.msra.mxu0 %v4354_v6  ;;  %v4364_v27 = vld [vmem:[#allocation8 + $0x18] sm:$0xff]  ;;  %v3593_v33 = vld [vmem:[#allocation14 + $0x60] sm:$0xf]  ;;  %v4382_v34 = vld [vmem:[#allocation14 + $0x68] sm:$0xf0] }
  0x5b   :  { %495 = vmatpush.bf16.msra.mxu2 %v4366_v7  ;;  %v4384_v35 = vld [vmem:[#allocation14 + $0x7c] sm:$0xf]  ;;  %v3607_v36 = vld [vmem:[#allocation14 + $0x84] sm:$0xf0]  ;;  %v4379_v38 = vld [vmem:[#allocation14 + $0x50] sm:$0xf0]  ;;  %v3594_v39 = vor.u32 %v4382_v34, %v3593_v33 }
  0x5c   :  { %415 = vmatpush.bf16.msra.mxu1 %v4358_v8  ;;  %836 = vmatpush.bf16.msra.mxu3 %v3618_v19  ;;  %v3581_v37 = vld [vmem:[#allocation14 + $0x48] sm:$0xf]  ;;  %v4381_v40 = vld [vmem:[#allocation14 + $0x64] sm:$0xf]  ;;  %v3595_v41 = vld [vmem:[#allocation14 + $0x6c] sm:$0xf0]  ;;  %v3610_v43 = vor.u32 %v4384_v35, %v3607_v36 }
  0x5d   :  { %v4350_v42 = vld [vmem:[#allocation6 + $0x8] sm:$0xff]  ;;  %v3582_v45 = vor.u32 %v4379_v38, %v3581_v37  ;;  %v3637_v46 = vld [vmem:[#allocation14 + $0xb0] sm:$0xf]  ;;  %v4392_v47 = vld [vmem:[#allocation14 + $0xb8] sm:$0xf0]  ;;  %v3598_v48 = vor.u32 %v4381_v40, %v3595_v41 }
  0x5e   :  { %399 = vmatpush.bf16.msra.mxu0 %v4353_v15  ;;  %v4362_v44 = vld [vmem:[#allocation8 + $0x8] sm:$0xff]  ;;  %v4349_v49 = vld [vmem:[#allocation6] sm:$0xff]  ;;  %v4378_v50 = vld [vmem:[#allocation14 + $0x4c] sm:$0xf]  ;;  %v3638_v55 = vor.u32 %v4392_v47, %v3637_v46 }
  0x5f   :  { %496 = vmatpush.bf16.msra.mxu2 %v4365_v16  ;;  %v3583_v51 = vld [vmem:[#allocation14 + $0x54] sm:$0xf0]  ;;  %v288_v52 = vld [vmem:[#allocation3] sm:$0xff]  ;;  %v4389_v57 = vld [vmem:[#allocation14 + $0xa0] sm:$0xf0] }
  0x60   :  { %416 = vmatpush.bf16.msra.mxu1 %v4357_v18  ;;  %837 = vmatpush.bf16.msra.mxu3 %v3606_v29  ;;  %v4361_v53 = vld [vmem:[#allocation8] sm:$0xff]  ;;  %v423_v54 = vld [vmem:[%s5895_s29] sm:$0xff]  ;;  %v3586_v58 = vor.u32 %v4378_v50, %v3583_v51  ;;  %v290_v59 = vpack.c.bf16 %v288_v52, %v288_v52  ;;  %v4383_v2 = vld [vmem:[#allocation14 + $0x70] sm:$0xf0] }
  0x61   :  { %v3625_v56 = vld [vmem:[#allocation14 + $0x98] sm:$0xf]  ;;  %v424_v60 = vpack.c.bf16 %v423_v54, %v423_v54  ;;  %v3613_v62 = vld [vmem:[#allocation14 + $0x80] sm:$0xf]  ;;  %v4386_v63 = vld [vmem:[#allocation14 + $0x88] sm:$0xf0] }
  0x62   :  { %400 = vmatpush.bf16.msra.mxu0 %v4352_v26  ;;  %v3626_v61 = vor.u32 %v4389_v57, %v3625_v56  ;;  %v3614_v0 = vor.u32 %v4386_v63, %v3613_v62  ;;  %v3601_v1 = vld [vmem:[#allocation14 + $0x68] sm:$0xf]  ;;  %v3589_v4 = vld [vmem:[#allocation14 + $0x50] sm:$0xf]  ;;  %v4380_v5 = vld [vmem:[#allocation14 + $0x58] sm:$0xf0] }
  0x63   :  { %497 = vmatpush.bf16.msra.mxu2 %v4364_v27  ;;  %3510 = vmatmul.msk.bf16.vlgmr.msra.gmra.mxu1 %vm392_vm0, %v291_v28  ;;  %v3602_v3 = vor.u32 %v4383_v2, %v3601_v1  ;;  %v3590_v6 = vor.u32 %v4380_v5, %v3589_v4  ;;  %v3569_v7 = vld [vmem:[#allocation14 + $0x30] sm:$0xf]  ;;  %v4376_v8 = vld [vmem:[#allocation14 + $0x38] sm:$0xf0]  ;;  %v4375_v9 = vld [vmem:[#allocation14 + $0x34] sm:$0xf] }
  0x64   :  { %853 = vmatpush.bf16.msrb.mxu1 %v3634_v21  ;;  %838 = vmatpush.bf16.msra.mxu3 %v3594_v39  ;;  %v3570_v10 = vor.u32 %v4376_v8, %v3569_v7  ;;  %v3571_v11 = vld [vmem:[#allocation14 + $0x3c] sm:$0xf0]  ;;  %v3577_v12 = vld [vmem:[#allocation14 + $0x38] sm:$0xf]  ;;  %v4377_v13 = vld [vmem:[#allocation14 + $0x40] sm:$0xf0] }
  0x65   :  { %v3574_v14 = vor.u32 %v4375_v9, %v3571_v11  ;;  %v3578_v15 = vor.u32 %v4377_v13, %v3577_v12  ;;  %v3557_v16 = vld [vmem:[#allocation14 + $0x18] sm:$0xf]  ;;  %v4373_v17 = vld [vmem:[#allocation14 + $0x20] sm:$0xf0]  ;;  %v4372_v18 = vld [vmem:[#allocation14 + $0x1c] sm:$0xf] }
  0x66   :  { %401 = vmatpush.bf16.msra.mxu0 %v4351_v30  ;;  %v3558_v19 = vor.u32 %v4373_v17, %v3557_v16  ;;  %v3559_v20 = vld [vmem:[#allocation14 + $0x24] sm:$0xf0]  ;;  %v3565_v21 = vld [vmem:[#allocation14 + $0x20] sm:$0xf]  ;;  %v4374_v22 = vld [vmem:[#allocation14 + $0x28] sm:$0xf0] }
  0x67   :  { %498 = vmatpush.bf16.msra.mxu2 %v4363_v31  ;;  %v3562_v23 = vor.u32 %v4372_v18, %v3559_v20  ;;  %v3566_v24 = vor.u32 %v4374_v22, %v3565_v21  ;;  %v3545_v25 = vld [vmem:[#allocation14] sm:$0xf]  ;;  %v4370_v26 = vld [vmem:[#allocation14 + $0x8] sm:$0xf0]  ;;  %v4369_v27 = vld [vmem:[#allocation14 + $0x4] sm:$0xf] }
  0x68   :  { %854 = vmatpush.bf16.msrb.mxu1 %v3622_v32  ;;  %839 = vmatpush.bf16.msra.mxu3 %v3582_v45  ;;  %v3546_v28 = vor.u32 %v4370_v26, %v3545_v25  ;;  %v3547_v29 = vld [vmem:[#allocation14 + $0xc] sm:$0xf0]  ;;  %v3553_v30 = vld [vmem:[#allocation14 + $0x8] sm:$0xf]  ;;  %v4371_v31 = vld [vmem:[#allocation14 + $0x10] sm:$0xf0] }
  0x69   :  { %v3550_v32 = vor.u32 %v4369_v27, %v3547_v29  ;;  %v3554_v33 = vor.u32 %v4371_v31, %v3553_v30  ;;  %v525_v35 = vld [vmem:[%s5874_s19 + $0x78] sm:$0xff]  ;;  %v524_v36 = vld [vmem:[%s5874_s19 + $0x70] sm:$0xff]  ;;  %v523_v38 = vld [vmem:[%s5874_s19 + $0x68] sm:$0xff] }
  0x6a   :  { %402 = vmatpush.bf16.msra.mxu0 %v4350_v42  ;;  %v522_v39 = vld [vmem:[%s5874_s19 + $0x60] sm:$0xff]  ;;  %v4603_v40 = vld [vmem:[#allocation9] ss:$0 sm:$0xff]  ;;  %v521_v41 = vld [vmem:[%s5874_s19 + $0x58] sm:$0xff] }
  0x6b   :  { %499 = vmatpush.bf16.msra.mxu2 %v4362_v44  ;;  %v5337_v45 = vld [vmem:[#allocation12] ss:$0 sm:$0xff]  ;;  %v519_v46 = vld [vmem:[%s5874_s19 + $0x48] sm:$0xff]  ;;  %v517_v51 = vld [vmem:[%s5874_s19 + $0x38] sm:$0xff] }
  0x6c   :  { %855 = vmatpush.bf16.msrb.mxu1 %v3610_v43  ;;  %840 = vmatpush.bf16.msra.mxu3 %v3570_v10  ;;  %v520_v43 = vld [vmem:[%s5874_s19 + $0x50] sm:$0xff]  ;;  %v511_v62 = vld [vmem:[%s5874_s19 + $0x8] sm:$0xff]  ;;  %v510_v63 = vld [vmem:[%s5874_s19] sm:$0xff] }
  0x6d   :  { %v4605_v54 = vld [vmem:[#allocation11] ss:$0 sm:$0xff] }
  0x6e   :  { %403 = vmatpush.bf16.msra.mxu0 %v4349_v49  ;;  %v518_v49 = vld [vmem:[%s5874_s19 + $0x40] sm:$0xff] }
  0x6f   :  { %500 = vmatpush.bf16.msra.mxu2 %v4361_v53  ;;  %v516_v53 = vld [vmem:[%s5874_s19 + $0x30] sm:$0xff] }
  0x70   :  { %856 = vmatpush.bf16.msrb.mxu1 %v3598_v48  ;;  %841 = vmatpush.bf16.msra.mxu3 %v3558_v19 }
  0x71   :  { %404 = vmatmul.bf16.vlgmr.msra.gmra.mxu0 %v290_v59  ;;  %v514_v59 = vld [vmem:[%s5874_s19 + $0x20] sm:$0xff] }
  0x72   :  { %871 = vmatpush.bf16.msrb.mxu0 %v3638_v55  ;;  %501 = vmatmul.bf16.vlgmr.msra.gmra.mxu2 %v424_v60  ;;  %v513_v60 = vld [vmem:[%s5874_s19 + $0x18] sm:$0xff] }
  0x73   :  { %892 = vmatpush.msrb.mxu2 %v525_v35 }
  0x74   :  { %857 = vmatpush.bf16.msrb.mxu1 %v3586_v58  ;;  %842 = vmatpush.bf16.msra.mxu3 %v3546_v28  ;;  %v515_v58 = vld [vmem:[%s5874_s19 + $0x28] sm:$0xff] }
  0x75   :  { %893 = vmatpush.msrb.mxu2 %v524_v36 }
  0x76   :  { %872 = vmatpush.bf16.msrb.mxu0 %v3626_v61  ;;  %v512_v61 = vld [vmem:[%s5874_s19 + $0x10] sm:$0xff] }
  0x77   :  { %894 = vmatpush.msrb.mxu2 %v523_v38 }
  0x78   :  { %858 = vmatpush.bf16.msrb.mxu1 %v3574_v14  ;;  %4561 = vmatpush.msrb.mxu3 %v525_v35 }
  0x79   :  { %895 = vmatpush.msrb.mxu2 %v522_v39 }
  0x7a   :  { %873 = vmatpush.bf16.msrb.mxu0 %v3614_v0  ;;  %4562 = vmatpush.msrb.mxu3 %v524_v36  ;;  %v5377_v0 = vld [vmem:[#allocation15] sm:$0x7] }
  0x7b   :  { %896 = vmatpush.msrb.mxu2 %v521_v41  ;;  %v701_v4 = vperm.slane %v5377_v0, 0 }
  0x7c   :  { %859 = vmatpush.bf16.msrb.mxu1 %v3562_v23  ;;  %4563 = vmatpush.msrb.mxu3 %v523_v38 }
  0x7d   :  { %897 = vmatpush.msrb.mxu2 %v520_v43 }
  0x7e   :  { %874 = vmatpush.bf16.msrb.mxu0 %v3602_v3  ;;  %4564 = vmatpush.msrb.mxu3 %v522_v39  ;;  %v702_v3 = vperm.slane %v5377_v0, 1 }
  0x7f   :  { %898 = vmatpush.msrb.mxu2 %v519_v46 }
  0x80   :  { %860 = vmatpush.bf16.msrb.mxu1 %v3550_v32  ;;  %4565 = vmatpush.msrb.mxu3 %v521_v41 }
  0x81   :  { %899 = vmatpush.msrb.mxu2 %v518_v49 }
  0x82   :  { %875 = vmatpush.bf16.msrb.mxu0 %v3590_v6  ;;  %4566 = vmatpush.msrb.mxu3 %v520_v43 }
  0x83   :  { %900 = vmatpush.msrb.mxu2 %v517_v51 }
  0x84   :  { %950 = vmatpush.msra.mxu1 %v525_v35  ;;  %4567 = vmatpush.msrb.mxu3 %v519_v46 }
  0x85   :  { %901 = vmatpush.msrb.mxu2 %v516_v53 }
  0x86   :  { %876 = vmatpush.bf16.msrb.mxu0 %v3578_v15  ;;  %951 = vmatpush.msra.mxu1 %v524_v36 }
  0x87   :  { %4568 = vmatpush.msrb.mxu3 %v518_v49  ;;  %902 = vmatpush.msrb.mxu2 %v515_v58 }
  0x88   :  { %952 = vmatpush.msra.mxu1 %v523_v38 }
  0x89   :  { %4569 = vmatpush.msrb.mxu3 %v517_v51  ;;  %903 = vmatpush.msrb.mxu2 %v514_v59 }
  0x8a   :  { %877 = vmatpush.bf16.msrb.mxu0 %v3566_v24  ;;  %953 = vmatpush.msra.mxu1 %v522_v39 }
  0x8b   :  { %4570 = vmatpush.msrb.mxu3 %v516_v53  ;;  %904 = vmatpush.msrb.mxu2 %v513_v60 }
  0x8c   :  { %954 = vmatpush.msra.mxu1 %v521_v41 }
  0x8d   :  { %4571 = vmatpush.msrb.mxu3 %v515_v58  ;;  %905 = vmatpush.msrb.mxu2 %v512_v61 }
  0x8e   :  { %878 = vmatpush.bf16.msrb.mxu0 %v3554_v33  ;;  %955 = vmatpush.msra.mxu1 %v520_v43  ;;  %v529_v33 = vld [vmem:[%s5875_s20 + $0x18] sm:$0xff] }
  0x8f   :  { %4572 = vmatpush.msrb.mxu3 %v514_v59  ;;  %906 = vmatpush.msrb.mxu2 %v511_v62 }
  0x90   :  { %956 = vmatpush.msra.mxu1 %v519_v46 }
  0x91   :  { %4573 = vmatpush.msrb.mxu3 %v513_v60  ;;  %907 = vmatpush.msrb.mxu2 %v510_v63 }
  0x92   :  { %921 = vmatpush.msra.mxu0 %v525_v35  ;;  %957 = vmatpush.msra.mxu1 %v518_v49 }
  0x93   :  { %4574 = vmatpush.msrb.mxu3 %v512_v61  ;;  %1082 = vmatpush.msra.mxu2 %v529_v33 }
  0x94   :  { %922 = vmatpush.msra.mxu0 %v524_v36  ;;  %958 = vmatpush.msra.mxu1 %v517_v51  ;;  %v528_v36 = vld [vmem:[%s5875_s20 + $0x10] sm:$0xff] }
  0x95   :  { %4575 = vmatpush.msrb.mxu3 %v511_v62  ;;  %1083 = vmatpush.msra.mxu2 %v528_v36 }
  0x96   :  { %923 = vmatpush.msra.mxu0 %v523_v38  ;;  %959 = vmatpush.msra.mxu1 %v516_v53 }
  0x97   :  { %4576 = vmatpush.msrb.mxu3 %v510_v63 }
  0x98   :  { %924 = vmatpush.msra.mxu0 %v522_v39  ;;  %960 = vmatpush.msra.mxu1 %v515_v58 }
  0x9a   :  { %925 = vmatpush.msra.mxu0 %v521_v41  ;;  %961 = vmatpush.msra.mxu1 %v514_v59 }
  0x9c   :  { %926 = vmatpush.msra.mxu0 %v520_v43  ;;  %962 = vmatpush.msra.mxu1 %v513_v60  ;;  %v526_v43 = vld [vmem:[%s5875_s20] sm:$0xff] }
  0x9e   :  { %927 = vmatpush.msra.mxu0 %v519_v46  ;;  %963 = vmatpush.msra.mxu1 %v512_v61 }
  0xa0   :  { %928 = vmatpush.msra.mxu0 %v518_v49  ;;  %964 = vmatpush.msra.mxu1 %v511_v62 }
  0xa2   :  { %929 = vmatpush.msra.mxu0 %v517_v51  ;;  %965 = vmatpush.msra.mxu1 %v510_v63 }
  0xa4   :  { %930 = vmatpush.msra.mxu0 %v516_v53 }
  0xa6   :  { %931 = vmatpush.msra.mxu0 %v515_v58 }
  0xa8   :  { %932 = vmatpush.msra.mxu0 %v514_v59 }
  0xaa   :  { %933 = vmatpush.msra.mxu0 %v513_v60 }
  0xac   :  { %934 = vmatpush.msra.mxu0 %v512_v61 }
  0xae   :  { %935 = vmatpush.msra.mxu0 %v511_v62 }
  0xb0   :  { %936 = vmatpush.msra.mxu0 %v510_v63 }
  0xe0   :  { %v418_v34 = vpop.f32.mrf.mxu1 }
  0xe8   :  { %v420_v37 = vpop.f32.mrf.mxu1 }
  0xee   :  { %v405_v42 = vpop.f32.mrf.mxu0 }
  0xef   :  { %v406_v44 = vadd.f32 %v4603_v40, %v405_v42  ;;  %v527_v42 = vld [vmem:[%s5875_s20 + $0x8] sm:$0xff] }
  0xf0   :  { %1084 = vmatpush.msra.mxu2 %v527_v42 }
  0xf1   :  { %v5342_v47 = vadd.f32 %v418_v34, %v406_v44 }
  0xf2   :  { %1085 = vmatpush.msra.mxu2 %v526_v43 }
  0xf3   :  { %v698_v48 = vpack.c.bf16 %v5342_v47, %v5337_v45 }
  0xf5   :  { %v502_v50 = vpop.f32.mrf.mxu2  ;;  %843 = vmatmul.bf16.vlgmr.msra.gmra.mxu3 %v698_v48  ;;  %861 = vmatmul.bf16.vlgmr.msrb.gmra.mxu1 %v698_v48 }
  0xf6   :  { %879 = vmatmul.bf16.vlgmr.msrb.gmra.mxu0 %v698_v48  ;;  %v407_v52 = vpop.f32.mrf.mxu0  ;;  %v5355_v56 = vadd.f32 %v4605_v54, %v502_v50  ;;  %1123 = vmatpush.msra.mxu3 %v529_v33 }
  0xf7   :  { %1167 = vmatpush.msrb.mxu0 %v529_v33 }
  0xf8   :  { %v699_v57 = vpack.c.bf16 %v5355_v56, %v5355_v56  ;;  %1124 = vmatpush.msra.mxu3 %v528_v36 }
  0xf9   :  { %1168 = vmatpush.msrb.mxu0 %v528_v36 }
  0xfa   :  { %1125 = vmatpush.msra.mxu3 %v527_v42 }
  0xfb   :  { %1169 = vmatpush.msrb.mxu0 %v527_v42 }
  0xfc   :  { %1126 = vmatpush.msra.mxu3 %v526_v43 }
  0xfd   :  { %v504_v55 = vpop.f32.mrf.mxu2  ;;  %1170 = vmatpush.msrb.mxu0 %v526_v43 }
 0x105   :  { %848 = vmatmul.bf16.gmra.mxu3 %v699_v57  ;;  %866 = vmatmul.bf16.gmra.mxu1 %v699_v57 }
 0x106   :  { %884 = vmatmul.bf16.gmra.mxu0 %v699_v57 }
 0x172   :  { %v862_v1 = vpop.f32.mrf.mxu1 }
 0x173   :  { %v5379_v2 = vpop.f32.mrf.mxu0  ;;  %v863_v6 = vadd.f32 %v862_v1, %v702_v3 }
 0x178   :  { %v844_v5 = vpop.f32.mrf.mxu3 }
 0x179   :  { %v845_v7 = vadd.f32 %v844_v5, %v701_v4 }
 0x17a   :  { %v864_v8 = vpop.f32.mrf.mxu1 }
 0x17b   :  { %v865_v9 = vadd.f32 %v864_v8, %v702_v3  ;;  %v5383_v10 = vpop.f32.mrf.mxu0  ;;  %v889_v11 = vmul.f32 %v863_v6, %v845_v7 }
 0x17d   :  { %v918_v12 = vmul.f32 %v865_v9, %v845_v7  ;;  %908 = vmatmul.f32.vlgmr.msrb.gmra.mxu2 %v889_v11 }
 0x17f   :  { %937 = vmatmul.f32.vlgmr.msra.gmra.mxu0 %v918_v12 }
 0x180   :  { %v846_v13 = vpop.f32.mrf.mxu3 }
 0x181   :  { %v847_v14 = vadd.f32 %v846_v13, %v701_v4 }
 0x182   :  { %v867_v15 = vpop.f32.mrf.mxu1 }
 0x183   :  { %v868_v16 = vadd.f32 %v867_v15, %v702_v3  ;;  %v5385_v17 = vpop.f32.mrf.mxu0  ;;  %v890_v18 = vmul.f32 %v863_v6, %v847_v14  ;;  %v919_v19 = vmul.f32 %v865_v9, %v847_v14 }
 0x185   :  { %v947_v20 = vmul.f32 %v868_v16, %v845_v7  ;;  %911 = vmatmul.f32.gmra.mxu2 %v890_v18  ;;  %940 = vmatmul.f32.vlgmr.msrb.gmra.mxu3 %v919_v19  ;;  %v948_v27 = vmul.f32 %v868_v16, %v847_v14  ;;  %v4400_v19 = vld [vmem:[%s5864_s9 + $0x38] sm:$0xff] }
 0x186   :  { %1240 = vmatpush.bf16.msrb.mxu1 %v4400_v19  ;;  %v5433_v19 = vld [vmem:[#allocation24 + $0x78] sm:$0xff] }
 0x187   :  { %966 = vmatmul.f32.vlgmr.msra.gmra.mxu1 %v947_v20  ;;  %1261 = vmatpush.msrb.mxu2 %v5433_v19 }
 0x188   :  { %v849_v21 = vpop.f32.mrf.mxu3  ;;  %1293 = vmatpush.msrb.mxu3 %v5433_v19 }
 0x189   :  { %v850_v22 = vadd.f32 %v849_v21, %v701_v4 }
 0x18a   :  { %v869_v23 = vpop.f32.mrf.mxu1 }
 0x18b   :  { %v887_v24 = vpop.f32.mrf.mxu0  ;;  %v891_v25 = vmul.f32 %v863_v6, %v850_v22  ;;  %v920_v26 = vmul.f32 %v865_v9, %v850_v22  ;;  %v949_v29 = vmul.f32 %v868_v16, %v850_v22  ;;  %v4399_v23 = vld [vmem:[%s5864_s9 + $0x30] sm:$0xff] }
 0x18c   :  { %1241 = vmatpush.bf16.msrb.mxu1 %v4399_v23  ;;  %v5441_v23 = vld [vmem:[#allocation24 + $0x68] sm:$0xff] }
 0x18d   :  { %914 = vmatmul.f32.gmra.mxu2 %v891_v25  ;;  %943 = vmatmul.f32.gmra.mxu3 %v920_v26 }
 0x18f   :  { %969 = vmatmul.f32.gmra.mxu1 %v948_v27 }
 0x190   :  { %v851_v28 = vpop.f32.mrf.mxu3 }
 0x197   :  { %972 = vmatmul.f32.gmra.mxu1 %v949_v29 }
 0x1fc   :  { %v938_v31 = vpop.f32.mrf.mxu0 }
 0x200   :  { %v909_v30 = vpop.f32.mrf.mxu2 }
 0x201   :  { %v976_v32 = vmax.f32 %v909_v30, %v938_v31 }
 0x204   :  { %v967_v34 = vpop.f32.mrf.mxu1 }
 0x205   :  { %v979_v35 = vmax.f32 %v976_v32, %v967_v34 }
 0x207   :  { %v982_v37 = vsub.f32 %v909_v30, %v979_v35  ;;  %v991_v38 = vsub.f32 %v938_v31, %v979_v35  ;;  %v1000_v39 = vsub.f32 %v967_v34, %v979_v35 }
 0x208   :  { %v912_v40 = vpop.f32.mrf.mxu2  ;;  %v941_v41 = vpop.f32.mrf.mxu3 }
 0x209   :  { %v985_v44 = vmul.f32 1.442695, %v982_v37  ;;  %v994_v46 = vmul.f32 1.442695, %v991_v38  ;;  %v1003_v48 = vmul.f32 1.442695, %v1000_v39  ;;  %v977_v49 = vmax.f32 %v912_v40, %v941_v41 }
 0x20b   :  { %4618 = vpow2.f32 %v985_v44 }
 0x20c   :  { %4620 = vpow2.f32 %v994_v46  ;;  %v970_v50 = vpop.f32.mrf.mxu1 }
 0x20d   :  { %v980_v51 = vmax.f32 %v977_v49, %v970_v50  ;;  %4622 = vpow2.f32 %v1003_v48 }
 0x20f   :  { %v983_v52 = vsub.f32 %v912_v40, %v980_v51  ;;  %v992_v53 = vsub.f32 %v941_v41, %v980_v51  ;;  %v1001_v54 = vsub.f32 %v970_v50, %v980_v51 }
 0x210   :  { %v915_v55 = vpop.f32.mrf.mxu2  ;;  %v944_v57 = vpop.f32.mrf.mxu3 }
 0x211   :  { %v4619_v58 = vpop.eup %4618  ;;  %v987_v59 = vmul.f32 1.442695, %v983_v52  ;;  %v996_v60 = vmul.f32 1.442695, %v992_v53  ;;  %v1005_v62 = vmul.f32 1.442695, %v1001_v54  ;;  %v978_v1 = vmax.f32 %v915_v55, %v944_v57 }
 0x212   :  { %v4621_v61 = vpop.eup %4620 }
 0x213   :  { %v1009_v63 = vadd.f32 %v4621_v61, %v4619_v58  ;;  %4624 = vpow2.f32 %v987_v59  ;;  %v4623_v3 = vpop.eup %4622 }
 0x214   :  { %4626 = vpow2.f32 %v996_v60  ;;  %v973_v4 = vpop.f32.mrf.mxu1 }
 0x215   :  { %v1012_v5 = vadd.f32 %v4623_v3, %v1009_v63  ;;  %v981_v6 = vmax.f32 %v978_v1, %v973_v4  ;;  %4628 = vpow2.f32 %v1005_v62 }
 0x217   :  { %4630 = vrcp.f32 %v1012_v5  ;;  %v984_v7 = vsub.f32 %v915_v55, %v981_v6  ;;  %v993_v8 = vsub.f32 %v944_v57, %v981_v6  ;;  %v1002_v9 = vsub.f32 %v973_v4, %v981_v6 }
 0x218   :  { %v1026_v25 = vand.u32 2147483648, %v1012_v5  ;;  %v1024_v28 = vand.u32 2147483647, %v1012_v5  ;;  %vm1020_vm2 = vweird.f32 %v1012_v5 }
 0x219   :  { %v4625_v11 = vpop.eup %4624  ;;  %v989_v13 = vmul.f32 1.442695, %v984_v7  ;;  %v998_v14 = vmul.f32 1.442695, %v993_v8  ;;  %v1007_v15 = vmul.f32 1.442695, %v1002_v9 }
 0x21a   :  { %v4627_v12 = vpop.eup %4626  ;;  %v1027_v34 = vor.u32 1.1754944e-38, %v1026_v25  ;;  %vm1025_vm4 = vcmp.eq.f32.partialorder %v1024_v28, 8.507059e+37  ;;  %v4398_v7 = vld [vmem:[%s5864_s9 + $0x28] sm:$0xff]  ;;  %v4397_v8 = vld [vmem:[%s5864_s9 + $0x20] sm:$0xff]  ;;  %v4396_v9 = vld [vmem:[%s5864_s9 + $0x18] sm:$0xff] }
 0x21b   :  { %v1010_v16 = vadd.f32 %v4627_v12, %v4625_v11  ;;  %v4629_v18 = vpop.eup %4628  ;;  %4632 = vpow2.f32 %v989_v13  ;;  %1242 = vmatpush.bf16.msrb.mxu1 %v4398_v7  ;;  %v4393_v13 = vld [vmem:[%s5864_s9] sm:$0xff]  ;;  %v5445_v25 = vld [vmem:[#allocation24 + $0x60] sm:$0xff] }
 0x21c   :  { %4634 = vpow2.f32 %v998_v14 }
 0x21d   :  { %v4631_v20 = vpop.eup %4630  ;;  %v1013_v21 = vadd.f32 %v4629_v18, %v1010_v16  ;;  %4636 = vpow2.f32 %v1007_v15  ;;  %v703_v15 = vperm.slane %v5377_v0, 2 }
 0x21e   :  { %v1016_v22 = vmul.f32 %v4631_v20, %v1012_v5  ;;  %vm1021_vm1 = vweird.f32 %v4631_v20 }
 0x21f   :  { %4638 = vrcp.f32 %v1013_v21  ;;  %vm1022_vm3 = vmor %vm1020_vm2, %vm1021_vm1  ;;  %v1040_v43 = vand.u32 2147483648, %v1013_v21  ;;  %v1038_v46 = vand.u32 2147483647, %v1013_v21  ;;  %vm1034_vm7 = vweird.f32 %v1013_v21  ;;  %1243 = vmatpush.bf16.msrb.mxu1 %v4397_v8 }
 0x220   :  { %v1017_v24 = vsub.f32 1.0, %v1016_v22  ;;  %v883_v22 = vadd.f32 %v5383_v10, %v703_v15  ;;  %v886_v10 = vadd.f32 %v5385_v17, %v703_v15 }
 0x221   :  { %v4633_v26 = vpop.eup %4632  ;;  %v1041_v50 = vor.u32 1.1754944e-38, %v1040_v43  ;;  %vm1039_vm9 = vcmp.eq.f32.partialorder %v1038_v46, 8.507059e+37  ;;  %v5470_v43 = vld [vmem:[#allocation24 + $0x30] sm:$0xff] }
 0x222   :  { %v1018_v27 = vmul.f32 %v4631_v20, %v1017_v24  ;;  %v4635_v29 = vpop.eup %4634 }
 0x223   :  { %v4637_v30 = vpop.eup %4636  ;;  %v1011_v32 = vadd.f32 %v4635_v29, %v4633_v26  ;;  %1244 = vmatpush.bf16.msrb.mxu1 %v4396_v9 }
 0x224   :  { %v1019_v31 = vadd.f32 %v4631_v20, %v1018_v27  ;;  %v5449_v27 = vld [vmem:[#allocation24 + $0x58] sm:$0xff] }
 0x225   :  { %v4639_v33 = vpop.eup %4638  ;;  %v1014_v36 = vadd.f32 %v4637_v30, %v1011_v32  ;;  %v5454_v32 = vld [vmem:[#allocation24 + $0x50] sm:$0xff] }
 0x226   :  { %v1023_v35 = vsel %vm1022_vm3, %v4631_v20, %v1019_v31  ;;  %v1030_v37 = vmul.f32 %v4639_v33, %v1013_v21  ;;  %vm1035_vm6 = vweird.f32 %v4639_v33  ;;  %v5435_v20 = vld [vmem:[#allocation24 + $0x70] sm:$0xff]  ;;  %v881_v21 = vadd.f32 %v5379_v2, %v703_v15 }
 0x227   :  { %v1028_v38 = vsel %vm1025_vm4, %v1027_v34, %v1023_v35  ;;  %4640 = vrcp.f32 %v1014_v36  ;;  %vm1036_vm8 = vmor %vm1034_vm7, %vm1035_vm6  ;;  %v1054_v59 = vand.u32 2147483648, %v1014_v36  ;;  %vm1048_vm11 = vweird.f32 %v1014_v36  ;;  %1262 = vmatpush.msrb.mxu2 %v5435_v20  ;;  %1294 = vmatpush.msrb.mxu3 %v5435_v20 }
 0x228   :  { %v1143_v39 = vmul.f32 %v4623_v3, %v1028_v38  ;;  %v1057_v40 = vmul.f32 %v4619_v58, %v1028_v38  ;;  %v1099_v41 = vmul.f32 %v4621_v61, %v1028_v38  ;;  %v1031_v42 = vsub.f32 1.0, %v1030_v37  ;;  %v5462_v38 = vld [vmem:[#allocation24 + $0x40] sm:$0xff] }
 0x229   :  { %v1052_v61 = vand.u32 2147483647, %v1014_v36  ;;  %v1055_v63 = vor.u32 1.1754944e-38, %v1054_v59  ;;  %1263 = vmatpush.msrb.mxu2 %v5441_v23  ;;  %1295 = vmatpush.msrb.mxu3 %v5441_v23  ;;  %v5495_v59 = vld [vmem:[#allocation24] sm:$0xff] }
 0x22a   :  { %3639 = vmatmul.msk.f32.vlgmr.msra.gmra.mxu2 %vm1060_vm5, %v1057_v40  ;;  %3642 = vmatmul.msk.f32.vlgmr.msra.gmra.mxu3 %vm1060_vm5, %v1099_v41  ;;  %v1032_v44 = vmul.f32 %v4639_v33, %v1031_v42  ;;  %v5466_v40 = vld [vmem:[#allocation24 + $0x38] sm:$0xff] }
 0x22b   :  { %3645 = vmatmul.msk.f32.vlgmr.msrb.gmra.mxu0 %vm1060_vm5, %v1143_v39  ;;  %vm1053_vm13 = vcmp.eq.f32.partialorder %v1052_v61, 8.507059e+37  ;;  %1264 = vmatpush.msrb.mxu2 %v5445_v25 }
 0x22c   :  { %v1033_v48 = vadd.f32 %v4639_v33, %v1032_v44  ;;  %1296 = vmatpush.msrb.mxu3 %v5445_v25 }
 0x22d   :  { %v4641_v49 = vpop.eup %4640  ;;  %1265 = vmatpush.msrb.mxu2 %v5449_v27 }
 0x22e   :  { %v1037_v51 = vsel %vm1036_vm8, %v4639_v33, %v1033_v48  ;;  %v1044_v52 = vmul.f32 %v4641_v49, %v1014_v36  ;;  %vm1049_vm10 = vweird.f32 %v4641_v49  ;;  %1297 = vmatpush.msrb.mxu3 %v5449_v27  ;;  %v5458_v36 = vld [vmem:[#allocation24 + $0x48] sm:$0xff] }
 0x22f   :  { %v1042_v53 = vsel %vm1039_vm9, %v1041_v50, %v1037_v51  ;;  %vm1050_vm12 = vmor %vm1048_vm11, %vm1049_vm10  ;;  %1266 = vmatpush.msrb.mxu2 %v5454_v32  ;;  %v5474_v48 = vld [vmem:[#allocation24 + $0x28] sm:$0xff] }
 0x230   :  { %v1058_v54 = vmul.f32 %v4625_v11, %v1042_v53  ;;  %v1100_v55 = vmul.f32 %v4627_v12, %v1042_v53  ;;  %v1144_v57 = vmul.f32 %v4629_v18, %v1042_v53  ;;  %v1045_v58 = vsub.f32 1.0, %v1044_v52  ;;  %v4395_v11 = vld [vmem:[%s5864_s9 + $0x10] sm:$0xff]  ;;  %v4394_v12 = vld [vmem:[%s5864_s9 + $0x8] sm:$0xff]  ;;  %1298 = vmatpush.msrb.mxu3 %v5454_v32  ;;  %v5482_v52 = vld [vmem:[#allocation24 + $0x18] sm:$0xff] }
 0x231   :  { %1245 = vmatpush.bf16.msrb.mxu1 %v4395_v11  ;;  %1267 = vmatpush.msrb.mxu2 %v5458_v36 }
 0x232   :  { %3640 = vmatmul.msk.f32.gmra.mxu2 %vm1060_vm5, %v1058_v54  ;;  %3643 = vmatmul.msk.f32.gmra.mxu3 %vm1060_vm5, %v1100_v55  ;;  %v1046_v60 = vmul.f32 %v4641_v49, %v1045_v58  ;;  %v5492_v58 = vld [vmem:[#allocation24 + $0x8] sm:$0xff] }
 0x233   :  { %3646 = vmatmul.msk.f32.gmra.mxu0 %vm1060_vm5, %v1144_v57  ;;  %1299 = vmatpush.msrb.mxu3 %v5458_v36  ;;  %v5488_v57 = vld [vmem:[#allocation24 + $0x10] sm:$0xff] }
 0x234   :  { %v1047_v62 = vadd.f32 %v4641_v49, %v1046_v60  ;;  %1268 = vmatpush.msrb.mxu2 %v5462_v38  ;;  %v4606_v60 = vld [vmem:[#allocation17] ss:$0 sm:$0xff] }
 0x235   :  { %1246 = vmatpush.bf16.msrb.mxu1 %v4394_v12  ;;  %1300 = vmatpush.msrb.mxu3 %v5462_v38 }
 0x236   :  { %v1051_v1 = vsel %vm1050_vm12, %v4641_v49, %v1047_v62  ;;  %1269 = vmatpush.msrb.mxu2 %v5466_v40  ;;  %v5478_v49 = vld [vmem:[#allocation24 + $0x20] sm:$0xff] }
 0x237   :  { %v1056_v3 = vsel %vm1053_vm13, %v1055_v63, %v1051_v1  ;;  %1301 = vmatpush.msrb.mxu3 %v5466_v40 }
 0x238   :  { %v1059_v4 = vmul.f32 %v4633_v26, %v1056_v3  ;;  %v1101_v5 = vmul.f32 %v4635_v29, %v1056_v3  ;;  %v1145_v6 = vmul.f32 %v4637_v30, %v1056_v3  ;;  %1270 = vmatpush.msrb.mxu2 %v5470_v43 }
 0x239   :  { %1247 = vmatpush.bf16.msrb.mxu1 %v4393_v13  ;;  %1302 = vmatpush.msrb.mxu3 %v5470_v43 }
 0x23a   :  { %3641 = vmatmul.msk.f32.gmra.mxu2 %vm1060_vm5, %v1059_v4  ;;  %3644 = vmatmul.msk.f32.gmra.mxu3 %vm1060_vm5, %v1101_v5 }
 0x23b   :  { %3647 = vmatmul.msk.f32.gmra.mxu0 %vm1060_vm5, %v1145_v6  ;;  %1271 = vmatpush.msrb.mxu2 %v5474_v48 }
 0x23c   :  { %1303 = vmatpush.msrb.mxu3 %v5474_v48 }
 0x23d   :  { %1272 = vmatpush.msrb.mxu2 %v5478_v49 }
 0x23e   :  { %1304 = vmatpush.msrb.mxu3 %v5478_v49 }
 0x23f   :  { %1273 = vmatpush.msrb.mxu2 %v5482_v52 }
 0x240   :  { %1305 = vmatpush.msrb.mxu3 %v5482_v52 }
 0x241   :  { %1274 = vmatpush.msrb.mxu2 %v5488_v57 }
 0x242   :  { %1306 = vmatpush.msrb.mxu3 %v5488_v57 }
 0x243   :  { %1275 = vmatpush.msrb.mxu2 %v5492_v58 }
 0x244   :  { %1307 = vmatpush.msrb.mxu3 %v5492_v58 }
 0x245   :  { %1276 = vmatpush.msrb.mxu2 %v5495_v59 }
 0x246   :  { %1308 = vmatpush.msrb.mxu3 %v5495_v59 }
 0x2a8   :  { %v1172_v14 = vpop.f32.mrf.mxu0 }
 0x2a9   :  { %v1181_v33 = vmul.f32 %v1172_v14, %v886_v10 }
 0x2ad   :  { %v1087_v16 = vpop.f32.mrf.mxu2  ;;  %v1128_v18 = vpop.f32.mrf.mxu3 }
 0x2ae   :  { %v1096_v0 = vmul.f32 %v1087_v16, %v881_v21  ;;  %v1137_v24 = vmul.f32 %v1128_v18, %v883_v22  ;;  %v3794_v16 = vld [vmem:[#allocation18 + $0xe0] sm:$0xf]  ;;  %v4431_v18 = vld [vmem:[#allocation18 + $0xec] sm:$0xf0] }
 0x2b0   :  { %v1175_v26 = vpop.f32.mrf.mxu0  ;;  %v1140_v29 = vadd.f32 %v1137_v24, %v1096_v0  ;;  %v3796_v0 = vld [vmem:[#allocation18 + $0xf0] sm:$0xf0]  ;;  %v3802_v24 = vld [vmem:[#allocation18 + $0xe8] sm:$0xf] }
 0x2b1   :  { %v1182_v34 = vmul.f32 %v1175_v26, %v886_v10  ;;  %v4432_v26 = vld [vmem:[#allocation18 + $0xf4] sm:$0xf0] }
 0x2b2   :  { %v1184_v37 = vadd.f32 %v1181_v33, %v1140_v29  ;;  %v3804_v29 = vld [vmem:[#allocation18 + $0xf8] sm:$0xf0]  ;;  %v4427_v33 = vld [vmem:[#allocation18 + $0xcc] sm:$0xf0] }
 0x2b5   :  { %v1090_v2 = vpop.f32.mrf.mxu2  ;;  %v1131_v28 = vpop.f32.mrf.mxu3 }
 0x2b6   :  { %v1097_v30 = vmul.f32 %v1090_v2, %v881_v21  ;;  %v1138_v31 = vmul.f32 %v1131_v28, %v883_v22  ;;  %v3803_v28 = vor.u32 %v4432_v26, %v3802_v24  ;;  %v4413_v24 = vld [vmem:[#allocation18 + $0x64] sm:$0xf] }
 0x2b8   :  { %v1141_v35 = vadd.f32 %v1138_v31, %v1097_v30  ;;  %v1178_v50 = vpop.f32.mrf.mxu0  ;;  %1571 = vmatpush.bf16.msra.mxu2 %v3803_v28  ;;  %v3778_v31 = vld [vmem:[#allocation18 + $0xc0] sm:$0xf]  ;;  %v3738_v28 = vld [vmem:[#allocation18 + $0x68] sm:$0xf] }
 0x2b9   :  { %v1183_v53 = vmul.f32 %v1178_v50, %v886_v10  ;;  %v4430_v10 = vld [vmem:[#allocation18 + $0xec] sm:$0xf] }
 0x2ba   :  { %v1185_v17 = vadd.f32 %v1182_v34, %v1141_v35  ;;  %v3807_v30 = vor.u32 %v4430_v10, %v3804_v29  ;;  %v4425_v34 = vld [vmem:[#allocation18 + $0xc4] sm:$0xf]  ;;  %v3779_v35 = vor.u32 %v4427_v33, %v3778_v31  ;;  %v4416_v29 = vld [vmem:[#allocation18 + $0x74] sm:$0xf0]  ;;  %v3740_v31 = vld [vmem:[#allocation18 + $0x78] sm:$0xf0] }
 0x2bb   :  { %v3739_v33 = vor.u32 %v4416_v29, %v3738_v28 }
 0x2bc   :  { %v1187_v39 = vpack.c.bf16 %v1185_v17, %v1184_v37  ;;  %1589 = vmatpush.bf16.msra.mxu3 %v3807_v30  ;;  %v3780_v37 = vld [vmem:[#allocation18 + $0xd0] sm:$0xf0]  ;;  %v3786_v17 = vld [vmem:[#allocation18 + $0xc8] sm:$0xf]  ;;  %v4414_v30 = vld [vmem:[#allocation18 + $0x6c] sm:$0xf] }
 0x2bd   :  { %v1093_v41 = vpop.f32.mrf.mxu2  ;;  %v1134_v42 = vpop.f32.mrf.mxu3 }
 0x2be   :  { %1248 = vmatmul.bf16.vlgmr.msrb.gmra.mxu1 %v1187_v39  ;;  %v1098_v44 = vmul.f32 %v1093_v41, %v881_v21  ;;  %v1139_v46 = vmul.f32 %v1134_v42, %v883_v22  ;;  %v4429_v21 = vld [vmem:[#allocation18 + $0xe4] sm:$0xf]  ;;  %v3795_v22 = vor.u32 %v4431_v18, %v3794_v16  ;;  %v4428_v39 = vld [vmem:[#allocation18 + $0xd4] sm:$0xf0]  ;;  %v3783_v41 = vor.u32 %v4425_v34, %v3780_v37  ;;  %v4418_v16 = vld [vmem:[#allocation18 + $0x8c] sm:$0xf] }
 0x2bf   :  { %v3799_v2 = vor.u32 %v4429_v21, %v3796_v0  ;;  %v3787_v42 = vor.u32 %v4428_v39, %v3786_v17  ;;  %v3756_v18 = vld [vmem:[#allocation18 + $0x98] sm:$0xf0]  ;;  %v4415_v0 = vld [vmem:[#allocation18 + $0x6c] sm:$0xf0]  ;;  %v3743_v34 = vor.u32 %v4414_v30, %v3740_v31  ;;  %v4409_v17 = vld [vmem:[#allocation18 + $0x44] sm:$0xf] }
 0x2c0   :  { %v1142_v51 = vadd.f32 %v1139_v46, %v1098_v44  ;;  %1535 = vmatpush.bf16.msra.mxu0 %v3795_v22  ;;  %v4426_v44 = vld [vmem:[#allocation18 + $0xcc] sm:$0xf]  ;;  %v3788_v46 = vld [vmem:[#allocation18 + $0xd8] sm:$0xf0]  ;;  %v3759_v21 = vor.u32 %v4418_v16, %v3756_v18  ;;  %v3730_v22 = vld [vmem:[#allocation18 + $0x60] sm:$0xf] }
 0x2c1   :  { %1553 = vmatpush.bf16.msra.mxu1 %v3799_v2  ;;  %v3791_v50 = vor.u32 %v4426_v44, %v3788_v46  ;;  %1572 = vmatpush.bf16.msra.mxu2 %v3787_v42  ;;  %v3731_v26 = vor.u32 %v4415_v0, %v3730_v22  ;;  %v3732_v2 = vld [vmem:[#allocation18 + $0x70] sm:$0xf0]  ;;  %v4411_v37 = vld [vmem:[#allocation18 + $0x4c] sm:$0xf0]  ;;  %v3722_v42 = vld [vmem:[#allocation18 + $0x48] sm:$0xf] }
 0x2c2   :  { %v1186_v54 = vadd.f32 %v1183_v53, %v1142_v51  ;;  %v3762_v51 = vld [vmem:[#allocation18 + $0xa0] sm:$0xf]  ;;  %v4423_v53 = vld [vmem:[#allocation18 + $0xac] sm:$0xf0]  ;;  %v3735_v10 = vor.u32 %v4413_v24, %v3732_v2  ;;  %v4412_v44 = vld [vmem:[#allocation18 + $0x54] sm:$0xf0] }
 0x2c3   :  { %1590 = vmatpush.bf16.msra.mxu3 %v3791_v50  ;;  %v3723_v50 = vor.u32 %v4412_v44, %v3722_v42  ;;  %v3684_v16 = vld [vmem:[#allocation18 + $0x10] sm:$0xf0]  ;;  %v3690_v18 = vld [vmem:[#allocation18 + $0x8] sm:$0xf]  ;;  %v4404_v22 = vld [vmem:[#allocation18 + $0x14] sm:$0xf0] }
 0x2c4   :  { %v1188_v55 = vpack.c.bf16 %v1186_v54, %v1186_v54  ;;  %1536 = vmatpush.bf16.msra.mxu0 %v3779_v35  ;;  %v4421_v54 = vld [vmem:[#allocation18 + $0xa4] sm:$0xf]  ;;  %v3714_v35 = vld [vmem:[#allocation18 + $0x40] sm:$0xf]  ;;  %v4402_v0 = vld [vmem:[#allocation18 + $0xc] sm:$0xf] }
 0x2c5   :  { %1554 = vmatpush.bf16.msra.mxu1 %v3783_v41  ;;  %v3715_v39 = vor.u32 %v4411_v37, %v3714_v35  ;;  %v3716_v41 = vld [vmem:[#allocation18 + $0x50] sm:$0xf0]  ;;  %v3692_v24 = vld [vmem:[#allocation18 + $0x18] sm:$0xf0] }
 0x2c6   :  { %v3719_v46 = vor.u32 %v4409_v17, %v3716_v41  ;;  %v3695_v2 = vor.u32 %v4402_v0, %v3692_v24  ;;  %v4445_v0 = vld [vmem:[#allocation21 + $0x60] sm:$0xff] }
 0x2ce   :  { %1253 = vmatmul.bf16.gmra.mxu1 %v1188_v55  ;;  %v3763_v55 = vor.u32 %v4423_v53, %v3762_v51  ;;  %v4410_v51 = vld [vmem:[#allocation18 + $0x4c] sm:$0xf]  ;;  %v3724_v53 = vld [vmem:[#allocation18 + $0x58] sm:$0xf0] }
 0x2d0   :  { %1537 = vmatpush.bf16.msra.mxu0 %v3763_v55  ;;  %v3698_v55 = vld [vmem:[#allocation18 + $0x20] sm:$0xf] }
 0x33b   :  { %v1249_v61 = vpop.f32.mrf.mxu1 }
 0x33c   :  { %v1250_v62 = vadd.f32 %v4606_v60, %v1249_v61  ;;  %v3770_v61 = vld [vmem:[#allocation18 + $0xa8] sm:$0xf] }
 0x33e   :  { %v1258_v63 = vadd.f32 %v5337_v45, %v1250_v62  ;;  %v4424_v62 = vld [vmem:[#allocation18 + $0xb4] sm:$0xf0] }
 0x340   :  { %1277 = vmatmul.f32.vlgmr.msrb.gmra.mxu2 %v1258_v63 }
 0x343   :  { %v1251_v1 = vpop.f32.mrf.mxu1 }
 0x344   :  { %v1252_v3 = vadd.f32 %v4606_v60, %v1251_v1  ;;  %v3771_v1 = vor.u32 %v4424_v62, %v3770_v61  ;;  %v4405_v61 = vld [vmem:[#allocation18 + $0x24] sm:$0xf] }
 0x346   :  { %v1259_v4 = vadd.f32 %v1252_v3, %v5342_v47  ;;  %v4422_v3 = vld [vmem:[#allocation18 + $0xac] sm:$0xf]  ;;  %1573 = vmatpush.bf16.msra.mxu2 %v3771_v1  ;;  %v3706_v1 = vld [vmem:[#allocation18 + $0x28] sm:$0xf] }
 0x348   :  { %1280 = vmatmul.f32.gmra.mxu2 %v1259_v4 }
 0x34b   :  { %v1254_v5 = vpop.f32.mrf.mxu1 }
 0x34c   :  { %v1255_v6 = vadd.f32 %v4606_v60, %v1254_v5  ;;  %v3764_v60 = vld [vmem:[#allocation18 + $0xb0] sm:$0xf0] }
 0x34e   :  { %v1260_v7 = vadd.f32 %v1255_v6, %v5355_v56  ;;  %v3746_v6 = vld [vmem:[#allocation18 + $0x80] sm:$0xf] }
 0x350   :  { %1283 = vmatmul.f32.gmra.mxu2 %v1260_v7 }
 0x353   :  { %v1256_v8 = vpop.f32.mrf.mxu1 }
 0x354   :  { %v4417_v8 = vld [vmem:[#allocation18 + $0x84] sm:$0xf] }
 0x3c3   :  { %v1278_v9 = vpop.f32.mrf.mxu2 }
 0x3c4   :  { %v5503_v11 = vsub.f32 %v1258_v63, %v1278_v9  ;;  %v3767_v63 = vor.u32 %v4421_v54, %v3764_v60  ;;  %v3727_v54 = vor.u32 %v4410_v51, %v3724_v53  ;;  %v4407_v60 = vld [vmem:[#allocation18 + $0x2c] sm:$0xf0]  ;;  %v4448_v51 = vld [vmem:[#allocation21 + $0x78] sm:$0xff] }
 0x3c5   :  { %v3699_v62 = vor.u32 %v4407_v60, %v3698_v55  ;;  %v4456_v53 = vld [vmem:[#allocation21 + $0xb8] sm:$0xff]  ;;  %v4439_v60 = vld [vmem:[#allocation21 + $0x30] sm:$0xff] }
 0x3c6   :  { %v1290_v12 = vmul.f32 %v5503_v11, %v5503_v11  ;;  %1555 = vmatpush.bf16.msra.mxu1 %v3767_v63  ;;  %v3700_v63 = vld [vmem:[#allocation18 + $0x30] sm:$0xf0] }
 0x3c8   :  { %1309 = vmatmul.f32.vlgmr.msrb.gmra.mxu3 %v1290_v12  ;;  %v3748_v12 = vld [vmem:[#allocation18 + $0x90] sm:$0xf0] }
 0x3cb   :  { %v1281_v45 = vpop.f32.mrf.mxu2 }
 0x3cc   :  { %v5507_v13 = vsub.f32 %v1259_v4, %v1281_v45  ;;  %v3772_v4 = vld [vmem:[#allocation18 + $0xb8] sm:$0xf0]  ;;  %v3754_v45 = vld [vmem:[#allocation18 + $0x88] sm:$0xf] }
 0x3cd   :  { %v3775_v5 = vor.u32 %v4422_v3, %v3772_v4  ;;  %v4408_v3 = vld [vmem:[#allocation18 + $0x34] sm:$0xf0]  ;;  %v3703_v4 = vor.u32 %v4405_v61, %v3700_v63 }
 0x3ce   :  { %v1291_v47 = vmul.f32 %v5507_v13, %v5507_v13  ;;  %v4447_v61 = vld [vmem:[#allocation21 + $0x70] sm:$0xff] }
 0x3cf   :  { %1591 = vmatpush.bf16.msra.mxu3 %v3775_v5  ;;  %v3707_v5 = vor.u32 %v4408_v3, %v3706_v1  ;;  %v4607_v1 = vld [vmem:[%s5870_s15] ss:$0 sm:$0xff]  ;;  %v4455_v3 = vld [vmem:[#allocation21 + $0xb0] sm:$0xff] }
 0x3d0   :  { %1312 = vmatmul.f32.gmra.mxu3 %v1291_v47  ;;  %v4420_v47 = vld [vmem:[#allocation18 + $0x94] sm:$0xf0] }
 0x3d3   :  { %v1284_v14 = vpop.f32.mrf.mxu2  ;;  %1592 = vmatpush.bf16.msra.mxu3 %v3759_v21 }
 0x3d4   :  { %v5511_v15 = vsub.f32 %v1260_v7, %v1284_v14  ;;  %v4419_v7 = vld [vmem:[#allocation18 + $0x8c] sm:$0xf0]  ;;  %v3751_v14 = vor.u32 %v4417_v8, %v3748_v12  ;;  %v3682_v12 = vld [vmem:[#allocation18] sm:$0xf] }
 0x3d5   :  { %v3747_v9 = vor.u32 %v4419_v7, %v3746_v6  ;;  %v4406_v6 = vld [vmem:[#allocation18 + $0x2c] sm:$0xf]  ;;  %v3708_v7 = vld [vmem:[#allocation18 + $0x38] sm:$0xf0] }
 0x3d6   :  { %v1292_v56 = vmul.f32 %v5511_v15, %v5511_v15  ;;  %1556 = vmatpush.bf16.msra.mxu1 %v3751_v14  ;;  %v3711_v8 = vor.u32 %v4406_v6, %v3708_v7 }
 0x3d7   :  { %1538 = vmatpush.bf16.msra.mxu0 %v3747_v9  ;;  %1593 = vmatpush.bf16.msra.mxu3 %v3743_v34 }
 0x3d8   :  { %1315 = vmatmul.f32.gmra.mxu3 %v1292_v56  ;;  %v3755_v56 = vor.u32 %v4420_v47, %v3754_v45  ;;  %v4403_v45 = vld [vmem:[#allocation18 + $0xc] sm:$0xf0]  ;;  %v4401_v47 = vld [vmem:[#allocation18 + $0x4] sm:$0xf] }
 0x3d9   :  { %v3687_v21 = vor.u32 %v4401_v47, %v3684_v16  ;;  %v4608_v47 = vld [vmem:[%s5871_s16] ss:$0 sm:$0xff] }
 0x3da   :  { %1574 = vmatpush.bf16.msra.mxu2 %v3755_v56  ;;  %1557 = vmatpush.bf16.msra.mxu1 %v3735_v10  ;;  %v3683_v56 = vor.u32 %v4403_v45, %v3682_v12  ;;  %v4446_v12 = vld [vmem:[#allocation21 + $0x68] sm:$0xff] }
 0x3db   :  { %1539 = vmatpush.bf16.msra.mxu0 %v3731_v26  ;;  %1594 = vmatpush.bf16.msra.mxu3 %v3727_v54  ;;  %v3691_v26 = vor.u32 %v4404_v22, %v3690_v18  ;;  %v4464_v54 = vld [vmem:[#allocation21 + $0xf8] sm:$0xff]  ;;  %v4437_v22 = vld [vmem:[#allocation21 + $0x20] sm:$0xff] }
 0x3de   :  { %1575 = vmatpush.bf16.msra.mxu2 %v3739_v33  ;;  %1558 = vmatpush.bf16.msra.mxu1 %v3719_v46 }
 0x3df   :  { %1540 = vmatpush.bf16.msra.mxu0 %v3715_v39  ;;  %1595 = vmatpush.bf16.msra.mxu3 %v3711_v8 }
 0x3e2   :  { %1576 = vmatpush.bf16.msra.mxu2 %v3723_v50  ;;  %1559 = vmatpush.bf16.msra.mxu1 %v3703_v4  ;;  %v4440_v50 = vld [vmem:[#allocation21 + $0x38] sm:$0xff]  ;;  %v4463_v4 = vld [vmem:[#allocation21 + $0xf0] sm:$0xff] }
 0x3e3   :  { %1541 = vmatpush.bf16.msra.mxu0 %v3699_v62  ;;  %1596 = vmatpush.bf16.msra.mxu3 %v3695_v2 }
 0x3e6   :  { %1577 = vmatpush.bf16.msra.mxu2 %v3707_v5  ;;  %1560 = vmatpush.bf16.msra.mxu1 %v3687_v21 }
 0x3e7   :  { %1542 = vmatpush.bf16.msra.mxu0 %v3683_v56  ;;  %1876 = vmatpush.bf16.msrb.mxu3 %v4464_v54  ;;  %v4462_v56 = vld [vmem:[#allocation21 + $0xe8] sm:$0xff] }
 0x3e8   :  { %v4450_v54 = vld [vmem:[#allocation21 + $0x88] sm:$0xff] }
 0x3ea   :  { %1578 = vmatpush.bf16.msra.mxu2 %v3691_v26  ;;  %1840 = vmatpush.bf16.msrb.mxu1 %v4448_v51  ;;  %v4433_v51 = vld [vmem:[#allocation21] sm:$0xff] }
 0x3eb   :  { %1822 = vmatpush.bf16.msrb.mxu0 %v4440_v50  ;;  %1877 = vmatpush.bf16.msrb.mxu3 %v4463_v4  ;;  %v4459_v50 = vld [vmem:[#allocation21 + $0xd0] sm:$0xff] }
 0x3ee   :  { %1858 = vmatpush.bf16.msrb.mxu2 %v4456_v53  ;;  %1841 = vmatpush.bf16.msrb.mxu1 %v4447_v61  ;;  %v4441_v53 = vld [vmem:[#allocation21 + $0x40] sm:$0xff] }
 0x3ef   :  { %1823 = vmatpush.bf16.msrb.mxu0 %v4439_v60  ;;  %1878 = vmatpush.bf16.msrb.mxu3 %v4462_v56  ;;  %v4449_v60 = vld [vmem:[#allocation21 + $0x80] sm:$0xff] }
 0x3f0   :  { %v4457_v61 = vld [vmem:[#allocation21 + $0xc0] sm:$0xff] }
 0x3f2   :  { %1859 = vmatpush.bf16.msrb.mxu2 %v4455_v3  ;;  %1842 = vmatpush.bf16.msrb.mxu1 %v4446_v12 }
 0x3f6   :  { %1843 = vmatpush.bf16.msrb.mxu1 %v4445_v0 }
 0x44b   :  { %v1310_v9 = vpop.f32.mrf.mxu3 }
 0x44c   :  { %v1311_v14 = vadd.f32 1e-05, %v1310_v9  ;;  %v4438_v9 = vld [vmem:[#allocation21 + $0x28] sm:$0xff] }
 0x44d   :  { %1824 = vmatpush.bf16.msrb.mxu0 %v4438_v9 }
 0x44e   :  { %4642 = vrsqrt.f32 %v1311_v14  ;;  %vm1325_vm15 = vweird.f32 %v1311_v14 }
 0x451   :  { %1825 = vmatpush.bf16.msrb.mxu0 %v4437_v22 }
 0x453   :  { %v1313_v28 = vpop.f32.mrf.mxu3 }
 0x454   :  { %v4643_v10 = vpop.eup %4642  ;;  %v1314_v29 = vadd.f32 1e-05, %v1313_v28 }
 0x455   :  { %v1320_v30 = vmul.f32 %v4643_v10, %v1311_v14  ;;  %vm1326_vm14 = vweird.f32 %v4643_v10  ;;  %v4454_v14 = vld [vmem:[#allocation21 + $0xa8] sm:$0xff] }
 0x456   :  { %4644 = vrsqrt.f32 %v1314_v29  ;;  %vm1327_vm0 = vmor %vm1325_vm15, %vm1326_vm14  ;;  %vm1335_vm2 = vweird.f32 %v1314_v29  ;;  %1860 = vmatpush.bf16.msrb.mxu2 %v4454_v14  ;;  %v5570_v14 = vld [vmem:[%s5874_s19 + $0x78] sm:$0xff] }
 0x457   :  { %v1321_v31 = vmul.f32 %v4643_v10, %v1320_v30 }
 0x459   :  { %v1322_v33 = vmul.f32 0.5, %v1321_v31 }
 0x45b   :  { %v1323_v34 = vsub.f32 1.5, %v1322_v33  ;;  %v1316_v35 = vpop.f32.mrf.mxu3  ;;  %v4436_v33 = vld [vmem:[#allocation21 + $0x18] sm:$0xff] }
 0x45c   :  { %v4645_v37 = vpop.eup %4644  ;;  %v1317_v17 = vadd.f32 1e-05, %v1316_v35  ;;  %1826 = vmatpush.bf16.msrb.mxu0 %v4436_v33  ;;  %v4453_v35 = vld [vmem:[#allocation21 + $0xa0] sm:$0xff] }
 0x45d   :  { %v1324_v39 = vmul.f32 %v4643_v10, %v1323_v34  ;;  %v1330_v41 = vmul.f32 %v4645_v37, %v1314_v29  ;;  %vm1336_vm1 = vweird.f32 %v4645_v37  ;;  %v4444_v34 = vld [vmem:[#allocation21 + $0x58] sm:$0xff]  ;;  %1861 = vmatpush.bf16.msrb.mxu2 %v4453_v35 }
 0x45e   :  { %4646 = vrsqrt.f32 %v1317_v17  ;;  %vm1337_vm3 = vmor %vm1335_vm2, %vm1336_vm1  ;;  %vm1345_vm6 = vweird.f32 %v1317_v17  ;;  %1844 = vmatpush.bf16.msrb.mxu1 %v4444_v34 }
 0x45f   :  { %v1331_v42 = vmul.f32 %v4645_v37, %v1330_v41  ;;  %v1328_v44 = vsel %vm1327_vm0, %v4643_v10, %v1324_v39  ;;  %v4452_v39 = vld [vmem:[#allocation21 + $0x98] sm:$0xff] }
 0x460   :  { %v1349_v63 = vmul.f32 %v1328_v44, %v5503_v11  ;;  %v4460_v41 = vld [vmem:[#allocation21 + $0xd8] sm:$0xff]  ;;  %v4442_v44 = vld [vmem:[#allocation21 + $0x48] sm:$0xff] }
 0x461   :  { %v1332_v46 = vmul.f32 0.5, %v1331_v42  ;;  %1862 = vmatpush.bf16.msrb.mxu2 %v4452_v39  ;;  %v4434_v42 = vld [vmem:[#allocation21 + $0x8] sm:$0xff] }
 0x462   :  { %v1355_v11 = vmul.f32 %v4607_v1, %v1349_v63 }
 0x463   :  { %v1333_v55 = vsub.f32 1.5, %v1332_v46  ;;  %v4451_v46 = vld [vmem:[#allocation21 + $0x90] sm:$0xff] }
 0x464   :  { %v4647_v62 = vpop.eup %4646  ;;  %v5524_v24 = vadd.f32 %v4608_v47, %v1355_v11 }
 0x465   :  { %v1334_v5 = vmul.f32 %v4645_v37, %v1333_v55  ;;  %v1340_v6 = vmul.f32 %v4647_v62, %v1317_v17  ;;  %vm1346_vm4 = vweird.f32 %v4647_v62  ;;  %v4435_v17 = vld [vmem:[#allocation21 + $0x10] sm:$0xff]  ;;  %1863 = vmatpush.bf16.msrb.mxu2 %v4451_v46  ;;  %v4458_v55 = vld [vmem:[#allocation21 + $0xc8] sm:$0xff] }
 0x466   :  { %vm1347_vm7 = vmor %vm1345_vm6, %vm1346_vm4  ;;  %1827 = vmatpush.bf16.msrb.mxu0 %v4435_v17  ;;  %v5594_v17 = vld [vmem:[%s5874_s19 + $0x58] sm:$0xff]  ;;  %v5606_v46 = vld [vmem:[%s5874_s19 + $0x48] sm:$0xff] }
 0x467   :  { %v1338_v7 = vsel %vm1337_vm3, %v4645_v37, %v1334_v5  ;;  %v1341_v8 = vmul.f32 %v4647_v62, %v1340_v6  ;;  %v4461_v37 = vld [vmem:[#allocation21 + $0xe0] sm:$0xff] }
 0x468   :  { %v1350_v45 = vmul.f32 %v1338_v7, %v5507_v13  ;;  %1879 = vmatpush.bf16.msrb.mxu3 %v4461_v37 }
 0x469   :  { %v1342_v16 = vmul.f32 0.5, %v1341_v8  ;;  %1864 = vmatpush.bf16.msrb.mxu2 %v4450_v54 }
 0x46a   :  { %v1356_v18 = vmul.f32 %v4607_v1, %v1350_v45  ;;  %1828 = vmatpush.bf16.msrb.mxu0 %v4434_v42 }
 0x46b   :  { %v1343_v21 = vsub.f32 1.5, %v1342_v16 }
 0x46c   :  { %v5526_v26 = vadd.f32 %v4608_v47, %v1356_v18  ;;  %1880 = vmatpush.bf16.msrb.mxu3 %v4460_v41 }
 0x46d   :  { %v1344_v13 = vmul.f32 %v4647_v62, %v1343_v21  ;;  %1865 = vmatpush.bf16.msrb.mxu2 %v4449_v60  ;;  %v5576_v21 = vld [vmem:[%s5874_s19 + $0x70] sm:$0xff]  ;;  %v5618_v60 = vld [vmem:[%s5874_s19 + $0x38] sm:$0xff] }
 0x46e   :  { %v1364_v2 = vpack.c.bf16 %v5526_v26, %v5524_v24  ;;  %1829 = vmatpush.bf16.msrb.mxu0 %v4433_v51 }
 0x46f   :  { %v1348_v28 = vsel %vm1347_vm7, %v4647_v62, %v1344_v13  ;;  %v5582_v13 = vld [vmem:[%s5874_s19 + $0x68] sm:$0xff] }
 0x470   :  { %1543 = vmatmul.bf16.vlgmr.msra.gmra.mxu0 %v1364_v2  ;;  %1561 = vmatmul.bf16.vlgmr.msra.gmra.mxu1 %v1364_v2  ;;  %v1351_v10 = vmul.f32 %v1348_v28, %v5511_v15  ;;  %v4443_v15 = vld [vmem:[#allocation21 + $0x50] sm:$0xff] }
 0x471   :  { %1579 = vmatmul.bf16.vlgmr.msra.gmra.mxu2 %v1364_v2  ;;  %1597 = vmatmul.bf16.vlgmr.msra.gmra.mxu3 %v1364_v2 }
 0x472   :  { %v1357_v29 = vmul.f32 %v4607_v1, %v1351_v10  ;;  %1845 = vmatpush.bf16.msrb.mxu1 %v4443_v15  ;;  %1881 = vmatpush.bf16.msrb.mxu3 %v4459_v50  ;;  %v5600_v15 = vld [vmem:[%s5874_s19 + $0x50] sm:$0xff] }
 0x473   :  { %1897 = vmatpush.msra.mxu0 %v5433_v19 }
 0x474   :  { %v5531_v30 = vadd.f32 %v4608_v47, %v1357_v29 }
 0x475   :  { %1898 = vmatpush.msra.mxu0 %v5435_v20 }
 0x476   :  { %v1365_v31 = vpack.c.bf16 %v5531_v30, %v5531_v30  ;;  %1846 = vmatpush.bf16.msrb.mxu1 %v4442_v44  ;;  %1882 = vmatpush.bf16.msrb.mxu3 %v4458_v55  ;;  %v5612_v55 = vld [vmem:[%s5874_s19 + $0x40] sm:$0xff] }
 0x477   :  { %1899 = vmatpush.msra.mxu0 %v5441_v23 }
 0x479   :  { %1900 = vmatpush.msra.mxu0 %v5445_v25 }
 0x47a   :  { %1847 = vmatpush.bf16.msrb.mxu1 %v4441_v53  ;;  %1883 = vmatpush.bf16.msrb.mxu3 %v4457_v61 }
 0x47b   :  { %1901 = vmatpush.msra.mxu0 %v5449_v27 }
 0x47d   :  { %1902 = vmatpush.msra.mxu0 %v5454_v32 }
 0x47e   :  { %1929 = vmatpush.msra.mxu1 %v5433_v19  ;;  %v628_v19 = vld [vmem:[#allocation20] sm:$0xf] }
 0x47f   :  { %1903 = vmatpush.msra.mxu0 %v5458_v36  ;;  %v1369_v1 = vperm.slane %v628_v19, 2  ;;  %v1370_v3 = vperm.slane %v628_v19, 3 }
 0x480   :  { %1548 = vmatmul.bf16.gmra.mxu0 %v1365_v31  ;;  %1566 = vmatmul.bf16.gmra.mxu1 %v1365_v31 }
 0x481   :  { %1584 = vmatmul.bf16.gmra.mxu2 %v1365_v31  ;;  %1602 = vmatmul.bf16.gmra.mxu3 %v1365_v31  ;;  %v5588_v31 = vld [vmem:[%s5874_s19 + $0x60] sm:$0xff] }
 0x482   :  { %1930 = vmatpush.msra.mxu1 %v5435_v20  ;;  %1904 = vmatpush.msra.mxu0 %v5462_v38 }
 0x484   :  { %1931 = vmatpush.msra.mxu1 %v5441_v23  ;;  %1905 = vmatpush.msra.mxu0 %v5466_v40 }
 0x486   :  { %1932 = vmatpush.msra.mxu1 %v5445_v25  ;;  %1906 = vmatpush.msra.mxu0 %v5470_v43  ;;  %v1367_v25 = vperm.slane %v628_v19, 0 }
 0x488   :  { %1933 = vmatpush.msra.mxu1 %v5449_v27  ;;  %1907 = vmatpush.msra.mxu0 %v5474_v48  ;;  %v1368_v27 = vperm.slane %v628_v19, 1 }
 0x48a   :  { %1934 = vmatpush.msra.mxu1 %v5454_v32  ;;  %1908 = vmatpush.msra.mxu0 %v5478_v49 }
 0x48c   :  { %1935 = vmatpush.msra.mxu1 %v5458_v36  ;;  %1909 = vmatpush.msra.mxu0 %v5482_v52 }
 0x48e   :  { %1936 = vmatpush.msra.mxu1 %v5462_v38  ;;  %1910 = vmatpush.msra.mxu0 %v5488_v57 }
 0x490   :  { %1937 = vmatpush.msra.mxu1 %v5466_v40  ;;  %1911 = vmatpush.msra.mxu0 %v5492_v58 }
 0x492   :  { %1938 = vmatpush.msra.mxu1 %v5470_v43  ;;  %1912 = vmatpush.msra.mxu0 %v5495_v59 }
 0x494   :  { %1939 = vmatpush.msra.mxu1 %v5474_v48 }
 0x496   :  { %1940 = vmatpush.msra.mxu1 %v5478_v49 }
 0x498   :  { %1941 = vmatpush.msra.mxu1 %v5482_v52 }
 0x49a   :  { %1942 = vmatpush.msra.mxu1 %v5488_v57 }
 0x49c   :  { %1943 = vmatpush.msra.mxu1 %v5492_v58 }
 0x49e   :  { %1944 = vmatpush.msra.mxu1 %v5495_v59 }
 0x4ed   :  { %v1544_v20 = vpop.f32.mrf.mxu0  ;;  %v1562_v23 = vpop.f32.mrf.mxu1 }
 0x4ee   :  { %v1545_v32 = vadd.f32 %v1544_v20, %v1367_v25  ;;  %v1563_v36 = vadd.f32 %v1562_v23, %v1368_v27  ;;  %v5624_v20 = vld [vmem:[%s5874_s19 + $0x30] sm:$0xff]  ;;  %v5630_v23 = vld [vmem:[%s5874_s19 + $0x28] sm:$0xff] }
 0x4f0   :  { %v1607_v49 = vmax.f32 %v1545_v32, 0.0  ;;  %v1608_v52 = vmax.f32 %v1563_v36, 0.0  ;;  %v5648_v32 = vld [vmem:[%s5874_s19 + $0x10] sm:$0xff]  ;;  %v5654_v36 = vld [vmem:[%s5874_s19 + $0x8] sm:$0xff] }
 0x4f4   :  { %v1580_v38 = vpop.f32.mrf.mxu2  ;;  %v1598_v40 = vpop.f32.mrf.mxu3 }
 0x4f5   :  { %v1546_v62 = vpop.f32.mrf.mxu0  ;;  %v1564_v43 = vpop.f32.mrf.mxu1  ;;  %v1581_v8 = vadd.f32 %v1580_v38, %v1369_v1  ;;  %v1599_v57 = vadd.f32 %v1598_v40, %v1370_v3  ;;  %v5660_v38 = vld [vmem:[%s5874_s19] sm:$0xff] }
 0x4f6   :  { %v1547_v48 = vadd.f32 %v1546_v62, %v1367_v25  ;;  %v1565_v63 = vadd.f32 %v1564_v43, %v1368_v27  ;;  %v4609_v43 = vld [vmem:[%s5869_s14] ss:$0 sm:$0xff] }
 0x4f7   :  { %v1609_v59 = vmax.f32 %v1581_v8, 0.0  ;;  %v1610_v56 = vmax.f32 %v1599_v57, 0.0 }
 0x4f8   :  { %v1611_v4 = vmax.f32 %v1547_v48, 0.0  ;;  %v1612_v5 = vmax.f32 %v1565_v63, 0.0 }
 0x4fa   :  { %v1619_v6 = vpack.c.bf16 %v1611_v4, %v1607_v49  ;;  %v1620_v7 = vpack.c.bf16 %v1612_v5, %v1608_v52 }
 0x4fc   :  { %v1582_v9 = vpop.f32.mrf.mxu2  ;;  %v1600_v12 = vpop.f32.mrf.mxu3  ;;  %1830 = vmatmul.bf16.vlgmr.msrb.gmra.mxu0 %v1619_v6  ;;  %1848 = vmatmul.bf16.vlgmr.msrb.gmra.mxu1 %v1620_v7 }
 0x4fd   :  { %v1583_v11 = vadd.f32 %v1582_v9, %v1369_v1  ;;  %v1601_v45 = vadd.f32 %v1600_v12, %v1370_v3  ;;  %v1549_v47 = vpop.f32.mrf.mxu0  ;;  %v1567_v58 = vpop.f32.mrf.mxu1  ;;  %2358 = vmatpush.msrb.mxu1 %v5570_v14 }
 0x4fe   :  { %v1550_v2 = vadd.f32 %v1549_v47, %v1367_v25  ;;  %v1568_v28 = vadd.f32 %v1567_v58, %v1368_v27  ;;  %v5636_v25 = vld [vmem:[%s5874_s19 + $0x20] sm:$0xff]  ;;  %v5642_v27 = vld [vmem:[%s5874_s19 + $0x18] sm:$0xff] }
 0x4ff   :  { %v1613_v16 = vmax.f32 %v1583_v11, 0.0  ;;  %v1614_v18 = vmax.f32 %v1601_v45, 0.0  ;;  %2359 = vmatpush.msrb.mxu1 %v5576_v21 }
 0x500   :  { %v1616_v35 = vmax.f32 %v1568_v28, 0.0  ;;  %v1615_v37 = vmax.f32 %v1550_v2, 0.0 }
 0x501   :  { %v1621_v22 = vpack.c.bf16 %v1613_v16, %v1609_v59  ;;  %v1622_v0 = vpack.c.bf16 %v1614_v18, %v1610_v56  ;;  %2360 = vmatpush.msrb.mxu1 %v5582_v13 }
 0x502   :  { %v1623_v42 = vpack.c.bf16 %v1615_v37, %v1615_v37  ;;  %v1624_v44 = vpack.c.bf16 %v1616_v35, %v1616_v35 }
 0x503   :  { %1866 = vmatmul.bf16.vlgmr.msrb.gmra.mxu2 %v1621_v22  ;;  %1884 = vmatmul.bf16.vlgmr.msrb.gmra.mxu3 %v1622_v0 }
 0x504   :  { %v1585_v10 = vpop.f32.mrf.mxu2  ;;  %v1603_v29 = vpop.f32.mrf.mxu3  ;;  %2361 = vmatpush.msrb.mxu1 %v5588_v31 }
 0x505   :  { %v1551_v33 = vpop.f32.mrf.mxu0  ;;  %v1569_v34 = vpop.f32.mrf.mxu1  ;;  %v1586_v39 = vadd.f32 %v1585_v10, %v1369_v1  ;;  %v1604_v41 = vadd.f32 %v1603_v29, %v1370_v3 }
 0x506   :  { %2362 = vmatpush.msrb.mxu1 %v5594_v17 }
 0x507   :  { %v1617_v53 = vmax.f32 %v1586_v39, 0.0  ;;  %v1618_v54 = vmax.f32 %v1604_v41, 0.0  ;;  %v5690_v41 = vld [vmem:[%s5875_s20 + $0x8] sm:$0xff] }
 0x508   :  { %2363 = vmatpush.msrb.mxu1 %v5600_v15 }
 0x509   :  { %v1625_v61 = vpack.c.bf16 %v1617_v53, %v1617_v53  ;;  %v1626_v19 = vpack.c.bf16 %v1618_v54, %v1618_v54  ;;  %v4486_v54 = vld [vmem:[#allocation14 + $0x16c] sm:$0xf] }
 0x50a   :  { %2364 = vmatpush.msrb.mxu1 %v5606_v46 }
 0x50c   :  { %v1587_v50 = vpop.f32.mrf.mxu2  ;;  %v1605_v51 = vpop.f32.mrf.mxu3  ;;  %1835 = vmatmul.bf16.gmra.mxu0 %v1623_v42  ;;  %1853 = vmatmul.bf16.gmra.mxu1 %v1624_v44  ;;  %v5698_v44 = vld [vmem:[%s5875_s20] sm:$0xff] }
 0x50d   :  { %2365 = vmatpush.msrb.mxu1 %v5612_v55 }
 0x50f   :  { %2366 = vmatpush.msrb.mxu1 %v5618_v60 }
 0x511   :  { %2367 = vmatpush.msrb.mxu1 %v5624_v20 }
 0x513   :  { %1871 = vmatmul.bf16.gmra.mxu2 %v1625_v61  ;;  %1889 = vmatmul.bf16.gmra.mxu3 %v1626_v19  ;;  %v4044_v61 = vld [vmem:[#allocation14 + $0x174] sm:$0xf0]  ;;  %v4042_v19 = vld [vmem:[#allocation14 + $0x168] sm:$0xf] }
 0x514   :  { %2368 = vmatpush.msrb.mxu1 %v5630_v23 }
 0x516   :  { %2369 = vmatpush.msrb.mxu1 %v5636_v25 }
 0x518   :  { %2370 = vmatpush.msrb.mxu1 %v5642_v27 }
 0x51a   :  { %2371 = vmatpush.msrb.mxu1 %v5648_v32 }
 0x51c   :  { %2372 = vmatpush.msrb.mxu1 %v5654_v36 }
 0x51e   :  { %2373 = vmatpush.msrb.mxu1 %v5660_v38 }
 0x579   :  { %v1831_v40 = vpop.f32.mrf.mxu0  ;;  %v1849_v62 = vpop.f32.mrf.mxu1 }
 0x57a   :  { %v1832_v48 = vadd.f32 %v4609_v43, %v1831_v40  ;;  %v4047_v40 = vor.u32 %v4486_v54, %v4044_v61  ;;  %v4002_v54 = vld [vmem:[#allocation14 + $0x110] sm:$0xf]  ;;  %v4476_v61 = vld [vmem:[#allocation14 + $0x118] sm:$0xf0] }
 0x57c   :  { %v1850_v3 = vadd.f32 %v1849_v62, %v1832_v48  ;;  %v4487_v62 = vld [vmem:[#allocation14 + $0x170] sm:$0xf0]  ;;  %v4488_v48 = vld [vmem:[#allocation14 + $0x178] sm:$0xf0]  ;;  %2319 = vmatpush.bf16.msra.mxu3 %v4047_v40  ;;  %v4003_v40 = vor.u32 %v4476_v61, %v4002_v54 }
 0x581   :  { %v1833_v63 = vpop.f32.mrf.mxu0  ;;  %v1851_v1 = vpop.f32.mrf.mxu1 }
 0x582   :  { %v1834_v5 = vadd.f32 %v4609_v43, %v1833_v63  ;;  %v4043_v63 = vor.u32 %v4487_v62, %v4042_v19  ;;  %v4471_v62 = vld [vmem:[#allocation14 + $0xf4] sm:$0xf] }
 0x584   :  { %v1852_v9 = vadd.f32 %v1851_v1, %v1834_v5  ;;  %2301 = vmatpush.bf16.msra.mxu2 %v4043_v63  ;;  %v4484_v5 = vld [vmem:[#allocation14 + $0x158] sm:$0xf0] }
 0x586   :  { %v1867_v49 = vpop.f32.mrf.mxu2  ;;  %v1885_v52 = vpop.f32.mrf.mxu3 }
 0x587   :  { %v1868_v4 = vadd.f32 %v1867_v49, %v1850_v3  ;;  %v4483_v3 = vld [vmem:[#allocation14 + $0x154] sm:$0xf]  ;;  %v4032_v49 = vld [vmem:[#allocation14 + $0x15c] sm:$0xf0] }
 0x589   :  { %v1886_v6 = vadd.f32 %v1885_v52, %v1868_v4  ;;  %v1836_v7 = vpop.f32.mrf.mxu0  ;;  %v1854_v8 = vpop.f32.mrf.mxu1  ;;  %v4030_v52 = vld [vmem:[#allocation14 + $0x150] sm:$0xf]  ;;  %v4035_v4 = vor.u32 %v4483_v3, %v4032_v49  ;;  %v3990_v3 = vld [vmem:[#allocation14 + $0xf8] sm:$0xf]  ;;  %v4473_v49 = vld [vmem:[#allocation14 + $0x100] sm:$0xf0] }
 0x58a   :  { %v1837_v47 = vadd.f32 %v4609_v43, %v1836_v7  ;;  %v4050_v43 = vld [vmem:[#allocation14 + $0x170] sm:$0xf]  ;;  %v4485_v7 = vld [vmem:[#allocation14 + $0x160] sm:$0xf0] }
 0x58b   :  { %v1894_v57 = vadd.f32 %v1886_v6, %v5524_v24  ;;  %v4051_v1 = vor.u32 %v4488_v48, %v4050_v43  ;;  %v4038_v6 = vld [vmem:[#allocation14 + $0x158] sm:$0xf]  ;;  %2320 = vmatpush.bf16.msra.mxu3 %v4035_v4  ;;  %v3984_v43 = vld [vmem:[#allocation14 + $0xfc] sm:$0xf0]  ;;  %v3982_v48 = vld [vmem:[#allocation14 + $0xf0] sm:$0xf]  ;;  %v3991_v4 = vor.u32 %v4473_v49, %v3990_v3 }
 0x58c   :  { %v1855_v18 = vadd.f32 %v1854_v8, %v1837_v47  ;;  %v4031_v8 = vor.u32 %v4484_v5, %v4030_v52  ;;  %v4481_v47 = vld [vmem:[#allocation14 + $0x140] sm:$0xf0]  ;;  %v3987_v63 = vor.u32 %v4471_v62, %v3984_v43  ;;  %v4468_v5 = vld [vmem:[#allocation14 + $0xdc] sm:$0xf]  ;;  %v4706_v49 = vld [vmem:[#allocation24 + $0x78] sm:$0xff] }
 0x58d   :  { %1913 = vmatmul.f32.vlgmr.msra.gmra.mxu0 %v1894_v57 }
 0x58e   :  { %v1869_v12 = vpop.f32.mrf.mxu2  ;;  %v1887_v11 = vpop.f32.mrf.mxu3  ;;  %2337 = vmatpush.bf16.msrb.mxu0 %v4051_v1  ;;  %2302 = vmatpush.bf16.msra.mxu2 %v4031_v8  ;;  %v4472_v1 = vld [vmem:[#allocation14 + $0xf8] sm:$0xf0] }
 0x58f   :  { %v1870_v45 = vadd.f32 %v1869_v12, %v1852_v9  ;;  %v4480_v9 = vld [vmem:[#allocation14 + $0x13c] sm:$0xf]  ;;  %v4020_v12 = vld [vmem:[#allocation14 + $0x144] sm:$0xf0]  ;;  %v3983_v52 = vor.u32 %v4472_v1, %v3982_v48 }
 0x591   :  { %v1888_v58 = vadd.f32 %v1887_v11, %v1870_v45  ;;  %v1838_v59 = vpop.f32.mrf.mxu0  ;;  %v1856_v56 = vpop.f32.mrf.mxu1  ;;  %v4018_v11 = vld [vmem:[#allocation14 + $0x138] sm:$0xf]  ;;  %v4023_v45 = vor.u32 %v4480_v9, %v4020_v12  ;;  %v3978_v9 = vld [vmem:[#allocation14 + $0xe0] sm:$0xf]  ;;  %v4470_v12 = vld [vmem:[#allocation14 + $0xe8] sm:$0xf0] }
 0x592   :  { %v4482_v59 = vld [vmem:[#allocation14 + $0x148] sm:$0xf0]  ;;  %v4019_v56 = vor.u32 %v4481_v47, %v4018_v11  ;;  %v4465_v47 = vld [vmem:[#allocation14 + $0xc4] sm:$0xf] }
 0x593   :  { %v1895_v16 = vadd.f32 %v1888_v58, %v5526_v26  ;;  %v5676_v26 = vld [vmem:[%s5875_s20 + $0x18] sm:$0xff]  ;;  %2321 = vmatpush.bf16.msra.mxu3 %v4023_v45  ;;  %v3979_v45 = vor.u32 %v4470_v12, %v3978_v9  ;;  %v4717_v9 = vld [vmem:[#allocation24 + $0x20] sm:$0xff]  ;;  %v4718_v12 = vld [vmem:[#allocation24 + $0x18] sm:$0xff] }
 0x594   :  { %v4026_v58 = vld [vmem:[#allocation14 + $0x140] sm:$0xf]  ;;  %2303 = vmatpush.bf16.msra.mxu2 %v4019_v56 }
 0x595   :  { %1916 = vmatmul.f32.gmra.mxu0 %v1895_v16 }
 0x596   :  { %v1872_v22 = vpop.f32.mrf.mxu2  ;;  %v1890_v0 = vpop.f32.mrf.mxu3 }
 0x597   :  { %v1873_v2 = vadd.f32 %v1872_v22, %v1855_v18  ;;  %v4477_v18 = vld [vmem:[#allocation14 + $0x124] sm:$0xf]  ;;  %v4008_v22 = vld [vmem:[#allocation14 + $0x12c] sm:$0xf0] }
 0x599   :  { %v1891_v28 = vadd.f32 %v1890_v0, %v1873_v2  ;;  %v4006_v0 = vld [vmem:[#allocation14 + $0x120] sm:$0xf]  ;;  %v4011_v2 = vor.u32 %v4477_v18, %v4008_v22  ;;  %v4466_v18 = vld [vmem:[#allocation14 + $0xc8] sm:$0xf0]  ;;  %v3966_v22 = vld [vmem:[#allocation14 + $0xc8] sm:$0xf] }
 0x59b   :  { %v1896_v10 = vadd.f32 %v1891_v28, %v5531_v30  ;;  %v5682_v30 = vld [vmem:[%s5875_s20 + $0x10] sm:$0xff]  ;;  %v4478_v28 = vld [vmem:[#allocation14 + $0x128] sm:$0xf0]  ;;  %2322 = vmatpush.bf16.msra.mxu3 %v4011_v2  ;;  %s5896_s20 = sld [smem:[#allocation43_spill]] }
 0x59d   :  { %1919 = vmatmul.f32.gmra.mxu0 %v1896_v10 }
 0x59e   :  { %v1874_v24 = vpop.f32.mrf.mxu2  ;;  %v1892_v29 = vpop.f32.mrf.mxu3 }
 0x59f   :  { %v4479_v24 = vld [vmem:[#allocation14 + $0x130] sm:$0xf0]  ;;  %v4007_v29 = vor.u32 %v4478_v28, %v4006_v0 }
 0x5a0   :  { %v4467_v0 = vld [vmem:[#allocation14 + $0xd0] sm:$0xf0] }
 0x5a1   :  { %2304 = vmatpush.bf16.msra.mxu2 %v4007_v29  ;;  %s3445_s23 = sshll.u32 %s5896_s20, 4  ;;  %s3446_s23 = int_to_ptr.hbm [resolvable:$true] %s3445_s23 }
 0x60a   :  { %v1914_v33 = vpop.f32.mrf.mxu0 }
 0x60b   :  { %v5669_v34 = vsub.f32 %v1894_v57, %v1914_v33  ;;  %v4039_v57 = vor.u32 %v4485_v7, %v4038_v6  ;;  %v3972_v6 = vld [vmem:[#allocation14 + $0xe4] sm:$0xf0]  ;;  %v3970_v7 = vld [vmem:[#allocation14 + $0xd8] sm:$0xf] }
 0x60c   :  { %v3975_v8 = vor.u32 %v4468_v5, %v3972_v6  ;;  %v4709_v5 = vld [vmem:[#allocation24 + $0x60] sm:$0xff] }
 0x60d   :  { %v1926_v35 = vmul.f32 %v5669_v34, %v5669_v34  ;;  %2338 = vmatpush.bf16.msrb.mxu0 %v4039_v57  ;;  %v4469_v57 = vld [vmem:[#allocation14 + $0xe0] sm:$0xf0] }
 0x60e   :  { %v3971_v11 = vor.u32 %v4469_v57, %v3970_v7  ;;  %v4712_v7 = vld [vmem:[#allocation24 + $0x48] sm:$0xff] }
 0x60f   :  { %1945 = vmatmul.f32.vlgmr.msra.gmra.mxu1 %v1926_v35  ;;  %v4474_v35 = vld [vmem:[#allocation14 + $0x10c] sm:$0xf]  ;;  %v4716_v57 = vld [vmem:[#allocation24 + $0x28] sm:$0xff] }
 0x610   :  { %2588 = vmatpush.msra.mxu1 %v5676_v26 }
 0x612   :  { %v1917_v37 = vpop.f32.mrf.mxu0  ;;  %2589 = vmatpush.msra.mxu1 %v5682_v30 }
 0x613   :  { %v5685_v39 = vsub.f32 %v1895_v16, %v1917_v37  ;;  %v4027_v16 = vor.u32 %v4482_v59, %v4026_v58  ;;  %v3996_v37 = vld [vmem:[#allocation14 + $0x114] sm:$0xf0]  ;;  %v3960_v58 = vld [vmem:[#allocation14 + $0xcc] sm:$0xf0]  ;;  %v3958_v59 = vld [vmem:[#allocation14 + $0xc0] sm:$0xf] }
 0x614   :  { %2590 = vmatpush.msra.mxu1 %v5690_v41  ;;  %v3959_v28 = vor.u32 %v4466_v18, %v3958_v59  ;;  %v5763_v59 = vld [vmem:[#allocation15 + $0x3] sm:$0x7] }
 0x615   :  { %v1927_v42 = vmul.f32 %v5685_v39, %v5685_v39  ;;  %2339 = vmatpush.bf16.msrb.mxu0 %v4027_v16  ;;  %v3963_v16 = vor.u32 %v4465_v47, %v3960_v58  ;;  %v4721_v47 = vld [vmem:[#allocation24] sm:$0xff] }
 0x616   :  { %2591 = vmatpush.msra.mxu1 %v5698_v44 }
 0x617   :  { %1948 = vmatmul.f32.gmra.mxu1 %v1927_v42  ;;  %v3994_v42 = vld [vmem:[#allocation14 + $0x108] sm:$0xf] }
 0x61a   :  { %v1920_v50 = vpop.f32.mrf.mxu0 }
 0x61b   :  { %v5701_v51 = vsub.f32 %v1896_v10, %v1920_v50  ;;  %v4014_v10 = vld [vmem:[#allocation14 + $0x128] sm:$0xf]  ;;  %v3999_v50 = vor.u32 %v4474_v35, %v3996_v37 }
 0x61c   :  { %v4015_v33 = vor.u32 %v4479_v24, %v4014_v10  ;;  %v3967_v10 = vor.u32 %v4467_v0, %v3966_v22 }
 0x61d   :  { %v1928_v53 = vmul.f32 %v5701_v51, %v5701_v51  ;;  %2323 = vmatpush.bf16.msra.mxu3 %v3999_v50 }
 0x61e   :  { %2340 = vmatpush.bf16.msrb.mxu0 %v4015_v33 }
 0x61f   :  { %1951 = vmatmul.f32.gmra.mxu1 %v1928_v53  ;;  %v4475_v53 = vld [vmem:[#allocation14 + $0x110] sm:$0xf0] }
 0x620   :  { %v3995_v19 = vor.u32 %v4475_v53, %v3994_v42 }
 0x621   :  { %2324 = vmatpush.bf16.msra.mxu3 %v3987_v63 }
 0x622   :  { %2305 = vmatpush.bf16.msra.mxu2 %v3995_v19  ;;  %2341 = vmatpush.bf16.msrb.mxu0 %v4003_v40  ;;  %v4610_v19 = vld [vmem:[#allocation23] ss:$0 sm:$0xff] }
 0x625   :  { %2325 = vmatpush.bf16.msra.mxu3 %v3975_v8  ;;  %v4714_v8 = vld [vmem:[#allocation24 + $0x38] sm:$0xff] }
 0x626   :  { %2306 = vmatpush.bf16.msra.mxu2 %v3983_v52  ;;  %2342 = vmatpush.bf16.msrb.mxu0 %v3991_v4  ;;  %v4707_v52 = vld [vmem:[#allocation24 + $0x70] sm:$0xff]  ;;  %v4708_v4 = vld [vmem:[#allocation24 + $0x68] sm:$0xff] }
 0x629   :  { %2326 = vmatpush.bf16.msra.mxu3 %v3963_v16  ;;  %v2168_v16 = vperm.slane %v5763_v59, 1 }
 0x62a   :  { %2307 = vmatpush.bf16.msra.mxu2 %v3971_v11  ;;  %2343 = vmatpush.bf16.msrb.mxu0 %v3979_v45  ;;  %v4719_v11 = vld [vmem:[#allocation24 + $0x10] sm:$0xff]  ;;  %v4720_v45 = vld [vmem:[#allocation24 + $0x8] sm:$0xff] }
 0x62d   :  { %2416 = vmatpush.msrb.mxu3 %v5570_v14 }
 0x62e   :  { %2308 = vmatpush.bf16.msra.mxu2 %v3959_v28  ;;  %2344 = vmatpush.bf16.msrb.mxu0 %v3967_v10 }
 0x62f   :  { %2417 = vmatpush.msrb.mxu3 %v5576_v21 }
 0x631   :  { %2418 = vmatpush.msrb.mxu3 %v5582_v13 }
 0x632   :  { %2387 = vmatpush.msrb.mxu2 %v5570_v14  ;;  %2547 = vmatpush.msra.mxu0 %v5676_v26 }
 0x633   :  { %2419 = vmatpush.msrb.mxu3 %v5588_v31 }
 0x634   :  { %2388 = vmatpush.msrb.mxu2 %v5576_v21  ;;  %2548 = vmatpush.msra.mxu0 %v5682_v30 }
 0x635   :  { %2420 = vmatpush.msrb.mxu3 %v5594_v17 }
 0x636   :  { %2389 = vmatpush.msrb.mxu2 %v5582_v13  ;;  %2549 = vmatpush.msra.mxu0 %v5690_v41 }
 0x637   :  { %2421 = vmatpush.msrb.mxu3 %v5600_v15 }
 0x638   :  { %2390 = vmatpush.msrb.mxu2 %v5588_v31  ;;  %2550 = vmatpush.msra.mxu0 %v5698_v44 }
 0x639   :  { %2422 = vmatpush.msrb.mxu3 %v5606_v46 }
 0x63a   :  { %2391 = vmatpush.msrb.mxu2 %v5594_v17 }
 0x63b   :  { %2423 = vmatpush.msrb.mxu3 %v5612_v55 }
 0x63c   :  { %2392 = vmatpush.msrb.mxu2 %v5600_v15 }
 0x63d   :  { %2424 = vmatpush.msrb.mxu3 %v5618_v60 }
 0x63e   :  { %2393 = vmatpush.msrb.mxu2 %v5606_v46 }
 0x63f   :  { %2425 = vmatpush.msrb.mxu3 %v5624_v20 }
 0x640   :  { %2394 = vmatpush.msrb.mxu2 %v5612_v55 }
 0x641   :  { %2426 = vmatpush.msrb.mxu3 %v5630_v23 }
 0x642   :  { %2395 = vmatpush.msrb.mxu2 %v5618_v60 }
 0x643   :  { %2427 = vmatpush.msrb.mxu3 %v5636_v25 }
 0x644   :  { %2396 = vmatpush.msrb.mxu2 %v5624_v20 }
 0x645   :  { %2428 = vmatpush.msrb.mxu3 %v5642_v27 }
 0x646   :  { %2397 = vmatpush.msrb.mxu2 %v5630_v23 }
 0x647   :  { %2429 = vmatpush.msrb.mxu3 %v5648_v32 }
 0x648   :  { %2398 = vmatpush.msrb.mxu2 %v5636_v25 }
 0x649   :  { %2430 = vmatpush.msrb.mxu3 %v5654_v36 }
 0x64a   :  { %2399 = vmatpush.msrb.mxu2 %v5642_v27 }
 0x64b   :  { %2431 = vmatpush.msrb.mxu3 %v5660_v38 }
 0x64c   :  { %2400 = vmatpush.msrb.mxu2 %v5648_v32 }
 0x64e   :  { %2401 = vmatpush.msrb.mxu2 %v5654_v36 }
 0x650   :  { %2402 = vmatpush.msrb.mxu2 %v5660_v38 }
 0x68c   :  { %v1946_v56 = vpop.f32.mrf.mxu1 }
 0x68d   :  { %v1947_v2 = vadd.f32 1e-05, %v1946_v56  ;;  %v2167_v56 = vperm.slane %v5763_v59, 0 }
 0x68f   :  { %4648 = vrsqrt.f32 %v1947_v2  ;;  %vm1961_vm9 = vweird.f32 %v1947_v2 }
 0x694   :  { %v1949_v24 = vpop.f32.mrf.mxu1 }
 0x695   :  { %v4649_v29 = vpop.eup %4648  ;;  %v1950_v33 = vadd.f32 1e-05, %v1949_v24 }
 0x696   :  { %v1956_v35 = vmul.f32 %v4649_v29, %v1947_v2  ;;  %vm1962_vm8 = vweird.f32 %v4649_v29 }
 0x697   :  { %4650 = vrsqrt.f32 %v1950_v33  ;;  %vm1963_vm10 = vmor %vm1961_vm9, %vm1962_vm8  ;;  %vm1971_vm12 = vweird.f32 %v1950_v33 }
 0x698   :  { %v1957_v14 = vmul.f32 %v4649_v29, %v1956_v35 }
 0x69a   :  { %v1958_v21 = vmul.f32 0.5, %v1957_v14 }
 0x69c   :  { %v1959_v13 = vsub.f32 1.5, %v1958_v21  ;;  %v1952_v37 = vpop.f32.mrf.mxu1 }
 0x69d   :  { %v4651_v31 = vpop.eup %4650  ;;  %v1953_v42 = vadd.f32 1e-05, %v1952_v37 }
 0x69e   :  { %v1960_v50 = vmul.f32 %v4649_v29, %v1959_v13  ;;  %v1966_v53 = vmul.f32 %v4651_v31, %v1950_v33  ;;  %vm1972_vm11 = vweird.f32 %v4651_v31 }
 0x69f   :  { %4652 = vrsqrt.f32 %v1953_v42  ;;  %vm1973_vm13 = vmor %vm1971_vm12, %vm1972_vm11  ;;  %vm1981_vm15 = vweird.f32 %v1953_v42 }
 0x6a0   :  { %v1967_v17 = vmul.f32 %v4651_v31, %v1966_v53  ;;  %v1964_v15 = vsel %vm1963_vm10, %v4649_v29, %v1960_v50 }
 0x6a1   :  { %v1985_v61 = vmul.f32 %v1964_v15, %v5669_v34  ;;  %v4611_v34 = vld [vmem:[%s5873_s18] ss:$0 sm:$0xff] }
 0x6a2   :  { %v1968_v54 = vmul.f32 0.5, %v1967_v17 }
 0x6a3   :  { %v1991_v43 = vmul.f32 %v4610_v19, %v1985_v61 }
 0x6a4   :  { %v1969_v46 = vsub.f32 1.5, %v1968_v54 }
 0x6a5   :  { %v4653_v55 = vpop.eup %4652  ;;  %v5744_v27 = vadd.f32 %v4611_v34, %v1991_v43 }
 0x6a6   :  { %v1970_v40 = vmul.f32 %v4651_v31, %v1969_v46  ;;  %v1976_v60 = vmul.f32 %v4653_v55, %v1953_v42  ;;  %vm1982_vm14 = vweird.f32 %v4653_v55 }
 0x6a7   :  { %vm1983_vm0 = vmor %vm1981_vm15, %vm1982_vm14 }
 0x6a8   :  { %v1974_v62 = vsel %vm1973_vm13, %v4651_v31, %v1970_v40  ;;  %v1977_v20 = vmul.f32 %v4653_v55, %v1976_v60 }
 0x6a9   :  { %v1986_v23 = vmul.f32 %v1974_v62, %v5685_v39 }
 0x6aa   :  { %v1978_v48 = vmul.f32 0.5, %v1977_v20 }
 0x6ab   :  { %v1992_v25 = vmul.f32 %v4610_v19, %v1986_v23 }
 0x6ac   :  { %v1979_v63 = vsub.f32 1.5, %v1978_v48 }
 0x6ad   :  { %v5746_v1 = vadd.f32 %v4611_v34, %v1992_v25 }
 0x6ae   :  { %v1980_v39 = vmul.f32 %v4653_v55, %v1979_v63 }
 0x6af   :  { %v2164_v32 = vpack.c.bf16 %v5746_v1, %v5744_v27 }
 0x6b0   :  { %v1984_v3 = vsel %vm1983_vm0, %v4653_v55, %v1980_v39 }
 0x6b1   :  { %2309 = vmatmul.bf16.vlgmr.msra.gmra.mxu2 %v2164_v32  ;;  %2327 = vmatmul.bf16.vlgmr.msra.gmra.mxu3 %v2164_v32  ;;  %v1987_v36 = vmul.f32 %v1984_v3, %v5701_v51  ;;  %v4711_v51 = vld [vmem:[#allocation24 + $0x50] sm:$0xff] }
 0x6b2   :  { %2345 = vmatmul.bf16.vlgmr.msrb.gmra.mxu0 %v2164_v32  ;;  %2632 = vmatpush.msra.mxu2 %v5676_v26  ;;  %v4710_v26 = vld [vmem:[#allocation24 + $0x58] sm:$0xff] }
 0x6b3   :  { %2726 = vmatpush.msrb.mxu0 %v4706_v49  ;;  %v1993_v38 = vmul.f32 %v4610_v19, %v1987_v36 }
 0x6b4   :  { %2633 = vmatpush.msra.mxu2 %v5682_v30 }
 0x6b5   :  { %2727 = vmatpush.msrb.mxu0 %v4707_v52  ;;  %v5757_v6 = vadd.f32 %v4611_v34, %v1993_v38 }
 0x6b6   :  { %2634 = vmatpush.msra.mxu2 %v5690_v41  ;;  %v4713_v41 = vld [vmem:[#allocation24 + $0x40] sm:$0xff] }
 0x6b7   :  { %2728 = vmatpush.msrb.mxu0 %v4708_v4  ;;  %v2165_v30 = vpack.c.bf16 %v5757_v6, %v5757_v6 }
 0x6b8   :  { %2635 = vmatpush.msra.mxu2 %v5698_v44  ;;  %v4715_v44 = vld [vmem:[#allocation24 + $0x30] sm:$0xff] }
 0x6b9   :  { %2729 = vmatpush.msrb.mxu0 %v4709_v5 }
 0x6bb   :  { %2730 = vmatpush.msrb.mxu0 %v4710_v26 }
 0x6bd   :  { %2731 = vmatpush.msrb.mxu0 %v4711_v51 }
 0x6bf   :  { %2732 = vmatpush.msrb.mxu0 %v4712_v7 }
 0x6c1   :  { %2314 = vmatmul.bf16.gmra.mxu2 %v2165_v30  ;;  %2332 = vmatmul.bf16.gmra.mxu3 %v2165_v30 }
 0x6c2   :  { %2350 = vmatmul.bf16.gmra.mxu0 %v2165_v30 }
 0x6c3   :  { %2733 = vmatpush.msrb.mxu0 %v4713_v41 }
 0x6c5   :  { %2734 = vmatpush.msrb.mxu0 %v4714_v8 }
 0x6c7   :  { %2735 = vmatpush.msrb.mxu0 %v4715_v44 }
 0x6c9   :  { %2736 = vmatpush.msrb.mxu0 %v4716_v57 }
 0x6cb   :  { %2737 = vmatpush.msrb.mxu0 %v4717_v9 }
 0x6cd   :  { %2738 = vmatpush.msrb.mxu0 %v4718_v12 }
 0x6cf   :  { %2739 = vmatpush.msrb.mxu0 %v4719_v11 }
 0x6d1   :  { %2740 = vmatpush.msrb.mxu0 %v4720_v45 }
 0x6d3   :  { %2741 = vmatpush.msrb.mxu0 %v4721_v47 }
 0x72f   :  { %v5761_v58 = vpop.f32.mrf.mxu0 }
 0x734   :  { %v2310_v18 = vpop.f32.mrf.mxu2  ;;  %v2328_v22 = vpop.f32.mrf.mxu3 }
 0x735   :  { %v2311_v0 = vadd.f32 %v2310_v18, %v2167_v56  ;;  %v2329_v2 = vadd.f32 %v2328_v22, %v2168_v16 }
 0x737   :  { %v2355_v28 = vmul.f32 %v2329_v2, %v2311_v0  ;;  %v5767_v10 = vpop.f32.mrf.mxu0 }
 0x739   :  { %2374 = vmatmul.f32.vlgmr.msrb.gmra.mxu1 %v2355_v28 }
 0x73a   :  { %2758 = vmatpush.msrb.mxu1 %v4706_v49 }
 0x73c   :  { %v2312_v24 = vpop.f32.mrf.mxu2  ;;  %v2330_v29 = vpop.f32.mrf.mxu3  ;;  %2759 = vmatpush.msrb.mxu1 %v4707_v52 }
 0x73d   :  { %v2313_v33 = vadd.f32 %v2312_v24, %v2167_v56  ;;  %v2331_v35 = vadd.f32 %v2330_v29, %v2168_v16 }
 0x73e   :  { %2760 = vmatpush.msrb.mxu1 %v4708_v4 }
 0x73f   :  { %v2384_v14 = vmul.f32 %v2331_v35, %v2311_v0  ;;  %v5769_v21 = vpop.f32.mrf.mxu0  ;;  %v2356_v13 = vmul.f32 %v2329_v2, %v2313_v33  ;;  %v2385_v54 = vmul.f32 %v2331_v35, %v2313_v33 }
 0x740   :  { %2761 = vmatpush.msrb.mxu1 %v4709_v5 }
 0x741   :  { %2377 = vmatmul.f32.gmra.mxu1 %v2356_v13  ;;  %2403 = vmatmul.f32.vlgmr.msrb.gmra.mxu2 %v2384_v14  ;;  %v4496_v14 = vld [vmem:[%s5864_s9 + $0x78] sm:$0xff] }
 0x742   :  { %2762 = vmatpush.msrb.mxu1 %v4710_v26  ;;  %2705 = vmatpush.bf16.msra.mxu3 %v4496_v14 }
 0x744   :  { %v2315_v37 = vpop.f32.mrf.mxu2  ;;  %v2333_v31 = vpop.f32.mrf.mxu3  ;;  %2763 = vmatpush.msrb.mxu1 %v4711_v51 }
 0x745   :  { %v2316_v42 = vadd.f32 %v2315_v37, %v2167_v56  ;;  %v2334_v50 = vadd.f32 %v2333_v31, %v2168_v16 }
 0x746   :  { %2764 = vmatpush.msrb.mxu1 %v4712_v7 }
 0x747   :  { %v2413_v53 = vmul.f32 %v2334_v50, %v2311_v0  ;;  %v2353_v17 = vpop.f32.mrf.mxu0  ;;  %v2357_v15 = vmul.f32 %v2329_v2, %v2316_v42  ;;  %v2386_v61 = vmul.f32 %v2331_v35, %v2316_v42  ;;  %v2414_v19 = vmul.f32 %v2334_v50, %v2313_v33 }
 0x748   :  { %2765 = vmatpush.msrb.mxu1 %v4713_v41  ;;  %v2415_v40 = vmul.f32 %v2334_v50, %v2316_v42  ;;  %v4495_v42 = vld [vmem:[%s5864_s9 + $0x70] sm:$0xff] }
 0x749   :  { %2380 = vmatmul.f32.gmra.mxu1 %v2357_v15  ;;  %2406 = vmatmul.f32.gmra.mxu2 %v2385_v54 }
 0x74a   :  { %2432 = vmatmul.f32.vlgmr.msrb.gmra.mxu3 %v2413_v53  ;;  %2766 = vmatpush.msrb.mxu1 %v4714_v8 }
 0x74b   :  { %2706 = vmatpush.bf16.msra.mxu3 %v4495_v42 }
 0x74c   :  { %v2317_v46 = vpop.f32.mrf.mxu2  ;;  %v2335_v55 = vpop.f32.mrf.mxu3  ;;  %2767 = vmatpush.msrb.mxu1 %v4715_v44 }
 0x74d   :  { %v4494_v46 = vld [vmem:[%s5864_s9 + $0x68] sm:$0xff] }
 0x74e   :  { %2768 = vmatpush.msrb.mxu1 %v4716_v57 }
 0x74f   :  { %2707 = vmatpush.bf16.msra.mxu3 %v4494_v46 }
 0x750   :  { %2769 = vmatpush.msrb.mxu1 %v4717_v9 }
 0x751   :  { %2409 = vmatmul.f32.gmra.mxu2 %v2386_v61 }
 0x752   :  { %2435 = vmatmul.f32.gmra.mxu3 %v2414_v19  ;;  %2770 = vmatpush.msrb.mxu1 %v4718_v12 }
 0x754   :  { %2771 = vmatpush.msrb.mxu1 %v4719_v11 }
 0x756   :  { %2772 = vmatpush.msrb.mxu1 %v4720_v45 }
 0x758   :  { %2773 = vmatpush.msrb.mxu1 %v4721_v47 }
 0x75a   :  { %2438 = vmatmul.f32.gmra.mxu3 %v2415_v40 }
 0x7b6   :  { %v2375_v62 = vpop.f32.mrf.mxu1 }
 0x7be   :  { %v2378_v39 = vpop.f32.mrf.mxu1 }
 0x7c4   :  { %v2404_v60 = vpop.f32.mrf.mxu2 }
 0x7c5   :  { %v2442_v20 = vmax.f32 %v2375_v62, %v2404_v60 }
 0x7c6   :  { %v2381_v44 = vpop.f32.mrf.mxu1 }
 0x7cc   :  { %v2407_v34 = vpop.f32.mrf.mxu2 }
 0x7cd   :  { %v2433_v43 = vpop.f32.mrf.mxu3  ;;  %v2443_v49 = vmax.f32 %v2378_v39, %v2407_v34 }
 0x7ce   :  { %v2445_v23 = vmax.f32 %v2442_v20, %v2433_v43 }
 0x7d0   :  { %v2448_v48 = vsub.f32 %v2375_v62, %v2445_v23  ;;  %v2457_v25 = vsub.f32 %v2404_v60, %v2445_v23  ;;  %v2466_v63 = vsub.f32 %v2433_v43, %v2445_v23 }
 0x7d2   :  { %v2451_v32 = vmul.f32 1.442695, %v2448_v48  ;;  %v2460_v3 = vmul.f32 1.442695, %v2457_v25  ;;  %v2469_v36 = vmul.f32 1.442695, %v2466_v63 }
 0x7d4   :  { %4654 = vpow2.f32 %v2451_v32  ;;  %v2410_v51 = vpop.f32.mrf.mxu2 }
 0x7d5   :  { %4656 = vpow2.f32 %v2460_v3  ;;  %v2436_v52 = vpop.f32.mrf.mxu3  ;;  %v2444_v12 = vmax.f32 %v2381_v44, %v2410_v51 }
 0x7d6   :  { %v2446_v38 = vmax.f32 %v2443_v49, %v2436_v52  ;;  %4658 = vpow2.f32 %v2469_v36 }
 0x7d8   :  { %v2449_v4 = vsub.f32 %v2378_v39, %v2446_v38  ;;  %v2458_v5 = vsub.f32 %v2407_v34, %v2446_v38  ;;  %v2467_v26 = vsub.f32 %v2436_v52, %v2446_v38 }
 0x7da   :  { %v4655_v30 = vpop.eup %4654  ;;  %v2453_v7 = vmul.f32 1.442695, %v2449_v4  ;;  %v2462_v41 = vmul.f32 1.442695, %v2458_v5  ;;  %v2471_v57 = vmul.f32 1.442695, %v2467_v26 }
 0x7db   :  { %v4657_v8 = vpop.eup %4656 }
 0x7dc   :  { %v2475_v9 = vadd.f32 %v4657_v8, %v4655_v30  ;;  %4660 = vpow2.f32 %v2453_v7  ;;  %v4659_v11 = vpop.eup %4658 }
 0x7dd   :  { %4662 = vpow2.f32 %v2462_v41  ;;  %v2439_v45 = vpop.f32.mrf.mxu3 }
 0x7de   :  { %v2478_v47 = vadd.f32 %v4659_v11, %v2475_v9  ;;  %v2447_v56 = vmax.f32 %v2444_v12, %v2439_v45  ;;  %4664 = vpow2.f32 %v2471_v57 }
 0x7e0   :  { %4666 = vrcp.f32 %v2478_v47  ;;  %v2450_v16 = vsub.f32 %v2381_v44, %v2447_v56  ;;  %v2459_v18 = vsub.f32 %v2410_v51, %v2447_v56  ;;  %v2468_v22 = vsub.f32 %v2439_v45, %v2447_v56 }
 0x7e1   :  { %v2492_v53 = vand.u32 2147483648, %v2478_v47  ;;  %v2490_v54 = vand.u32 2147483647, %v2478_v47  ;;  %vm2486_vm2 = vweird.f32 %v2478_v47 }
 0x7e2   :  { %v4661_v0 = vpop.eup %4660  ;;  %v2455_v28 = vmul.f32 1.442695, %v2450_v16  ;;  %v2464_v24 = vmul.f32 1.442695, %v2459_v18  ;;  %v2473_v29 = vmul.f32 1.442695, %v2468_v22 }
 0x7e3   :  { %v4663_v2 = vpop.eup %4662  ;;  %v2493_v62 = vor.u32 1.1754944e-38, %v2492_v53  ;;  %vm2491_vm4 = vcmp.eq.f32.partialorder %v2490_v54, 8.507059e+37  ;;  %v4493_v18 = vld [vmem:[%s5864_s9 + $0x60] sm:$0xff]  ;;  %v4492_v22 = vld [vmem:[%s5864_s9 + $0x58] sm:$0xff] }
 0x7e4   :  { %v2476_v33 = vadd.f32 %v4663_v2, %v4661_v0  ;;  %v4665_v35 = vpop.eup %4664  ;;  %4668 = vpow2.f32 %v2455_v28  ;;  %2708 = vmatpush.bf16.msra.mxu3 %v4493_v18  ;;  %v4489_v28 = vld [vmem:[%s5864_s9 + $0x40] sm:$0xff]  ;;  %v4526_v18 = vld [vmem:[#allocation18 + $0x1ec] sm:$0xf] }
 0x7e5   :  { %4670 = vpow2.f32 %v2464_v24  ;;  %v2169_v24 = vperm.slane %v5763_v59, 2 }
 0x7e6   :  { %v4667_v13 = vpop.eup %4666  ;;  %v2479_v37 = vadd.f32 %v4665_v35, %v2476_v33  ;;  %4672 = vpow2.f32 %v2473_v29 }
 0x7e7   :  { %v2482_v31 = vmul.f32 %v4667_v13, %v2478_v47  ;;  %vm2487_vm1 = vweird.f32 %v4667_v13  ;;  %v2347_v29 = vadd.f32 %v5761_v58, %v2169_v24  ;;  %v2349_v33 = vadd.f32 %v5767_v10, %v2169_v24 }
 0x7e8   :  { %4674 = vrcp.f32 %v2479_v37  ;;  %vm2488_vm3 = vmor %vm2486_vm2, %vm2487_vm1  ;;  %v2506_v32 = vand.u32 2147483648, %v2479_v37  ;;  %v2504_v36 = vand.u32 2147483647, %v2479_v37  ;;  %vm2500_vm7 = vweird.f32 %v2479_v37  ;;  %2709 = vmatpush.bf16.msra.mxu3 %v4492_v22  ;;  %v4217_v22 = vld [vmem:[#allocation18 + $0x1f8] sm:$0xf0] }
 0x7e9   :  { %v2483_v50 = vsub.f32 1.0, %v2482_v31  ;;  %v2352_v42 = vadd.f32 %v5769_v21, %v2169_v24  ;;  %v4521_v24 = vld [vmem:[#allocation18 + $0x1c4] sm:$0xf] }
 0x7ea   :  { %v4669_v17 = vpop.eup %4668  ;;  %v2507_v38 = vor.u32 1.1754944e-38, %v2506_v32  ;;  %vm2505_vm9 = vcmp.eq.f32.partialorder %v2504_v36, 8.507059e+37 }
 0x7eb   :  { %v2484_v15 = vmul.f32 %v4667_v13, %v2483_v50  ;;  %v4671_v55 = vpop.eup %4670 }
 0x7ec   :  { %v4673_v61 = vpop.eup %4672  ;;  %v2477_v40 = vadd.f32 %v4671_v55, %v4669_v17 }
 0x7ed   :  { %v2485_v19 = vadd.f32 %v4667_v13, %v2484_v15 }
 0x7ee   :  { %v4675_v60 = vpop.eup %4674  ;;  %v2480_v43 = vadd.f32 %v4673_v61, %v2477_v40 }
 0x7ef   :  { %v2489_v20 = vsel %vm2488_vm3, %v4667_v13, %v2485_v19  ;;  %v2496_v23 = vmul.f32 %v4675_v60, %v2479_v37  ;;  %vm2501_vm6 = vweird.f32 %v4675_v60 }
 0x7f0   :  { %v2494_v34 = vsel %vm2491_vm4, %v2493_v62, %v2489_v20  ;;  %4676 = vrcp.f32 %v2480_v43  ;;  %vm2502_vm8 = vmor %vm2500_vm7, %vm2501_vm6  ;;  %v2518_v57 = vand.u32 2147483647, %v2480_v43  ;;  %vm2514_vm11 = vweird.f32 %v2480_v43 }
 0x7f1   :  { %v2523_v48 = vmul.f32 %v4655_v30, %v2494_v34  ;;  %v2564_v25 = vmul.f32 %v4657_v8, %v2494_v34  ;;  %v2608_v63 = vmul.f32 %v4659_v11, %v2494_v34  ;;  %v2497_v39 = vsub.f32 1.0, %v2496_v23 }
 0x7f2   :  { %v2520_v8 = vand.u32 2147483648, %v2480_v43  ;;  %vm2519_vm13 = vcmp.eq.f32.partialorder %v2518_v57, 8.507059e+37  ;;  %v4527_v57 = vld [vmem:[#allocation18 + $0x1ec] sm:$0xf0] }
 0x7f3   :  { %4052 = vmatmul.msk.f32.vlgmr.msra.gmra.mxu0 %vm1060_vm5, %v2523_v48  ;;  %4055 = vmatmul.msk.f32.vlgmr.msra.gmra.mxu1 %vm1060_vm5, %v2564_v25  ;;  %v2498_v3 = vmul.f32 %v4675_v60, %v2497_v39  ;;  %v4612_v25 = vld [vmem:[#allocation17 + $0x1] ss:$0 sm:$0xff] }
 0x7f4   :  { %4058 = vmatmul.msk.f32.vlgmr.msra.gmra.mxu2 %vm1060_vm5, %v2608_v63  ;;  %v2521_v12 = vor.u32 1.1754944e-38, %v2520_v8 }
 0x7f5   :  { %v2499_v49 = vadd.f32 %v4675_v60, %v2498_v3 }
 0x7f6   :  { %v4677_v52 = vpop.eup %4676 }
 0x7f7   :  { %v2503_v4 = vsel %vm2502_vm8, %v4675_v60, %v2499_v49  ;;  %v2510_v5 = vmul.f32 %v4677_v52, %v2480_v43  ;;  %vm2515_vm10 = vweird.f32 %v4677_v52 }
 0x7f8   :  { %v2508_v26 = vsel %vm2505_vm9, %v2507_v38, %v2503_v4  ;;  %vm2516_vm12 = vmor %vm2514_vm11, %vm2515_vm10 }
 0x7f9   :  { %v2524_v51 = vmul.f32 %v4661_v0, %v2508_v26  ;;  %v2565_v30 = vmul.f32 %v4663_v2, %v2508_v26  ;;  %v2609_v7 = vmul.f32 %v4665_v35, %v2508_v26  ;;  %v2511_v41 = vsub.f32 1.0, %v2510_v5  ;;  %v4491_v0 = vld [vmem:[%s5864_s9 + $0x50] sm:$0xff]  ;;  %v4490_v2 = vld [vmem:[%s5864_s9 + $0x48] sm:$0xff] }
 0x7fa   :  { %2710 = vmatpush.bf16.msra.mxu3 %v4491_v0  ;;  %v4220_v0 = vor.u32 %v4526_v18, %v4217_v22 }
 0x7fb   :  { %4053 = vmatmul.msk.f32.gmra.mxu0 %vm1060_vm5, %v2524_v51  ;;  %4056 = vmatmul.msk.f32.gmra.mxu1 %vm1060_vm5, %v2565_v30  ;;  %v2512_v44 = vmul.f32 %v4677_v52, %v2511_v41 }
 0x7fc   :  { %4059 = vmatmul.msk.f32.gmra.mxu2 %vm1060_vm5, %v2609_v7  ;;  %3054 = vmatpush.bf16.msra.mxu1 %v4220_v0  ;;  %v4111_v0 = vld [vmem:[#allocation18 + $0x120] sm:$0xf] }
 0x7fd   :  { %v2513_v9 = vadd.f32 %v4677_v52, %v2512_v44  ;;  %v4207_v44 = vld [vmem:[#allocation18 + $0x1e0] sm:$0xf] }
 0x7fe   :  { %2711 = vmatpush.bf16.msra.mxu3 %v4490_v2  ;;  %v4191_v2 = vld [vmem:[#allocation18 + $0x1c0] sm:$0xf] }
 0x7ff   :  { %v2517_v11 = vsel %vm2516_vm12, %v4677_v52, %v2513_v9  ;;  %v4525_v9 = vld [vmem:[#allocation18 + $0x1e4] sm:$0xf] }
 0x800   :  { %v2522_v45 = vsel %vm2519_vm13, %v2521_v12, %v2517_v11  ;;  %v4208_v12 = vor.u32 %v4527_v57, %v4207_v44  ;;  %v4209_v11 = vld [vmem:[#allocation18 + $0x1f0] sm:$0xf0]  ;;  %v4507_v44 = vld [vmem:[#allocation18 + $0x14c] sm:$0xf0] }
 0x801   :  { %v2525_v47 = vmul.f32 %v4669_v17, %v2522_v45  ;;  %v2566_v56 = vmul.f32 %v4671_v55, %v2522_v45  ;;  %v2610_v16 = vmul.f32 %v4673_v61, %v2522_v45  ;;  %v4215_v45 = vld [vmem:[#allocation18 + $0x1e8] sm:$0xf] }
 0x802   :  { %2712 = vmatpush.bf16.msra.mxu3 %v4489_v28  ;;  %3000 = vmatpush.bf16.msrb.mxu2 %v4208_v12  ;;  %v4523_v28 = vld [vmem:[#allocation18 + $0x1cc] sm:$0xf0]  ;;  %v4129_v12 = vld [vmem:[#allocation18 + $0x150] sm:$0xf0] }
 0x803   :  { %4054 = vmatmul.msk.f32.gmra.mxu0 %vm1060_vm5, %v2525_v47  ;;  %4057 = vmatmul.msk.f32.gmra.mxu1 %vm1060_vm5, %v2566_v56  ;;  %v4528_v47 = vld [vmem:[#allocation18 + $0x1f4] sm:$0xf0]  ;;  %v4212_v56 = vor.u32 %v4525_v9, %v4209_v11  ;;  %v4505_v9 = vld [vmem:[#allocation18 + $0x144] sm:$0xf]  ;;  %v4135_v11 = vld [vmem:[#allocation18 + $0x148] sm:$0xf] }
 0x804   :  { %4060 = vmatmul.msk.f32.gmra.mxu2 %vm1060_vm5, %v2610_v16  ;;  %v4216_v16 = vor.u32 %v4528_v47, %v4215_v45  ;;  %v4132_v45 = vor.u32 %v4505_v9, %v4129_v12  ;;  %v4508_v47 = vld [vmem:[#allocation18 + $0x154] sm:$0xf0] }
 0x805   :  { %v4136_v18 = vor.u32 %v4508_v47, %v4135_v11  ;;  %v4543_v9 = vld [vmem:[#allocation21 + $0x170] sm:$0xff] }
 0x806   :  { %3018 = vmatpush.bf16.msrb.mxu3 %v4212_v56  ;;  %3036 = vmatpush.bf16.msra.mxu0 %v4216_v16  ;;  %v4506_v56 = vld [vmem:[#allocation18 + $0x14c] sm:$0xf]  ;;  %v4137_v16 = vld [vmem:[#allocation18 + $0x158] sm:$0xf0] }
 0x807   :  { %v4140_v22 = vor.u32 %v4506_v56, %v4137_v16  ;;  %v4550_v56 = vld [vmem:[#allocation21 + $0x1a8] sm:$0xff] }
 0x808   :  { %v4558_v16 = vld [vmem:[#allocation21 + $0x1e8] sm:$0xff] }
 0x870   :  { %v2552_v35 = vpop.f32.mrf.mxu0  ;;  %v2593_v14 = vpop.f32.mrf.mxu1 }
 0x871   :  { %v2561_v13 = vmul.f32 %v2552_v35, %v2347_v29  ;;  %v2602_v37 = vmul.f32 %v2593_v14, %v2349_v33  ;;  %v4199_v35 = vld [vmem:[#allocation18 + $0x1c8] sm:$0xf]  ;;  %v4524_v14 = vld [vmem:[#allocation18 + $0x1d4] sm:$0xf0] }
 0x873   :  { %v2605_v31 = vadd.f32 %v2602_v37, %v2561_v13  ;;  %v4200_v37 = vor.u32 %v4524_v14, %v4199_v35  ;;  %v4504_v35 = vld [vmem:[#allocation18 + $0x134] sm:$0xf0] }
 0x875   :  { %3037 = vmatpush.bf16.msra.mxu0 %v4200_v37  ;;  %v4502_v37 = vld [vmem:[#allocation18 + $0x12c] sm:$0xf] }
 0x877   :  { %v2637_v50 = vpop.f32.mrf.mxu2 }
 0x878   :  { %v2646_v53 = vmul.f32 %v2637_v50, %v2352_v42  ;;  %v2555_v17 = vpop.f32.mrf.mxu0  ;;  %v2596_v15 = vpop.f32.mrf.mxu1 }
 0x879   :  { %v2562_v46 = vmul.f32 %v2555_v17, %v2347_v29  ;;  %v2603_v55 = vmul.f32 %v2596_v15, %v2349_v33  ;;  %v4519_v17 = vld [vmem:[#allocation18 + $0x1ac] sm:$0xf0]  ;;  %v4517_v15 = vld [vmem:[#allocation18 + $0x1a4] sm:$0xf] }
 0x87a   :  { %v2649_v54 = vadd.f32 %v2646_v53, %v2605_v31  ;;  %v4522_v31 = vld [vmem:[#allocation18 + $0x1cc] sm:$0xf]  ;;  %v4175_v53 = vld [vmem:[#allocation18 + $0x1a0] sm:$0xf] }
 0x87b   :  { %v2606_v61 = vadd.f32 %v2603_v55, %v2562_v46  ;;  %v4177_v46 = vld [vmem:[#allocation18 + $0x1b0] sm:$0xf0]  ;;  %v4183_v55 = vld [vmem:[#allocation18 + $0x1a8] sm:$0xf] }
 0x87f   :  { %v2640_v59 = vpop.f32.mrf.mxu2 }
 0x880   :  { %v2647_v19 = vmul.f32 %v2640_v59, %v2352_v42  ;;  %v2558_v58 = vpop.f32.mrf.mxu0  ;;  %v2599_v40 = vpop.f32.mrf.mxu1  ;;  %v4180_v59 = vor.u32 %v4517_v15, %v4177_v46  ;;  %v4097_v46 = vld [vmem:[#allocation18 + $0x110] sm:$0xf0] }
 0x881   :  { %v2563_v10 = vmul.f32 %v2558_v58, %v2347_v29  ;;  %v2604_v60 = vmul.f32 %v2599_v40, %v2349_v33  ;;  %v4192_v29 = vor.u32 %v4523_v28, %v4191_v2  ;;  %v4193_v33 = vld [vmem:[#allocation18 + $0x1d0] sm:$0xf0]  ;;  %v4518_v58 = vld [vmem:[#allocation18 + $0x1ac] sm:$0xf]  ;;  %v4185_v40 = vld [vmem:[#allocation18 + $0x1b8] sm:$0xf0] }
 0x882   :  { %v2650_v62 = vadd.f32 %v2647_v19, %v2606_v61  ;;  %v4196_v13 = vor.u32 %v4521_v24, %v4193_v33  ;;  %v4520_v61 = vld [vmem:[#allocation18 + $0x1b4] sm:$0xf0]  ;;  %v4503_v2 = vld [vmem:[#allocation18 + $0x12c] sm:$0xf0]  ;;  %v4501_v28 = vld [vmem:[#allocation18 + $0x124] sm:$0xf] }
 0x883   :  { %v2607_v20 = vadd.f32 %v2604_v60, %v2563_v10  ;;  %3001 = vmatpush.bf16.msrb.mxu2 %v4192_v29  ;;  %v4184_v19 = vor.u32 %v4520_v61, %v4183_v55  ;;  %v4188_v10 = vor.u32 %v4518_v58, %v4185_v40  ;;  %v4159_v60 = vld [vmem:[#allocation18 + $0x180] sm:$0xf]  ;;  %v4112_v24 = vor.u32 %v4503_v2, %v4111_v0  ;;  %v4113_v29 = vld [vmem:[#allocation18 + $0x130] sm:$0xf0]  ;;  %v4119_v33 = vld [vmem:[#allocation18 + $0x128] sm:$0xf] }
 0x884   :  { %v2652_v43 = vpack.c.bf16 %v2650_v62, %v2649_v54  ;;  %3019 = vmatpush.bf16.msrb.mxu3 %v4196_v13  ;;  %v4176_v54 = vor.u32 %v4519_v17, %v4175_v53  ;;  %v4515_v62 = vld [vmem:[#allocation18 + $0x18c] sm:$0xf0]  ;;  %v4116_v14 = vor.u32 %v4501_v28, %v4113_v29  ;;  %v4120_v13 = vor.u32 %v4504_v35, %v4119_v33  ;;  %v4497_v17 = vld [vmem:[#allocation18 + $0x104] sm:$0xf]  ;;  %v4103_v55 = vld [vmem:[#allocation18 + $0x108] sm:$0xf] }
 0x885   :  { %3038 = vmatpush.bf16.msra.mxu0 %v4184_v19  ;;  %v4499_v53 = vld [vmem:[#allocation18 + $0x10c] sm:$0xf0]  ;;  %v4500_v61 = vld [vmem:[#allocation18 + $0x114] sm:$0xf0]  ;;  %v4100_v19 = vor.u32 %v4497_v17, %v4097_v46  ;;  %v4498_v40 = vld [vmem:[#allocation18 + $0x10c] sm:$0xf] }
 0x886   :  { %2713 = vmatmul.bf16.vlgmr.msra.gmra.mxu3 %v2652_v43  ;;  %v4160_v43 = vor.u32 %v4515_v62, %v4159_v60  ;;  %v4104_v58 = vor.u32 %v4500_v61, %v4103_v55  ;;  %v4534_v0 = vld [vmem:[#allocation21 + $0x128] sm:$0xff]  ;;  %v4549_v33 = vld [vmem:[#allocation21 + $0x1a0] sm:$0xff]  ;;  %v4547_v61 = vld [vmem:[#allocation21 + $0x190] sm:$0xff] }
 0x887   :  { %v2643_v23 = vpop.f32.mrf.mxu2  ;;  %3002 = vmatpush.bf16.msrb.mxu2 %v4176_v54  ;;  %v4542_v2 = vld [vmem:[#allocation21 + $0x168] sm:$0xff]  ;;  %v4557_v35 = vld [vmem:[#allocation21 + $0x1e0] sm:$0xff] }
 0x888   :  { %v2648_v21 = vmul.f32 %v2643_v23, %v2352_v42  ;;  %v4201_v42 = vld [vmem:[#allocation18 + $0x1d8] sm:$0xf0]  ;;  %3020 = vmatpush.bf16.msrb.mxu3 %v4180_v59  ;;  %v4161_v23 = vld [vmem:[#allocation18 + $0x190] sm:$0xf0]  ;;  %v4533_v46 = vld [vmem:[#allocation21 + $0x120] sm:$0xff] }
 0x889   :  { %v4204_v50 = vor.u32 %v4522_v31, %v4201_v42  ;;  %v4121_v31 = vld [vmem:[#allocation18 + $0x138] sm:$0xf0]  ;;  %v4541_v55 = vld [vmem:[#allocation21 + $0x160] sm:$0xff] }
 0x88a   :  { %v2651_v34 = vadd.f32 %v2648_v21, %v2607_v20  ;;  %v4513_v20 = vld [vmem:[#allocation18 + $0x184] sm:$0xf]  ;;  %v4167_v21 = vld [vmem:[#allocation18 + $0x188] sm:$0xf]  ;;  %v4124_v42 = vor.u32 %v4502_v37, %v4121_v31 }
 0x88b   :  { %3055 = vmatpush.bf16.msra.mxu1 %v4204_v50  ;;  %3003 = vmatpush.bf16.msrb.mxu2 %v4160_v43  ;;  %v4095_v50 = vld [vmem:[#allocation18 + $0x100] sm:$0xf] }
 0x88c   :  { %v2653_v48 = vpack.c.bf16 %v2651_v34, %v2651_v34  ;;  %v4516_v34 = vld [vmem:[#allocation18 + $0x194] sm:$0xf0]  ;;  %v4096_v54 = vor.u32 %v4499_v53, %v4095_v50 }
 0x88f   :  { %3056 = vmatpush.bf16.msra.mxu1 %v4188_v10  ;;  %v4105_v10 = vld [vmem:[#allocation18 + $0x118] sm:$0xf0] }
 0x890   :  { %v4108_v60 = vor.u32 %v4498_v40, %v4105_v10  ;;  %v4554_v40 = vld [vmem:[#allocation21 + $0x1c8] sm:$0xff]  ;;  %v4531_v10 = vld [vmem:[#allocation21 + $0x110] sm:$0xff] }
 0x896   :  { %2718 = vmatmul.bf16.gmra.mxu3 %v2653_v48  ;;  %v4164_v48 = vor.u32 %v4513_v20, %v4161_v23 }
 0x898   :  { %3021 = vmatpush.bf16.msrb.mxu3 %v4164_v48 }
 0x909   :  { %v2714_v63 = vpop.f32.mrf.mxu3 }
 0x90a   :  { %v2715_v39 = vadd.f32 %v4612_v25, %v2714_v63  ;;  %v4514_v63 = vld [vmem:[#allocation18 + $0x18c] sm:$0xf] }
 0x90c   :  { %v2723_v32 = vadd.f32 %v2715_v39, %v5744_v27  ;;  %v4169_v39 = vld [vmem:[#allocation18 + $0x198] sm:$0xf0] }
 0x90e   :  { %2742 = vmatmul.f32.vlgmr.msrb.gmra.mxu0 %v2723_v32 }
 0x911   :  { %v2716_v3 = vpop.f32.mrf.mxu3 }
 0x912   :  { %v2717_v36 = vadd.f32 %v4612_v25, %v2716_v3  ;;  %v4143_v3 = vld [vmem:[#allocation18 + $0x160] sm:$0xf] }
 0x914   :  { %v2724_v49 = vadd.f32 %v2717_v36, %v5746_v1  ;;  %v4511_v36 = vld [vmem:[#allocation18 + $0x16c] sm:$0xf0] }
 0x916   :  { %2745 = vmatmul.f32.gmra.mxu0 %v2724_v49 }
 0x919   :  { %v2719_v52 = vpop.f32.mrf.mxu3 }
 0x91a   :  { %v2720_v38 = vadd.f32 %v4612_v25, %v2719_v52  ;;  %v4168_v25 = vor.u32 %v4516_v34, %v4167_v21  ;;  %v4144_v52 = vor.u32 %v4511_v36, %v4143_v3 }
 0x91c   :  { %v2725_v4 = vadd.f32 %v2720_v38, %v5757_v6  ;;  %3039 = vmatpush.bf16.msra.mxu0 %v4168_v25  ;;  %v4145_v38 = vld [vmem:[#allocation18 + $0x170] sm:$0xf0]  ;;  %3004 = vmatpush.bf16.msrb.mxu2 %v4144_v52 }
 0x91e   :  { %2748 = vmatmul.f32.gmra.mxu0 %v2725_v4 }
 0x921   :  { %v2721_v5 = vpop.f32.mrf.mxu3 }
 0x922   :  { %v4512_v5 = vld [vmem:[#allocation18 + $0x174] sm:$0xf0] }
 0x98b   :  { %v2743_v26 = vpop.f32.mrf.mxu0 }
 0x98c   :  { %v5811_v51 = vsub.f32 %v2723_v32, %v2743_v26  ;;  %v4172_v32 = vor.u32 %v4514_v63, %v4169_v39 }
 0x98e   :  { %v2755_v30 = vmul.f32 %v5811_v51, %v5811_v51  ;;  %3057 = vmatpush.bf16.msra.mxu1 %v4172_v32 }
 0x990   :  { %2774 = vmatmul.f32.vlgmr.msrb.gmra.mxu1 %v2755_v30 }
 0x993   :  { %v2746_v27 = vpop.f32.mrf.mxu0 }
 0x994   :  { %v5815_v7 = vsub.f32 %v2724_v49, %v2746_v27  ;;  %v4509_v49 = vld [vmem:[#allocation18 + $0x164] sm:$0xf]  ;;  %v4510_v27 = vld [vmem:[#allocation18 + $0x16c] sm:$0xf] }
 0x995   :  { %v4148_v26 = vor.u32 %v4509_v49, %v4145_v38  ;;  %v4552_v38 = vld [vmem:[#allocation21 + $0x1b8] sm:$0xff] }
 0x996   :  { %v2756_v1 = vmul.f32 %v5815_v7, %v5815_v7 }
 0x997   :  { %3022 = vmatpush.bf16.msrb.mxu3 %v4148_v26  ;;  %v4544_v26 = vld [vmem:[#allocation21 + $0x178] sm:$0xff] }
 0x998   :  { %2777 = vmatmul.f32.gmra.mxu1 %v2756_v1  ;;  %v4153_v1 = vld [vmem:[#allocation18 + $0x178] sm:$0xf0] }
 0x99b   :  { %v2749_v41 = vpop.f32.mrf.mxu0  ;;  %3023 = vmatpush.bf16.msrb.mxu3 %v4132_v45 }
 0x99c   :  { %v5819_v8 = vsub.f32 %v2725_v4, %v2749_v41  ;;  %v4151_v4 = vld [vmem:[#allocation18 + $0x168] sm:$0xf]  ;;  %v4156_v41 = vor.u32 %v4510_v27, %v4153_v1  ;;  %v4551_v27 = vld [vmem:[#allocation21 + $0x1b0] sm:$0xff] }
 0x99d   :  { %v4152_v30 = vor.u32 %v4512_v5, %v4151_v4  ;;  %v4560_v4 = vld [vmem:[#allocation21 + $0x1f8] sm:$0xff]  ;;  %v4559_v1 = vld [vmem:[#allocation21 + $0x1f0] sm:$0xff] }
 0x99e   :  { %v2757_v6 = vmul.f32 %v5819_v8, %v5819_v8  ;;  %3058 = vmatpush.bf16.msra.mxu1 %v4156_v41  ;;  %v4536_v5 = vld [vmem:[#allocation21 + $0x138] sm:$0xff] }
 0x99f   :  { %3040 = vmatpush.bf16.msra.mxu0 %v4152_v30  ;;  %3024 = vmatpush.bf16.msrb.mxu3 %v4116_v14 }
 0x9a0   :  { %2780 = vmatmul.f32.gmra.mxu1 %v2757_v6  ;;  %v4127_v6 = vld [vmem:[#allocation18 + $0x140] sm:$0xf] }
 0x9a1   :  { %v4128_v57 = vor.u32 %v4507_v44, %v4127_v6  ;;  %v4613_v44 = vld [vmem:[%s5870_s15 + $0x1] ss:$0 sm:$0xff] }
 0x9a2   :  { %3059 = vmatpush.bf16.msra.mxu1 %v4140_v22 }
 0x9a3   :  { %3005 = vmatpush.bf16.msrb.mxu2 %v4128_v57  ;;  %3041 = vmatpush.bf16.msra.mxu0 %v4136_v18  ;;  %v4535_v57 = vld [vmem:[#allocation21 + $0x130] sm:$0xff]  ;;  %v4614_v18 = vld [vmem:[%s5871_s16 + $0x1] ss:$0 sm:$0xff] }
 0x9a4   :  { %3025 = vmatpush.bf16.msrb.mxu3 %v4100_v19  ;;  %v4540_v19 = vld [vmem:[#allocation21 + $0x158] sm:$0xff] }
 0x9a6   :  { %3060 = vmatpush.bf16.msra.mxu1 %v4124_v42 }
 0x9a7   :  { %3006 = vmatpush.bf16.msrb.mxu2 %v4112_v24  ;;  %3042 = vmatpush.bf16.msra.mxu0 %v4120_v13 }
 0x9a8   :  { %3305 = vmatpush.bf16.msra.mxu3 %v4544_v26 }
 0x9aa   :  { %3061 = vmatpush.bf16.msra.mxu1 %v4108_v60  ;;  %v4539_v60 = vld [vmem:[#allocation21 + $0x150] sm:$0xff] }
 0x9ab   :  { %3007 = vmatpush.bf16.msrb.mxu2 %v4096_v54  ;;  %3043 = vmatpush.bf16.msra.mxu0 %v4104_v58  ;;  %v4556_v54 = vld [vmem:[#allocation21 + $0x1d8] sm:$0xff]  ;;  %v4546_v58 = vld [vmem:[#allocation21 + $0x188] sm:$0xff] }
 0x9ac   :  { %3306 = vmatpush.bf16.msra.mxu3 %v4543_v9 }
 0x9ae   :  { %3341 = vmatpush.bf16.msrb.mxu1 %v4560_v4  ;;  %v4729_v4 = vld [vmem:[#allocation24 + $0x40] sm:$0xff] }
 0x9af   :  { %3323 = vmatpush.bf16.msrb.mxu0 %v4552_v38  ;;  %3287 = vmatpush.bf16.msra.mxu2 %v4536_v5 }
 0x9b0   :  { %3307 = vmatpush.bf16.msra.mxu3 %v4542_v2  ;;  %v4734_v2 = vld [vmem:[#allocation24 + $0x18] sm:$0xff] }
 0x9b2   :  { %3342 = vmatpush.bf16.msrb.mxu1 %v4559_v1 }
 0x9b3   :  { %3324 = vmatpush.bf16.msrb.mxu0 %v4551_v27  ;;  %3288 = vmatpush.bf16.msra.mxu2 %v4535_v57  ;;  %v4732_v57 = vld [vmem:[#allocation24 + $0x28] sm:$0xff] }
 0x9b4   :  { %3308 = vmatpush.bf16.msra.mxu3 %v4541_v55 }
 0x9b6   :  { %3343 = vmatpush.bf16.msrb.mxu1 %v4558_v16  ;;  %v4733_v16 = vld [vmem:[#allocation24 + $0x20] sm:$0xff] }
 0x9b7   :  { %3325 = vmatpush.bf16.msrb.mxu0 %v4550_v56  ;;  %3289 = vmatpush.bf16.msra.mxu2 %v4534_v0 }
 0x9b8   :  { %3309 = vmatpush.bf16.msra.mxu3 %v4540_v19  ;;  %v4737_v19 = vld [vmem:[#allocation24] sm:$0xff] }
 0x9ba   :  { %3344 = vmatpush.bf16.msrb.mxu1 %v4557_v35 }
 0x9bb   :  { %3326 = vmatpush.bf16.msrb.mxu0 %v4549_v33  ;;  %3290 = vmatpush.bf16.msra.mxu2 %v4533_v46 }
 0x9bc   :  { %3310 = vmatpush.bf16.msra.mxu3 %v4539_v60 }
 0x9be   :  { %3345 = vmatpush.bf16.msrb.mxu1 %v4556_v54 }
 0xa0d   :  { %v2775_v15 = vpop.f32.mrf.mxu1 }
 0xa0e   :  { %v2776_v59 = vadd.f32 1e-05, %v2775_v15  ;;  %v4548_v15 = vld [vmem:[#allocation21 + $0x198] sm:$0xff] }
 0xa0f   :  { %3327 = vmatpush.bf16.msrb.mxu0 %v4548_v15 }
 0xa10   :  { %4678 = vrsqrt.f32 %v2776_v59  ;;  %vm2790_vm14 = vweird.f32 %v2776_v59 }
 0xa13   :  { %3328 = vmatpush.bf16.msrb.mxu0 %v4547_v61  ;;  %v4736_v61 = vld [vmem:[#allocation24 + $0x8] sm:$0xff] }
 0xa15   :  { %v2778_v62 = vpop.f32.mrf.mxu1 }
 0xa16   :  { %v4679_v20 = vpop.eup %4678  ;;  %v2779_v43 = vadd.f32 1e-05, %v2778_v62  ;;  %v4545_v62 = vld [vmem:[#allocation21 + $0x180] sm:$0xff] }
 0xa17   :  { %v2785_v23 = vmul.f32 %v4679_v20, %v2776_v59  ;;  %vm2791_vm5 = vweird.f32 %v4679_v20  ;;  %v4532_v59 = vld [vmem:[#allocation21 + $0x118] sm:$0xff]  ;;  %3329 = vmatpush.bf16.msrb.mxu0 %v4546_v58 }
 0xa18   :  { %4680 = vrsqrt.f32 %v2779_v43  ;;  %vm2792_vm15 = vmor %vm2790_vm14, %vm2791_vm5  ;;  %vm2800_vm1 = vweird.f32 %v2779_v43  ;;  %3291 = vmatpush.bf16.msra.mxu2 %v4532_v59 }
 0xa19   :  { %v2786_v21 = vmul.f32 %v4679_v20, %v2785_v23  ;;  %v4538_v23 = vld [vmem:[#allocation21 + $0x148] sm:$0xff] }
 0xa1a   :  { %3311 = vmatpush.bf16.msra.mxu3 %v4538_v23 }
 0xa1b   :  { %v2787_v34 = vmul.f32 0.5, %v2786_v21  ;;  %3330 = vmatpush.bf16.msrb.mxu0 %v4545_v62  ;;  %v4529_v21 = vld [vmem:[#allocation21 + $0x100] sm:$0xff] }
 0xa1c   :  { %3292 = vmatpush.bf16.msra.mxu2 %v4531_v10 }
 0xa1d   :  { %v2788_v48 = vsub.f32 1.5, %v2787_v34  ;;  %v2781_v25 = vpop.f32.mrf.mxu1  ;;  %v4537_v34 = vld [vmem:[#allocation21 + $0x140] sm:$0xff] }
 0xa1e   :  { %v4681_v63 = vpop.eup %4680  ;;  %v2782_v39 = vadd.f32 1e-05, %v2781_v25  ;;  %3312 = vmatpush.bf16.msra.mxu3 %v4537_v34  ;;  %v4723_v25 = vld [vmem:[#allocation24 + $0x70] sm:$0xff] }
 0xa1f   :  { %v2789_v32 = vmul.f32 %v4679_v20, %v2788_v48  ;;  %v2795_v3 = vmul.f32 %v4681_v63, %v2779_v43  ;;  %vm2801_vm0 = vweird.f32 %v4681_v63  ;;  %v4530_v43 = vld [vmem:[#allocation21 + $0x108] sm:$0xff]  ;;  %v4722_v48 = vld [vmem:[#allocation24 + $0x78] sm:$0xff] }
 0xa20   :  { %4682 = vrsqrt.f32 %v2782_v39  ;;  %vm2802_vm2 = vmor %vm2800_vm1, %vm2801_vm0  ;;  %vm2810_vm4 = vweird.f32 %v2782_v39  ;;  %3293 = vmatpush.bf16.msra.mxu2 %v4530_v43 }
 0xa21   :  { %v2796_v36 = vmul.f32 %v4681_v63, %v2795_v3  ;;  %v2793_v49 = vsel %vm2792_vm15, %v4679_v20, %v2789_v32  ;;  %v4553_v20 = vld [vmem:[#allocation21 + $0x1c0] sm:$0xff]  ;;  %v4727_v3 = vld [vmem:[#allocation24 + $0x50] sm:$0xff] }
 0xa22   :  { %v2814_v6 = vmul.f32 %v2793_v49, %v5811_v51  ;;  %v4726_v32 = vld [vmem:[#allocation24 + $0x58] sm:$0xff] }
 0xa23   :  { %v2797_v52 = vmul.f32 0.5, %v2796_v36  ;;  %v4728_v36 = vld [vmem:[#allocation24 + $0x48] sm:$0xff]  ;;  %v2088_v49 = vld [vmem:[#allocation20 + $0x4] sm:$0xf] }
 0xa24   :  { %v2820_v51 = vmul.f32 %v4613_v44, %v2814_v6  ;;  %3294 = vmatpush.bf16.msra.mxu2 %v4529_v21  ;;  %v2834_v5 = vperm.slane %v2088_v49, 2  ;;  %v2835_v26 = vperm.slane %v2088_v49, 3  ;;  %v2832_v9 = vperm.slane %v2088_v49, 0 }
 0xa25   :  { %v2798_v30 = vsub.f32 1.5, %v2797_v52 }
 0xa26   :  { %v4683_v41 = vpop.eup %4682  ;;  %v5832_v14 = vadd.f32 %v4614_v18, %v2820_v51 }
 0xa27   :  { %v2799_v12 = vmul.f32 %v4681_v63, %v2798_v30  ;;  %v2805_v11 = vmul.f32 %v4683_v41, %v2782_v39  ;;  %vm2811_vm3 = vweird.f32 %v4683_v41  ;;  %v4725_v39 = vld [vmem:[#allocation24 + $0x60] sm:$0xff]  ;;  %v4730_v30 = vld [vmem:[#allocation24 + $0x38] sm:$0xff] }
 0xa28   :  { %vm2812_vm6 = vmor %vm2810_vm4, %vm2811_vm3 }
 0xa29   :  { %v2803_v45 = vsel %vm2802_vm2, %v4681_v63, %v2799_v12  ;;  %v2806_v47 = vmul.f32 %v4683_v41, %v2805_v11  ;;  %v4724_v63 = vld [vmem:[#allocation24 + $0x68] sm:$0xff]  ;;  %v2833_v12 = vperm.slane %v2088_v49, 1 }
 0xa2a   :  { %v2815_v22 = vmul.f32 %v2803_v45, %v5815_v7 }
 0xa2b   :  { %v2807_v28 = vmul.f32 0.5, %v2806_v47 }
 0xa2c   :  { %v2821_v24 = vmul.f32 %v4613_v44, %v2815_v22 }
 0xa2d   :  { %v2808_v29 = vsub.f32 1.5, %v2807_v28 }
 0xa2e   :  { %v5834_v13 = vadd.f32 %v4614_v18, %v2821_v24 }
 0xa2f   :  { %v2809_v37 = vmul.f32 %v4683_v41, %v2808_v29 }
 0xa30   :  { %v2829_v7 = vpack.c.bf16 %v5834_v13, %v5832_v14 }
 0xa31   :  { %v2813_v31 = vsel %vm2812_vm6, %v4683_v41, %v2809_v37  ;;  %v4731_v41 = vld [vmem:[#allocation24 + $0x30] sm:$0xff] }
 0xa32   :  { %3008 = vmatmul.bf16.vlgmr.msrb.gmra.mxu2 %v2829_v7  ;;  %3026 = vmatmul.bf16.vlgmr.msrb.gmra.mxu3 %v2829_v7  ;;  %v2816_v42 = vmul.f32 %v2813_v31, %v5819_v8  ;;  %v4555_v8 = vld [vmem:[#allocation21 + $0x1d0] sm:$0xff] }
 0xa33   :  { %3044 = vmatmul.bf16.vlgmr.msra.gmra.mxu0 %v2829_v7  ;;  %3062 = vmatmul.bf16.vlgmr.msra.gmra.mxu1 %v2829_v7  ;;  %v4735_v7 = vld [vmem:[#allocation24 + $0x10] sm:$0xff] }
 0xa34   :  { %v2822_v50 = vmul.f32 %v4613_v44, %v2816_v42  ;;  %3346 = vmatpush.bf16.msrb.mxu1 %v4555_v8  ;;  %3362 = vmatpush.msrb.mxu2 %v4722_v48 }
 0xa35   :  { %3394 = vmatpush.msrb.mxu3 %v4722_v48 }
 0xa36   :  { %v5839_v53 = vadd.f32 %v4614_v18, %v2822_v50  ;;  %3363 = vmatpush.msrb.mxu2 %v4723_v25 }
 0xa37   :  { %3395 = vmatpush.msrb.mxu3 %v4723_v25 }
 0xa38   :  { %v2830_v17 = vpack.c.bf16 %v5839_v53, %v5839_v53  ;;  %3347 = vmatpush.bf16.msrb.mxu1 %v4554_v40  ;;  %3364 = vmatpush.msrb.mxu2 %v4724_v63 }
 0xa39   :  { %3396 = vmatpush.msrb.mxu3 %v4724_v63 }
 0xa3a   :  { %3365 = vmatpush.msrb.mxu2 %v4725_v39 }
 0xa3b   :  { %3397 = vmatpush.msrb.mxu3 %v4725_v39 }
 0xa3c   :  { %3348 = vmatpush.bf16.msrb.mxu1 %v4553_v20  ;;  %3366 = vmatpush.msrb.mxu2 %v4726_v32 }
 0xa3d   :  { %3398 = vmatpush.msrb.mxu3 %v4726_v32 }
 0xa3e   :  { %3367 = vmatpush.msrb.mxu2 %v4727_v3 }
 0xa3f   :  { %3399 = vmatpush.msrb.mxu3 %v4727_v3 }
 0xa40   :  { %3368 = vmatpush.msrb.mxu2 %v4728_v36 }
 0xa41   :  { %3400 = vmatpush.msrb.mxu3 %v4728_v36 }
 0xa42   :  { %3013 = vmatmul.bf16.gmra.mxu2 %v2830_v17  ;;  %3031 = vmatmul.bf16.gmra.mxu3 %v2830_v17 }
 0xa43   :  { %3049 = vmatmul.bf16.gmra.mxu0 %v2830_v17  ;;  %3067 = vmatmul.bf16.gmra.mxu1 %v2830_v17 }
 0xa44   :  { %3369 = vmatpush.msrb.mxu2 %v4729_v4  ;;  %3401 = vmatpush.msrb.mxu3 %v4729_v4 }
 0xa46   :  { %3370 = vmatpush.msrb.mxu2 %v4730_v30  ;;  %3402 = vmatpush.msrb.mxu3 %v4730_v30 }
 0xa48   :  { %3371 = vmatpush.msrb.mxu2 %v4731_v41  ;;  %3403 = vmatpush.msrb.mxu3 %v4731_v41 }
 0xa4a   :  { %3372 = vmatpush.msrb.mxu2 %v4732_v57  ;;  %3404 = vmatpush.msrb.mxu3 %v4732_v57 }
 0xa4c   :  { %3373 = vmatpush.msrb.mxu2 %v4733_v16  ;;  %3405 = vmatpush.msrb.mxu3 %v4733_v16 }
 0xa4e   :  { %3374 = vmatpush.msrb.mxu2 %v4734_v2  ;;  %3406 = vmatpush.msrb.mxu3 %v4734_v2 }
 0xa50   :  { %3375 = vmatpush.msrb.mxu2 %v4735_v7  ;;  %3407 = vmatpush.msrb.mxu3 %v4735_v7 }
 0xa52   :  { %3376 = vmatpush.msrb.mxu2 %v4736_v61  ;;  %3408 = vmatpush.msrb.mxu3 %v4736_v61 }
 0xa54   :  { %3377 = vmatpush.msrb.mxu2 %v4737_v19  ;;  %3409 = vmatpush.msrb.mxu3 %v4737_v19 }
 0xab0   :  { %v3045_v52 = vpop.f32.mrf.mxu0  ;;  %v3063_v38 = vpop.f32.mrf.mxu1 }
 0xab1   :  { %v3046_v6 = vadd.f32 %v3045_v52, %v2834_v5  ;;  %v3064_v44 = vadd.f32 %v3063_v38, %v2835_v26 }
 0xab3   :  { %v3074_v51 = vmax.f32 %v3046_v6, 0.0  ;;  %v3075_v18 = vmax.f32 %v3064_v44, 0.0 }
 0xab5   :  { %v3009_v27 = vpop.f32.mrf.mxu2  ;;  %v3027_v1 = vpop.f32.mrf.mxu3 }
 0xab6   :  { %v3010_v28 = vadd.f32 %v3009_v27, %v2832_v9  ;;  %v3028_v24 = vadd.f32 %v3027_v1, %v2833_v12 }
 0xab8   :  { %v3047_v11 = vpop.f32.mrf.mxu0  ;;  %v3065_v45 = vpop.f32.mrf.mxu1  ;;  %v3072_v50 = vmax.f32 %v3010_v28, 0.0  ;;  %v3073_v17 = vmax.f32 %v3028_v24, 0.0 }
 0xab9   :  { %v3048_v47 = vadd.f32 %v3047_v11, %v2834_v5  ;;  %v3066_v56 = vadd.f32 %v3065_v45, %v2835_v26 }
 0xabb   :  { %v3078_v22 = vmax.f32 %v3048_v47, 0.0  ;;  %v3079_v0 = vmax.f32 %v3066_v56, 0.0 }
 0xabd   :  { %v3086_v29 = vpack.c.bf16 %v3078_v22, %v3074_v51  ;;  %v3087_v33 = vpack.c.bf16 %v3079_v0, %v3075_v18  ;;  %v3011_v35 = vpop.f32.mrf.mxu2  ;;  %v3029_v37 = vpop.f32.mrf.mxu3 }
 0xabe   :  { %v3012_v31 = vadd.f32 %v3011_v35, %v2832_v9  ;;  %v3030_v42 = vadd.f32 %v3029_v37, %v2833_v12 }
 0xabf   :  { %3331 = vmatmul.bf16.vlgmr.msrb.gmra.mxu0 %v3086_v29  ;;  %3349 = vmatmul.bf16.vlgmr.msrb.gmra.mxu1 %v3087_v33 }
 0xac0   :  { %v3076_v15 = vmax.f32 %v3012_v31, 0.0  ;;  %v3077_v54 = vmax.f32 %v3030_v42, 0.0  ;;  %v3050_v46 = vpop.f32.mrf.mxu0  ;;  %v3068_v55 = vpop.f32.mrf.mxu1 }
 0xac1   :  { %v3051_v58 = vadd.f32 %v3050_v46, %v2834_v5  ;;  %v3069_v40 = vadd.f32 %v3068_v55, %v2835_v26  ;;  %v4615_v26 = vld [vmem:[%s5869_s14 + $0x1] ss:$0 sm:$0xff] }
 0xac2   :  { %v3084_v8 = vpack.c.bf16 %v3076_v15, %v3072_v50  ;;  %v3085_v59 = vpack.c.bf16 %v3077_v54, %v3073_v17 }
 0xac3   :  { %v3082_v43 = vmax.f32 %v3051_v58, 0.0  ;;  %v3083_v23 = vmax.f32 %v3069_v40, 0.0 }
 0xac4   :  { %3295 = vmatmul.bf16.vlgmr.msra.gmra.mxu2 %v3084_v8  ;;  %3313 = vmatmul.bf16.vlgmr.msra.gmra.mxu3 %v3085_v59 }
 0xac5   :  { %v3014_v10 = vpop.f32.mrf.mxu2  ;;  %v3032_v60 = vpop.f32.mrf.mxu3  ;;  %v3090_v48 = vpack.c.bf16 %v3082_v43, %v3082_v43  ;;  %v3091_v25 = vpack.c.bf16 %v3083_v23, %v3083_v23 }
 0xac6   :  { %v3015_v21 = vadd.f32 %v3014_v10, %v2832_v9  ;;  %v3033_v34 = vadd.f32 %v3032_v60, %v2833_v12 }
 0xac8   :  { %v3052_v62 = vpop.f32.mrf.mxu0  ;;  %v3070_v20 = vpop.f32.mrf.mxu1  ;;  %v3080_v32 = vmax.f32 %v3015_v21, 0.0  ;;  %v3081_v3 = vmax.f32 %v3033_v34, 0.0  ;;  %v4617_v21 = vld [vmem:[%s5873_s18 + $0x1] ss:$0 sm:$0xff] }
 0xac9   :  { %v4616_v20 = vld [vmem:[#allocation23 + $0x1] ss:$0 sm:$0xff] }
 0xaca   :  { %v3088_v36 = vpack.c.bf16 %v3080_v32, %v3080_v32  ;;  %v3089_v49 = vpack.c.bf16 %v3081_v3, %v3081_v3 }
 0xacd   :  { %v3016_v63 = vpop.f32.mrf.mxu2  ;;  %v3034_v39 = vpop.f32.mrf.mxu3 }
 0xacf   :  { %3336 = vmatmul.bf16.gmra.mxu0 %v3090_v48  ;;  %3354 = vmatmul.bf16.gmra.mxu1 %v3091_v25 }
 0xad4   :  { %3300 = vmatmul.bf16.gmra.mxu2 %v3088_v36  ;;  %3318 = vmatmul.bf16.gmra.mxu3 %v3089_v49 }
 0xb3c   :  { %v3332_v52 = vpop.f32.mrf.mxu0  ;;  %v3350_v38 = vpop.f32.mrf.mxu1 }
 0xb44   :  { %v3334_v4 = vpop.f32.mrf.mxu0  ;;  %v3352_v5 = vpop.f32.mrf.mxu1 }
 0xb47   :  { %v3296_v30 = vpop.f32.mrf.mxu2  ;;  %v3314_v27 = vpop.f32.mrf.mxu3 }
 0xb48   :  { %v3297_v1 = vadd.f32 %v4615_v26, %v3296_v30 }
 0xb4a   :  { %v3315_v41 = vadd.f32 %v3314_v27, %v3297_v1 }
 0xb4c   :  { %v3333_v6 = vadd.f32 %v3332_v52, %v3315_v41  ;;  %v3337_v44 = vpop.f32.mrf.mxu0  ;;  %v3355_v57 = vpop.f32.mrf.mxu1 }
 0xb4e   :  { %v3351_v9 = vadd.f32 %v3350_v38, %v3333_v6 }
 0xb4f   :  { %v3298_v12 = vpop.f32.mrf.mxu2  ;;  %v3316_v11 = vpop.f32.mrf.mxu3 }
 0xb50   :  { %v3359_v45 = vadd.f32 %v3351_v9, %v5832_v14  ;;  %v3299_v47 = vadd.f32 %v4615_v26, %v3298_v12 }
 0xb52   :  { %v3317_v56 = vadd.f32 %v3316_v11, %v3299_v47  ;;  %3378 = vmatmul.f32.vlgmr.msrb.gmra.mxu2 %v3359_v45 }
 0xb54   :  { %v3335_v16 = vadd.f32 %v3334_v4, %v3317_v56  ;;  %v3339_v51 = vpop.f32.mrf.mxu0  ;;  %v3357_v18 = vpop.f32.mrf.mxu1 }
 0xb56   :  { %v3353_v22 = vadd.f32 %v3352_v5, %v3335_v16 }
 0xb57   :  { %v3301_v0 = vpop.f32.mrf.mxu2  ;;  %v3319_v2 = vpop.f32.mrf.mxu3 }
 0xb58   :  { %v3302_v28 = vadd.f32 %v4615_v26, %v3301_v0  ;;  %v3360_v24 = vadd.f32 %v3353_v22, %v5834_v13 }
 0xb5a   :  { %v3320_v29 = vadd.f32 %v3319_v2, %v3302_v28  ;;  %3381 = vmatmul.f32.gmra.mxu2 %v3360_v24 }
 0xb5c   :  { %v3338_v33 = vadd.f32 %v3337_v44, %v3320_v29 }
 0xb5e   :  { %v3356_v35 = vadd.f32 %v3355_v57, %v3338_v33 }
 0xb5f   :  { %v3303_v37 = vpop.f32.mrf.mxu2  ;;  %v3321_v7 = vpop.f32.mrf.mxu3 }
 0xb60   :  { %v3361_v14 = vadd.f32 %v3356_v35, %v5839_v53 }
 0xb62   :  { %3384 = vmatmul.f32.gmra.mxu2 %v3361_v14 }
 0xbd5   :  { %v3379_v31 = vpop.f32.mrf.mxu2 }
 0xbd6   :  { %v3388_v42 = vsub.f32 %v3359_v45, %v3379_v31 }
 0xbd8   :  { %v3391_v50 = vmul.f32 %v3388_v42, %v3388_v42 }
 0xbda   :  { %3410 = vmatmul.f32.vlgmr.msrb.gmra.mxu3 %v3391_v50 }
 0xbdd   :  { %v3382_v17 = vpop.f32.mrf.mxu2 }
 0xbde   :  { %v3389_v15 = vsub.f32 %v3360_v24, %v3382_v17 }
 0xbe0   :  { %v3392_v54 = vmul.f32 %v3389_v15, %v3389_v15 }
 0xbe2   :  { %3413 = vmatmul.f32.gmra.mxu3 %v3392_v54 }
 0xbe5   :  { %v3385_v46 = vpop.f32.mrf.mxu2 }
 0xbe6   :  { %v3390_v55 = vsub.f32 %v3361_v14, %v3385_v46 }
 0xbe8   :  { %v3393_v13 = vmul.f32 %v3390_v55, %v3390_v55 }
 0xbea   :  { %3415 = vmatmul.f32.gmra.mxu3 %v3393_v13 }
 0xc5d   :  { %v3411_v61 = vpop.f32.mrf.mxu3 }
 0xc5e   :  { %v3412_v8 = vadd.f32 1e-05, %v3411_v61 }
 0xc60   :  { %4684 = vrsqrt.f32 %v3412_v8  ;;  %vm3424_vm8 = vweird.f32 %v3412_v8 }
 0xc65   :  { %v3414_v59 = vpop.f32.mrf.mxu3 }
 0xc66   :  { %v4685_v19 = vpop.eup %4684 }
 0xc67   :  { %v3419_v58 = vmul.f32 %v4685_v19, %v3412_v8  ;;  %vm3425_vm7 = vweird.f32 %v4685_v19 }
 0xc68   :  { %vm3426_vm9 = vmor %vm3424_vm8, %vm3425_vm7 }
 0xc69   :  { %v3420_v53 = vmul.f32 %v4685_v19, %v3419_v58 }
 0xc6b   :  { %v3421_v40 = vmul.f32 0.5, %v3420_v53 }
 0xc6d   :  { %v3422_v10 = vsub.f32 1.5, %v3421_v40  ;;  %v3416_v60 = vpop.f32.mrf.mxu3 }
 0xc6f   :  { %v3423_v62 = vmul.f32 %v4685_v19, %v3422_v10 }
 0xc71   :  { %v3427_v43 = vsel %vm3426_vm9, %v4685_v19, %v3423_v62 }
 0xc72   :  { %v3428_v23 = vmul.f32 %v3427_v43, %v3388_v42 }
 0xc74   :  { %v3432_v34 = vmul.f32 %v4616_v20, %v3428_v23 }
 0xc76   :  { %v3436_v48 = vadd.f32 %v4617_v21, %v3432_v34 }
 0xc78   :  { %3437 = vst [vmem:[#allocation26] sm:$0xff] %v3436_v48 }
 0xc79   :  { %3448 = dma.vmem_to_hbm [thread:$0]  %s3444_s2, 128, %s3446_s23, [#allocation5]  }
 0xc7a   :  { %5114 = dma.done.wait [#allocation5], 128  }
 0xc7b   :  { %5115 = vsyncadd [#allocation5], 4294967168 }
 0xc7c   :  { %3453 = vsyncpa [#allocation4], 1 }
 0xc7d   :  { %3454 = vsyncpa [#allocation7], 1 }
 0xc7e   :  { %3455 = vsyncpa [#allocation10], 1 }
 0xc7f   :  { %3456 = vsyncpa [#allocation13], 1 }
 0xc80   :  { %3457 = vsyncpa [#allocation16], 1 }
 0xc81   :  { %3458 = vsyncpa [#allocation19], 1 }
 0xc82   :  { %3459 = vsyncpa [#allocation22], 1 }
 0xc83   :  { %3460 = vsyncpa [#allocation25], 1 }
 0xc84   :  { %3461 = vsyncpa [#allocation5], 1 }

</bundles_post_ra>
